<compile_context>
chip_gen: v5e
topology: v5e:2x2
jax: 0.10.0
libtpu: 0.0.40
codegen_flags: <defaults>
</compile_context>

<pallas_src>
import functools

import jax
import jax.numpy as jnp
from jax import lax
from jax.experimental import pallas as pl
from jax.experimental.pallas import tpu as pltpu


def _round_up(x, m):
    return ((x + m - 1) // m) * m


def _gat_fused_kernel(t_ref, adj_ref, z_ref, out_ref, *, num_heads, head_dim,
                      s_lane, apply_elu):
    # t_ref   : (H, 1, TD)  f32  per-destination logits  t_j = z_j . a_dst
    # adj_ref : (N, TD)     int8 adjacency mask adj[src, dst]
    # z_ref   : (H, N, Fz)  f32  block-layout features: head h's z in lanes
    #                            [h*D,(h+1)*D), its source logit s_i in lane s_lane+h
    # out_ref : (TD, Fo)    f32  concatenated head outputs for this dst tile
    del head_dim  # layout is encoded in s_lane / lane placement

    # Hoisted out of the head loop: one int8 -> f32 unpack per dst tile.
    mask = adj_ref[...].astype(jnp.float32)                     # (N, TD)

    acc = None
    for hh in range(num_heads):                                 # small H -> static unroll
        zh = z_ref[hh]                                          # (N, Fz)
        s = z_ref[hh, :, s_lane + hh:s_lane + hh + 1]           # (N, 1) src logit (pad lane)
        t = t_ref[hh]                                           # (1, TD) dst logit
        e = s + t                                               # (N, TD) edge logits
        e = jnp.maximum(e, 0.01 * e)                            # F.leaky_relu, 2 VPU ops
        # Mask once, after exp: the unmasked max still upper-bounds edge logits,
        # exp(e - m) <= 1 for every entry, then non-edges are zeroed by the multiply.
        m = jnp.max(e, axis=0, keepdims=True)                   # (1, TD)
        p = jnp.exp(e - m) * mask                               # (N, TD)
        denom = jnp.sum(p, axis=0, keepdims=True)               # (1, TD)
        denom = jnp.maximum(denom, 1e-30)                       # isolated dst -> 0 row, not NaN
        inv = pl.reciprocal(denom, approx=True)                 # EUP slot (otherwise idle)
        inv = inv * (2.0 - denom * inv)                         # one Newton step -> ~f32 accuracy
        alpha = p * inv                                         # (N, TD)
        # out_tile += alpha^T @ z_blk : contract axis 0 directly on the MXU (no
        # transpose); the block lane layout makes the sum land pre-concatenated.
        contrib = lax.dot_general(alpha, zh,
                                  dimension_numbers=(((0,), (0,)), ((), ())),
                                  preferred_element_type=jnp.float32)   # (TD, Fz)
        acc = contrib if acc is None else acc + contrib

    if apply_elu:                                               # fused F.elu epilogue (layer 1)
        acc = jnp.where(acc > 0, acc, jnp.exp(jnp.minimum(acc, 0.0)) - 1.0)
    if acc.shape[-1] != out_ref.shape[-1]:                      # drop extra s-lane tile if any
        acc = acc[:, :out_ref.shape[-1]]
    out_ref[...] = acc.astype(out_ref.dtype)


def _pick_dst_tile(np_dst, n_src, num_heads, fz, budget=24 * 1024 * 1024):
    """Widest lane-aligned dst tile whose VMEM footprint stays under budget."""
    for td in (512, 256, 128):
        if np_dst % td == 0:
            vmem = (2 * n_src * td                    # double-buffered int8 adj tile
                    + 2 * num_heads * n_src * fz * 4  # resident z block (2 buffers)
                    + 2 * td * fz * 4)                # output block
            if vmem <= budget:
                return td
    return 128


def multi_head_gat_layer(h, fc_w, attn_w, adj_i8, *, apply_elu=False):
    """One MultiHeadGATLayer (merge='cat'), all heads fused into one kernel.

    h      : (N, in_dim)            f32 node features
    fc_w   : (H, out_dim, in_dim)   f32 per-head nn.Linear weight (no bias)
    attn_w : (H, 1, 2*out_dim)      f32 per-head attn_fc weight (no bias)
    adj_i8 : (N, N)                 int8 mask, adj[src, dst] = 1 for edge src->dst
    returns: (N, H*out_dim) concatenated head outputs (ELU applied if apply_elu).
    """
    N = h.shape[0]
    H, D, _ = fc_w.shape
    F_out = H * D
    Fo = _round_up(F_out, 128)                 # lane-dense concatenated output width
    s_lane = F_out                             # src logits live in the pad lanes
    Fz = Fo if F_out + H <= Fo else _round_up(F_out + H, 128)

    # Small O(N*D) precompute in plain XLA (not recomputed per dst tile).
    z = jnp.einsum('ni,hdi->hnd', h, fc_w)                       # (H, N, D)
    s = jnp.einsum('hnd,hd->hn', z, attn_w[:, 0, :D])            # (H, N)  z_i . a_src
    t = jnp.einsum('hnd,hd->hn', z, attn_w[:, 0, D:])            # (H, N)  z_j . a_dst

    # Block-layout z (+ folded s): avoids a separate (N,1) input (128x VMEM pad)
    # and lets the matmuls write the concatenated layout directly.
    z_aug = jnp.zeros((H, N, Fz), jnp.float32)
    for hh in range(H):
        z_aug = z_aug.at[hh, :, hh * D:(hh + 1) * D].set(z[hh])
        z_aug = z_aug.at[hh, :, s_lane + hh].set(s[hh])

    # Pad the destination axis to a lane multiple: keeps dst tiles in {128,256,512},
    # stores unmasked, and the adj DMA pipeline with >1 grid step.
    Np = _round_up(N, 128)
    if Np != N:
        adj_p = jnp.zeros((N, Np), jnp.int8).at[:, :N].set(adj_i8)
        adj_p = adj_p.at[0, N:].set(1)         # dummy edge so discarded padded rows stay finite
        t_p = jnp.pad(t, ((0, 0), (0, Np - N)))
    else:
        adj_p, t_p = adj_i8, t
    t_p = t_p[:, None, :]                      # (H, 1, Np)

    TD = _pick_dst_tile(Np, N, H, Fz)
    grid = (Np // TD,)                         # heads fused: adj streams exactly once

    kernel = functools.partial(_gat_fused_kernel, num_heads=H, head_dim=D,
                               s_lane=s_lane, apply_elu=apply_elu)

    out = pl.pallas_call(
        kernel,
        out_shape=jax.ShapeDtypeStruct((Np, Fo), jnp.float32),
        grid_spec=pltpu.PrefetchScalarGridSpec(
            num_scalar_prefetch=0,
            grid=grid,
            in_specs=[
                pl.BlockSpec((H, 1, TD), lambda i: (0, 0, i)),    # t  (per-dst logits)
                pl.BlockSpec((N, TD), lambda i: (0, i)),          # adj (int8, dominant stream)
                pl.BlockSpec((H, N, Fz), lambda i: (0, 0, 0)),    # z_aug (resident, no re-DMA)
            ],
            out_specs=pl.BlockSpec((TD, Fo), lambda i: (i, 0)),
        ),
        compiler_params=pltpu.CompilerParams(
            dimension_semantics=("parallel",),
            vmem_limit_bytes=32 * 1024 * 1024,
        ),
        cost_estimate=pl.CostEstimate(
            flops=2 * H * N * Np * Fz + 8 * H * N * Np,
            transcendentals=H * N * Np,
            bytes_accessed=N * Np + 4 * (H * N * Fz + Np * Fo + H * Np),
        ),
    )(t_p, adj_p, z_aug)

    return out[:N, :F_out]                     # drop dst padding rows / lane padding cols


def graph_network(h, params, adj_i8):
    """GraphNetwork forward: layer1 (multi-head, concat) -> ELU -> layer2 (1 head)."""
    h1 = multi_head_gat_layer(h, params['l1_fc'], params['l1_attn'], adj_i8,
                              apply_elu=True)      # F.elu fused into kernel epilogue
    return multi_head_gat_layer(h1, params['l2_fc'], params['l2_attn'], adj_i8,
                                apply_elu=False)


# ----------------------------- pure-JAX reference -----------------------------

def _gat_layer_ref(h, fc_w, attn_w, adj):
    D = fc_w.shape[0]
    z = h @ fc_w.T
    s = z @ attn_w[0, :D]
    t = z @ attn_w[0, D:]
    e = s[:, None] + t[None, :]
    e = jnp.where(e >= 0, e, 0.01 * e)
    e = jnp.where(adj > 0, e, -1e30)
    alpha = jax.nn.softmax(e, axis=0) * (adj > 0)
    return alpha.T @ z


def graph_network_ref(h, params, adj):
    heads = [_gat_layer_ref(h, params['l1_fc'][k], params['l1_attn'][k], adj)
             for k in range(params['l1_fc'].shape[0])]
    h1 = jnp.concatenate(heads, axis=-1)
    h1 = jnp.where(h1 > 0, h1, jnp.exp(jnp.minimum(h1, 0.0)) - 1.0)   # F.elu
    return _gat_layer_ref(h1, params['l2_fc'][0], params['l2_attn'][0], adj)


def init_params(key, in_dim, hidden_dim, out_dim, num_heads):
    k1, k2, k3, k4 = jax.random.split(key, 4)
    return {
        'l1_fc': jax.random.normal(k1, (num_heads, hidden_dim, in_dim), jnp.float32) * 0.1,
        'l1_attn': jax.random.normal(k2, (num_heads, 1, 2 * hidden_dim), jnp.float32) * 0.1,
        'l2_fc': jax.random.normal(k3, (1, out_dim, num_heads * hidden_dim), jnp.float32) * 0.1,
        'l2_attn': jax.random.normal(k4, (1, 1, 2 * out_dim), jnp.float32) * 0.1,
    }


if __name__ == "__main__":
    key = jax.random.PRNGKey(0)
    k_h, k_g, k_p = jax.random.split(key, 3)

    # Small graph: N multiple of 128 -> 3 dst tiles of 128, heads fused per tile.
    N, in_dim, hidden_dim, out_dim, num_heads = 384, 16, 16, 8, 2

    params = init_params(k_p, in_dim, hidden_dim, out_dim, num_heads)
    h = jax.random.normal(k_h, (N, in_dim), jnp.float32)

    # Random sparse graph + self-loops (every node has >=1 incoming edge).
    adj_f = (jax.random.uniform(k_g, (N, N)) < 0.05).astype(jnp.float32)
    adj_f = jnp.maximum(adj_f, jnp.eye(N, dtype=jnp.float32))
    adj_i8 = adj_f.astype(jnp.int8)

    out = jax.jit(graph_network)(h, params, adj_i8)
    out = jax.block_until_ready(out)

    ref = graph_network_ref(h, params, adj_f)
    assert out.shape == (N, out_dim)
    max_err = float(jnp.max(jnp.abs(out - ref)))
    assert jnp.allclose(out, ref, atol=1e-3, rtol=1e-3), \
        f"mismatch vs reference (max abs err {max_err})"

    print("KERNEL_OK")
</pallas_src>

<mosaic_0001>
module attributes {stable_mosaic.version = 11 : i64} {
  func.func @_gat_fused_kernel(%arg0: i32, %arg1: memref<2x1x128xf32, #tpu.memory_space<vmem>>, %arg2: memref<384x128xi8, #tpu.memory_space<vmem>>, %arg3: memref<2x384x128xf32, #tpu.memory_space<vmem>>, %arg4: memref<128x128xf32, #tpu.memory_space<vmem>>) attributes {dimension_semantics = [#tpu.dimension_semantics<parallel>], iteration_bounds = array<i64: 3>, scalar_prefetch = 0 : i64, scratch_operands = 0 : i64, tpu.core_type = #tpu.core_type<tc>, window_params = [{transform_indices = @transform_0, window_bounds = array<i64: 2, 1, 128>}, {transform_indices = @transform_1, window_bounds = array<i64: 384, 128>}, {pipeline_mode = #tpu.pipeline_mode<synchronous>, transform_indices = @transform_2, window_bounds = array<i64: 2, 384, 128>}, {transform_indices = @transform_3, window_bounds = array<i64: 128, 128>}]} {
    %c0 = arith.constant 0 : index
    %c0_0 = arith.constant 0 : index
    %0 = vector.load %arg2[%c0, %c0_0] : memref<384x128xi8, #tpu.memory_space<vmem>>, vector<384x128xi8>
    %1 = arith.sitofp %0 : vector<384x128xi8> to vector<384x128xf32>
    %c0_1 = arith.constant 0 : index
    %c0_2 = arith.constant 0 : index
    %c0_3 = arith.constant 0 : index
    %2 = vector.load %arg3[%c0_1, %c0_2, %c0_3] : memref<2x384x128xf32, #tpu.memory_space<vmem>>, vector<1x384x128xf32>
    %3 = vector.shape_cast %2 : vector<1x384x128xf32> to vector<384x128xf32>
    %c0_4 = arith.constant 0 : index
    %c0_5 = arith.constant 0 : index
    %c32 = arith.constant 32 : index
    %4 = vector.load %arg3[%c0_4, %c0_5, %c32] : memref<2x384x128xf32, #tpu.memory_space<vmem>>, vector<1x384x1xf32>
    %5 = vector.shape_cast %4 : vector<1x384x1xf32> to vector<384x1xf32>
    %c0_6 = arith.constant 0 : index
    %c0_7 = arith.constant 0 : index
    %c0_8 = arith.constant 0 : index
    %6 = vector.load %arg1[%c0_6, %c0_7, %c0_8] : memref<2x1x128xf32, #tpu.memory_space<vmem>>, vector<1x1x128xf32>
    %7 = vector.shape_cast %6 : vector<1x1x128xf32> to vector<1x128xf32>
    %8 = vector.broadcast %5 : vector<384x1xf32> to vector<384x128xf32>
    %9 = vector.broadcast %7 : vector<1x128xf32> to vector<384x128xf32>
    %10 = arith.addf %8, %9 : vector<384x128xf32>
    %cst = arith.constant 0.00999999977 : f32
    %11 = vector.broadcast %cst : f32 to vector<384x128xf32>
    %12 = arith.mulf %11, %10 : vector<384x128xf32>
    %13 = arith.maximumf %10, %12 : vector<384x128xf32>
    %cst_9 = arith.constant dense<0xFF800000> : vector<128xf32>
    %14 = vector.multi_reduction <maximumf>, %13, %cst_9 [0] : vector<384x128xf32> to vector<128xf32>
    %15 = vector.shape_cast %14 : vector<128xf32> to vector<1x128xf32>
    %16 = vector.broadcast %15 : vector<1x128xf32> to vector<384x128xf32>
    %17 = arith.subf %13, %16 : vector<384x128xf32>
    %18 = math.exp %17 : vector<384x128xf32>
    %19 = arith.mulf %18, %1 : vector<384x128xf32>
    %cst_10 = arith.constant dense<0.000000e+00> : vector<128xf32>
    %20 = vector.multi_reduction <add>, %19, %cst_10 [0] : vector<384x128xf32> to vector<128xf32>
    %21 = vector.shape_cast %20 : vector<128xf32> to vector<1x128xf32>
    %cst_11 = arith.constant 1.000000e-30 : f32
    %22 = vector.broadcast %cst_11 : f32 to vector<1x128xf32>
    %23 = arith.maximumf %21, %22 : vector<1x128xf32>
    %24 = tpu.reciprocal %23 {approx = true} : vector<1x128xf32> -> vector<1x128xf32>
    %25 = arith.mulf %23, %24 : vector<1x128xf32>
    %cst_12 = arith.constant 2.000000e+00 : f32
    %26 = vector.broadcast %cst_12 : f32 to vector<1x128xf32>
    %27 = arith.subf %26, %25 : vector<1x128xf32>
    %28 = arith.mulf %24, %27 : vector<1x128xf32>
    %29 = vector.broadcast %28 : vector<1x128xf32> to vector<384x128xf32>
    %30 = arith.mulf %19, %29 : vector<384x128xf32>
    %cst_13 = arith.constant dense<0.000000e+00> : vector<128x128xf32>
    %31 = tpu.matmul %30, %3, %cst_13 {dimension_numbers = #tpu.dot_dimension_numbers<[0], [0], [1], [1], [0, 1, 1, 1], [], []>} : vector<384x128xf32>, vector<384x128xf32>, vector<128x128xf32> -> vector<128x128xf32>
    %c1 = arith.constant 1 : index
    %c0_14 = arith.constant 0 : index
    %c0_15 = arith.constant 0 : index
    %32 = vector.load %arg3[%c1, %c0_14, %c0_15] : memref<2x384x128xf32, #tpu.memory_space<vmem>>, vector<1x384x128xf32>
    %33 = vector.shape_cast %32 : vector<1x384x128xf32> to vector<384x128xf32>
    %c1_16 = arith.constant 1 : index
    %c0_17 = arith.constant 0 : index
    %c33 = arith.constant 33 : index
    %34 = vector.load %arg3[%c1_16, %c0_17, %c33] : memref<2x384x128xf32, #tpu.memory_space<vmem>>, vector<1x384x1xf32>
    %35 = vector.shape_cast %34 : vector<1x384x1xf32> to vector<384x1xf32>
    %c1_18 = arith.constant 1 : index
    %c0_19 = arith.constant 0 : index
    %c0_20 = arith.constant 0 : index
    %36 = vector.load %arg1[%c1_18, %c0_19, %c0_20] : memref<2x1x128xf32, #tpu.memory_space<vmem>>, vector<1x1x128xf32>
    %37 = vector.shape_cast %36 : vector<1x1x128xf32> to vector<1x128xf32>
    %38 = vector.broadcast %35 : vector<384x1xf32> to vector<384x128xf32>
    %39 = vector.broadcast %37 : vector<1x128xf32> to vector<384x128xf32>
    %40 = arith.addf %38, %39 : vector<384x128xf32>
    %cst_21 = arith.constant 0.00999999977 : f32
    %41 = vector.broadcast %cst_21 : f32 to vector<384x128xf32>
    %42 = arith.mulf %41, %40 : vector<384x128xf32>
    %43 = arith.maximumf %40, %42 : vector<384x128xf32>
    %cst_22 = arith.constant dense<0xFF800000> : vector<128xf32>
    %44 = vector.multi_reduction <maximumf>, %43, %cst_22 [0] : vector<384x128xf32> to vector<128xf32>
    %45 = vector.shape_cast %44 : vector<128xf32> to vector<1x128xf32>
    %46 = vector.broadcast %45 : vector<1x128xf32> to vector<384x128xf32>
    %47 = arith.subf %43, %46 : vector<384x128xf32>
    %48 = math.exp %47 : vector<384x128xf32>
    %49 = arith.mulf %48, %1 : vector<384x128xf32>
    %cst_23 = arith.constant dense<0.000000e+00> : vector<128xf32>
    %50 = vector.multi_reduction <add>, %49, %cst_23 [0] : vector<384x128xf32> to vector<128xf32>
    %51 = vector.shape_cast %50 : vector<128xf32> to vector<1x128xf32>
    %cst_24 = arith.constant 1.000000e-30 : f32
    %52 = vector.broadcast %cst_24 : f32 to vector<1x128xf32>
    %53 = arith.maximumf %51, %52 : vector<1x128xf32>
    %54 = tpu.reciprocal %53 {approx = true} : vector<1x128xf32> -> vector<1x128xf32>
    %55 = arith.mulf %53, %54 : vector<1x128xf32>
    %cst_25 = arith.constant 2.000000e+00 : f32
    %56 = vector.broadcast %cst_25 : f32 to vector<1x128xf32>
    %57 = arith.subf %56, %55 : vector<1x128xf32>
    %58 = arith.mulf %54, %57 : vector<1x128xf32>
    %59 = vector.broadcast %58 : vector<1x128xf32> to vector<384x128xf32>
    %60 = arith.mulf %49, %59 : vector<384x128xf32>
    %cst_26 = arith.constant dense<0.000000e+00> : vector<128x128xf32>
    %61 = tpu.matmul %60, %33, %cst_26 {dimension_numbers = #tpu.dot_dimension_numbers<[0], [0], [1], [1], [0, 1, 1, 1], [], []>} : vector<384x128xf32>, vector<384x128xf32>, vector<128x128xf32> -> vector<128x128xf32>
    %62 = arith.addf %31, %61 : vector<128x128xf32>
    %cst_27 = arith.constant 0.000000e+00 : f32
    %63 = vector.broadcast %cst_27 : f32 to vector<128x128xf32>
    %64 = arith.cmpf ogt, %62, %63 : vector<128x128xf32>
    %cst_28 = arith.constant 0.000000e+00 : f32
    %65 = vector.broadcast %cst_28 : f32 to vector<128x128xf32>
    %66 = arith.minimumf %62, %65 : vector<128x128xf32>
    %67 = math.exp %66 : vector<128x128xf32>
    %cst_29 = arith.constant 1.000000e+00 : f32
    %68 = vector.broadcast %cst_29 : f32 to vector<128x128xf32>
    %69 = arith.subf %67, %68 : vector<128x128xf32>
    %70 = arith.select %64, %62, %69 : vector<128x128xi1>, vector<128x128xf32>
    %c0_30 = arith.constant 0 : index
    %c0_31 = arith.constant 0 : index
    %71 = vector.load %arg4[%c0_30, %c0_31] : memref<128x128xf32, #tpu.memory_space<vmem>>, vector<128x128xf32>
    tpu.vector_store %arg4[%c0_30, %c0_31], %70 {strides = array<i32>} : memref<128x128xf32, #tpu.memory_space<vmem>>, vector<128x128xf32>,
    return
  }
  func.func @transform_0(%arg0: i32) -> (i32, i32, i32) {
    %c0_i32 = arith.constant 0 : i32
    %c0_i32_0 = arith.constant 0 : i32
    %c0_i32_1 = arith.constant 0 : i32
    return %c0_i32, %c0_i32_0, %arg0 : i32, i32, i32
  }
  func.func @transform_1(%arg0: i32) -> (i32, i32) {
    %c0_i32 = arith.constant 0 : i32
    %c0_i32_0 = arith.constant 0 : i32
    return %c0_i32, %arg0 : i32, i32
  }
  func.func @transform_2(%arg0: i32) -> (i32, i32, i32) {
    %c0_i32 = arith.constant 0 : i32
    %c0_i32_0 = arith.constant 0 : i32
    %c0_i32_1 = arith.constant 0 : i32
    %c0_i32_2 = arith.constant 0 : i32
    return %c0_i32, %c0_i32_0, %c0_i32_1 : i32, i32, i32
  }
  func.func @transform_3(%arg0: i32) -> (i32, i32) {
    %c0_i32 = arith.constant 0 : i32
    %c0_i32_0 = arith.constant 0 : i32
    return %arg0, %c0_i32 : i32, i32
  }
}

module attributes {stable_mosaic.version = 11 : i64} {
  func.func @_gat_fused_kernel(%arg0: i32, %arg1: memref<1x1x128xf32, #tpu.memory_space<vmem>>, %arg2: memref<384x128xi8, #tpu.memory_space<vmem>>, %arg3: memref<1x384x128xf32, #tpu.memory_space<vmem>>, %arg4: memref<128x128xf32, #tpu.memory_space<vmem>>) attributes {dimension_semantics = [#tpu.dimension_semantics<parallel>], iteration_bounds = array<i64: 3>, scalar_prefetch = 0 : i64, scratch_operands = 0 : i64, tpu.core_type = #tpu.core_type<tc>, window_params = [{transform_indices = @transform_0, window_bounds = array<i64: 1, 1, 128>}, {transform_indices = @transform_1, window_bounds = array<i64: 384, 128>}, {pipeline_mode = #tpu.pipeline_mode<synchronous>, transform_indices = @transform_2, window_bounds = array<i64: 1, 384, 128>}, {transform_indices = @transform_3, window_bounds = array<i64: 128, 128>}]} {
    %c0 = arith.constant 0 : index
    %c0_0 = arith.constant 0 : index
    %0 = vector.load %arg2[%c0, %c0_0] : memref<384x128xi8, #tpu.memory_space<vmem>>, vector<384x128xi8>
    %1 = arith.sitofp %0 : vector<384x128xi8> to vector<384x128xf32>
    %c0_1 = arith.constant 0 : index
    %c0_2 = arith.constant 0 : index
    %c0_3 = arith.constant 0 : index
    %2 = vector.load %arg3[%c0_1, %c0_2, %c0_3] : memref<1x384x128xf32, #tpu.memory_space<vmem>>, vector<1x384x128xf32>
    %3 = vector.shape_cast %2 : vector<1x384x128xf32> to vector<384x128xf32>
    %c0_4 = arith.constant 0 : index
    %c0_5 = arith.constant 0 : index
    %c8 = arith.constant 8 : index
    %4 = vector.load %arg3[%c0_4, %c0_5, %c8] : memref<1x384x128xf32, #tpu.memory_space<vmem>>, vector<1x384x1xf32>
    %5 = vector.shape_cast %4 : vector<1x384x1xf32> to vector<384x1xf32>
    %c0_6 = arith.constant 0 : index
    %c0_7 = arith.constant 0 : index
    %c0_8 = arith.constant 0 : index
    %6 = vector.load %arg1[%c0_6, %c0_7, %c0_8] : memref<1x1x128xf32, #tpu.memory_space<vmem>>, vector<1x1x128xf32>
    %7 = vector.shape_cast %6 : vector<1x1x128xf32> to vector<1x128xf32>
    %8 = vector.broadcast %5 : vector<384x1xf32> to vector<384x128xf32>
    %9 = vector.broadcast %7 : vector<1x128xf32> to vector<384x128xf32>
    %10 = arith.addf %8, %9 : vector<384x128xf32>
    %cst = arith.constant 0.00999999977 : f32
    %11 = vector.broadcast %cst : f32 to vector<384x128xf32>
    %12 = arith.mulf %11, %10 : vector<384x128xf32>
    %13 = arith.maximumf %10, %12 : vector<384x128xf32>
    %cst_9 = arith.constant dense<0xFF800000> : vector<128xf32>
    %14 = vector.multi_reduction <maximumf>, %13, %cst_9 [0] : vector<384x128xf32> to vector<128xf32>
    %15 = vector.shape_cast %14 : vector<128xf32> to vector<1x128xf32>
    %16 = vector.broadcast %15 : vector<1x128xf32> to vector<384x128xf32>
    %17 = arith.subf %13, %16 : vector<384x128xf32>
    %18 = math.exp %17 : vector<384x128xf32>
    %19 = arith.mulf %18, %1 : vector<384x128xf32>
    %cst_10 = arith.constant dense<0.000000e+00> : vector<128xf32>
    %20 = vector.multi_reduction <add>, %19, %cst_10 [0] : vector<384x128xf32> to vector<128xf32>
    %21 = vector.shape_cast %20 : vector<128xf32> to vector<1x128xf32>
    %cst_11 = arith.constant 1.000000e-30 : f32
    %22 = vector.broadcast %cst_11 : f32 to vector<1x128xf32>
    %23 = arith.maximumf %21, %22 : vector<1x128xf32>
    %24 = tpu.reciprocal %23 {approx = true} : vector<1x128xf32> -> vector<1x128xf32>
    %25 = arith.mulf %23, %24 : vector<1x128xf32>
    %cst_12 = arith.constant 2.000000e+00 : f32
    %26 = vector.broadcast %cst_12 : f32 to vector<1x128xf32>
    %27 = arith.subf %26, %25 : vector<1x128xf32>
    %28 = arith.mulf %24, %27 : vector<1x128xf32>
    %29 = vector.broadcast %28 : vector<1x128xf32> to vector<384x128xf32>
    %30 = arith.mulf %19, %29 : vector<384x128xf32>
    %cst_13 = arith.constant dense<0.000000e+00> : vector<128x128xf32>
    %31 = tpu.matmul %30, %3, %cst_13 {dimension_numbers = #tpu.dot_dimension_numbers<[0], [0], [1], [1], [0, 1, 1, 1], [], []>} : vector<384x128xf32>, vector<384x128xf32>, vector<128x128xf32> -> vector<128x128xf32>
    %c0_14 = arith.constant 0 : index
    %c0_15 = arith.constant 0 : index
    %32 = vector.load %arg4[%c0_14, %c0_15] : memref<128x128xf32, #tpu.memory_space<vmem>>, vector<128x128xf32>
    tpu.vector_store %arg4[%c0_14, %c0_15], %31 {strides = array<i32>} : memref<128x128xf32, #tpu.memory_space<vmem>>, vector<128x128xf32>,
    return
  }
  func.func @transform_0(%arg0: i32) -> (i32, i32, i32) {
    %c0_i32 = arith.constant 0 : i32
    %c0_i32_0 = arith.constant 0 : i32
    %c0_i32_1 = arith.constant 0 : i32
    return %c0_i32, %c0_i32_0, %arg0 : i32, i32, i32
  }
  func.func @transform_1(%arg0: i32) -> (i32, i32) {
    %c0_i32 = arith.constant 0 : i32
    %c0_i32_0 = arith.constant 0 : i32
    return %c0_i32, %arg0 : i32, i32
  }
  func.func @transform_2(%arg0: i32) -> (i32, i32, i32) {
    %c0_i32 = arith.constant 0 : i32
    %c0_i32_0 = arith.constant 0 : i32
    %c0_i32_1 = arith.constant 0 : i32
    %c0_i32_2 = arith.constant 0 : i32
    return %c0_i32, %c0_i32_0, %c0_i32_1 : i32, i32, i32
  }
  func.func @transform_3(%arg0: i32) -> (i32, i32) {
    %c0_i32 = arith.constant 0 : i32
    %c0_i32_0 = arith.constant 0 : i32
    return %arg0, %c0_i32 : i32, i32
  }
}

</mosaic_0001>

<bundles_post_ra>
// kernel: graph_network.2
= control target key start
LH: loop header
LB: loop body
LE: loop exit
PB: predicated region body
PF: predicated region fallthrough
CT: control target
= control target key end

     0   :  { %s3513_s12 = smov 0   ;;  %s3515_s13 = smov 0   ;;  %s5814_s0 = inlined_call_operand.vmem [shape: f32[2,1,384], index: 0, kind: input, shape index: {}]   ;;  %s5815_s1 = inlined_call_operand.vmem [shape: s8[384,384], index: 1, kind: input, shape index: {}]   ;;  %s5816_s2 = inlined_call_operand.vmem [shape: f32[2,384,128], index: 2, kind: input, shape index: {}]   ;;  %s5817_s3 = inlined_call_operand.vmem [shape: f32[384,128], index: 3, kind: output, shape index: {}]  }
   0x1   :  { %s3517_s14 = smov 0  }
   0x2 LB: > { %s2766_s15 = sadd.s32 4294967295, %s3485_s14   ;;  %s3530_s16 = sadd.s32 1, %s3485_s14   ;;  %s3485_s14 = sphi %s3517_s14, %s6338_s14   ;;  %s3481_s13 = sphi %s3515_s13, %s6337_s13   ;;  %s3477_s12 = sphi %s3513_s12, %s6336_s12  }
   0x3   : > { %s17_s17 = ssub.s32 %s3485_s14, %s3530_s16  ;;  %s20_s18 = sadd.s32 1, %s3481_s13 }
   0x4   : > { %p18_p0 = scmp.eq.s32.totalorder %s17_s17, 0  ;;  %p27_p1 = scmp.ne.s32.totalorder %s3481_s13, %s3477_s12 }
   0x5   : > { %p28_p2 = scmp.eq.s32.totalorder %s3485_s14, 0  ;;  %p2769_p4 = scmp.ge.s32.totalorder %s3485_s14, 3 }
   0x6   : > { %s3539_s19 = scalar_select %p18_p0, %s3481_s13, %s20_s18  }
   0x7   : > { %p29_p3 = por %p28_p2, %p27_p1  ;;  %129 = sbr.rel (%p2769_p4) target bundleno = 33 (0x21), region = 20 }
   0xc   : > { %132 = sbr.rel (!%p29_p3) target bundleno = 17 (0x11), region = 24  ;;  %s134_s20 = sand.u32 (%p29_p3), 1, %s3481_s13  }
   0xd   : > { %s137_s23 = scalar_lea.vmem (%p29_p3), %s5814_s0, %s3485_s14  ;;  %s2770_s24 = sshll.u32 (%p29_p3), %s134_s20, 1 }
   0xe   : > { %v154_v0 = vld [vmem:[%s137_s23] sm:$0x1] (%p29_p3)  ;;  %v156_v1 = vld [vmem:[%s137_s23 + $0x3] sm:$0x1] (%p29_p3)  ;;  %s136_s25 = scalar_lea.vmem (%p29_p3), [#allocation2], %s2770_s24 }
   0xf   : > { %155 = vst [vmem:[%s136_s25] sm:$0x1] (%p29_p3), %v154_v0 }
  0x10   : > { %157 = vst [vmem:[%s136_s25 + $0x1] sm:$0x1] (%p29_p3), %v156_v1 }
  0x11 PF: > { %177 = sbr.rel (!%p29_p3) target bundleno = 33 (0x21), region = 58  ;;  %s179_s26 = sand.u32 (%p29_p3), 1, %s3481_s13  }
  0x12   : > { %s2771_s27 = sshll.u32 (%p29_p3), %s3485_s14, 3  ;;  %s3019_s28 = smul.u32 (%p29_p3), 96, %s179_s26 }
  0x13   : > { %s183_s4 = scalar_lea.vmem (%p29_p3), %s5815_s1, %s2771_s27 }
  0x14   : > { %v234_v2 = vld [vmem:[%s183_s4] sm:$0xff] (%p29_p3)  ;;  %v236_v3 = vld [vmem:[%s183_s4 + $0x18] sm:$0xff] (%p29_p3)  ;;  %v238_v4 = vld [vmem:[%s183_s4 + $0x30] sm:$0xff] (%p29_p3)  ;;  %s181_s5 = scalar_lea.vmem (%p29_p3), [#allocation3], %s3019_s28 }
  0x15   : > { %235 = vst [vmem:[%s181_s5] sm:$0xff] (%p29_p3), %v234_v2  ;;  %v240_v5 = vld [vmem:[%s183_s4 + $0x48] sm:$0xff] (%p29_p3)  ;;  %v242_v6 = vld [vmem:[%s183_s4 + $0x60] sm:$0xff] (%p29_p3)  ;;  %v244_v7 = vld [vmem:[%s183_s4 + $0x78] sm:$0xff] (%p29_p3) }
  0x16   : > { %237 = vst [vmem:[%s181_s5 + $0x8] sm:$0xff] %v236_v3  ;;  %v246_v8 = vld [vmem:[%s183_s4 + $0x90] sm:$0xff]  ;;  %v248_v9 = vld [vmem:[%s183_s4 + $0xa8] sm:$0xff]  ;;  %v250_v10 = vld [vmem:[%s183_s4 + $0xc0] sm:$0xff] }
  0x17   : > { %239 = vst [vmem:[%s181_s5 + $0x10] sm:$0xff] %v238_v4  ;;  %v252_v11 = vld [vmem:[%s183_s4 + $0xd8] sm:$0xff]  ;;  %v254_v12 = vld [vmem:[%s183_s4 + $0xf0] sm:$0xff]  ;;  %v256_v13 = vld [vmem:[%s183_s4 + $0x108] sm:$0xff] }
  0x18   : > { %241 = vst [vmem:[%s181_s5 + $0x18] sm:$0xff] %v240_v5 }
  0x19   : > { %243 = vst [vmem:[%s181_s5 + $0x20] sm:$0xff] %v242_v6 }
  0x1a   : > { %245 = vst [vmem:[%s181_s5 + $0x28] sm:$0xff] %v244_v7 }
  0x1b   : > { %247 = vst [vmem:[%s181_s5 + $0x30] sm:$0xff] %v246_v8 }
  0x1c   : > { %249 = vst [vmem:[%s181_s5 + $0x38] sm:$0xff] %v248_v9 }
  0x1d   : > { %251 = vst [vmem:[%s181_s5 + $0x40] sm:$0xff] %v250_v10 }
  0x1e   : > { %253 = vst [vmem:[%s181_s5 + $0x48] sm:$0xff] %v252_v11 }
  0x1f   : > { %255 = vst [vmem:[%s181_s5 + $0x50] sm:$0xff] %v254_v12 }
  0x20   : > { %257 = vst [vmem:[%s181_s5 + $0x58] sm:$0xff] %v256_v13 }
  0x21 PF: > { %p2772_p5 = scmp.ge.s32.totalorder %s3485_s14, 1  ;;  %p262_p6 = scmp.lt.s32.totalorder %s3485_s14, 4 }
  0x23   : > { %p263_p7 = pnand %p2772_p5, %p262_p6 }
  0x25   : > { %266 = sbr.rel (%p263_p7) target bundleno = 1061 (0x425), region = 96 }
  0x2a   : > { %v3557_v14 = vld [vmem:[%s5816_s2 + $0x190] sm:$0xff]  ;;  %v421_v15 = vld [vmem:[%s5816_s2 + $0x20] sm:$0xff]  ;;  %s269_s17 = sand.u32 1, %s3477_s12   ;;  %v5818_v17 = vmov 33   ;;  %v3488_v18 = vmov 32   ;;  %v2783_v19 = vld [vmem:[%s5816_s2 + $0x1b8] sm:$0xff] }
  0x2b   : > { %v419_v16 = vld [vmem:[%s5816_s2 + $0x10] sm:$0xff]  ;;  %3051 = vset.pattern.permute.xlu0 %v5818_v17  ;;  %3048 = vset.pattern.permute.xlu2 %v3488_v18  ;;  %s2773_s18 = sshll.u32 %s269_s17, 1  ;;  %v422_v20 = vld [vmem:[%s5816_s2 + $0x28] sm:$0xff]  ;;  %v420_v21 = vld [vmem:[%s5816_s2 + $0x18] sm:$0xff]  ;;  %s3020_s7 = smul.u32 96, %s269_s17 }
  0x2c   : > { %3047 = vset.pattern.permute.xlu1 %v3488_v18  ;;  %1267 = vperm.xlu0 %3051, %v3557_v14   ;;  %s3572_s20 = scalar_lea.vmem [#allocation2], %s2773_s18  ;;  %v2786_v22 = vld [vmem:[%s5816_s2 + $0x1d0] sm:$0xff]  ;;  %v3589_v23 = vld [vmem:[%s5816_s2 + $0x188] sm:$0xff]  ;;  %v3594_v24 = vld [vmem:[%s5816_s2 + $0x180] sm:$0xff] }
  0x2d   : > { %488 = vperm.xlu2 %3048, %v421_v15   ;;  %478 = vperm.xlu1 %3047, %v419_v16   ;;  %v2789_v25 = vld [vmem:[%s5816_s2 + $0x1e8] sm:$0xff]  ;;  %v2780_v26 = vld [vmem:[%s5816_s2 + $0x1a0] sm:$0xff]  ;;  %v2779_v27 = vld [vmem:[%s5816_s2 + $0x198] sm:$0xff]  ;;  %s4174_s8 = scalar_lea.vmem [#allocation3], %s3020_s7  ;;  %s2774_s7 = sshll.u32 %s2766_s15, 4 }
  0x2e   : > { %v2791_v28 = vld [vmem:[%s5816_s2 + $0x1f8] sm:$0xff]  ;;  %v2790_v29 = vld [vmem:[%s5816_s2 + $0x1f0] sm:$0xff]  ;;  %v3618_v30 = vld [vmem:[%s5816_s2 + $0x200] sm:$0xff]  ;;  %p304_p8 = scmp.lt.s32.totalorder %s2774_s7, 47 }
  0x2f   : > { %2089 = vmatpush.msra.mxu0 %v2791_v28  ;;  %2843 = vmatpush.msra.mxu2 %v2791_v28  ;;  %v2788_v31 = vld [vmem:[%s5816_s2 + $0x1e0] sm:$0xff]  ;;  %v2782_v32 = vld [vmem:[%s5816_s2 + $0x1b0] sm:$0xff]  ;;  %v2781_v33 = vld [vmem:[%s5816_s2 + $0x1a8] sm:$0xff] }
  0x30   : > { %v2787_v34 = vld [vmem:[%s5816_s2 + $0x1d8] sm:$0xff]  ;;  %v2785_v36 = vld [vmem:[%s5816_s2 + $0x1c8] sm:$0xff]  ;;  %v2784_v38 = vld [vmem:[%s5816_s2 + $0x1c0] sm:$0xff]  ;;  %s6340_s7 = smov (!%p304_p8, %s2774_s7), 47 }
  0x31   : > { %2090 = vmatpush.msra.mxu0 %v2790_v29  ;;  %2844 = vmatpush.msra.mxu2 %v2790_v29  ;;  %v2807_v35 = vld [vmem:[%s5816_s2 + $0x278] sm:$0xff]  ;;  %v2798_v39 = vld [vmem:[%s5816_s2 + $0x230] sm:$0xff]  ;;  %v2801_v40 = vld [vmem:[%s5816_s2 + $0x248] sm:$0xff]  ;;  %s2775_s14 = sshll.u32 %s6340_s7, 3 }
  0x32   : > { %2154 = vmatpush.msra.mxu1 %v2807_v35  ;;  %2859 = vmatpush.msra.mxu3 %v2807_v35  ;;  %v3642_v37 = vld [vmem:[%s5816_s2 + $0x218] sm:$0xff]  ;;  %v2804_v41 = vld [vmem:[%s5816_s2 + $0x260] sm:$0xff]  ;;  %v2794_v42 = vld [vmem:[%s5816_s2 + $0x210] sm:$0xff]  ;;  %s5768_s12 = scalar_lea.vmem %s5817_s3, %s2775_s14 }
  0x33   : > { %2091 = vmatpush.msra.mxu0 %v2789_v25  ;;  %2845 = vmatpush.msra.mxu2 %v2789_v25  ;;  %v2793_v43 = vld [vmem:[%s5816_s2 + $0x208] sm:$0xff]  ;;  %v2806_v44 = vld [vmem:[%s5816_s2 + $0x270] sm:$0xff]  ;;  %v2803_v46 = vld [vmem:[%s5816_s2 + $0x258] sm:$0xff] }
  0x34   : > { %1292 = vperm.xlu0 %3051, %v2783_v19   ;;  %2155 = vmatpush.msra.mxu1 %v2806_v44  ;;  %v2805_v45 = vld [vmem:[%s5816_s2 + $0x268] sm:$0xff]  ;;  %v2796_v48 = vld [vmem:[%s5816_s2 + $0x220] sm:$0xff]  ;;  %v2802_v49 = vld [vmem:[%s5816_s2 + $0x250] sm:$0xff] }
  0x35   : > { %493 = vperm.xlu2 %3048, %v422_v20   ;;  %483 = vperm.xlu1 %3047, %v420_v21   ;;  %v2797_v47 = vld [vmem:[%s5816_s2 + $0x228] sm:$0xff]  ;;  %v2800_v50 = vld [vmem:[%s5816_s2 + $0x240] sm:$0xff]  ;;  %v2810_v51 = vld [vmem:[%s5816_s2 + $0x290] sm:$0xff] }
  0x36   : > { %2092 = vmatpush.msra.mxu0 %v2788_v31  ;;  %2846 = vmatpush.msra.mxu2 %v2788_v31  ;;  %v2799_v52 = vld [vmem:[%s5816_s2 + $0x238] sm:$0xff]  ;;  %v2813_v53 = vld [vmem:[%s5816_s2 + $0x2a8] sm:$0xff]  ;;  %v2816_v55 = vld [vmem:[%s5816_s2 + $0x2c0] sm:$0xff] }
  0x37   : > { %2860 = vmatpush.msra.mxu3 %v2806_v44  ;;  %2156 = vmatpush.msra.mxu1 %v2805_v45  ;;  %v2819_v57 = vld [vmem:[%s5816_s2 + $0x2d8] sm:$0xff]  ;;  %v2809_v58 = vld [vmem:[%s5816_s2 + $0x288] sm:$0xff]  ;;  %v2808_v59 = vld [vmem:[%s5816_s2 + $0x280] sm:$0xff] }
  0x38   : > { %2093 = vmatpush.msra.mxu0 %v2787_v34  ;;  %2847 = vmatpush.msra.mxu2 %v2787_v34  ;;  %v2822_v61 = vld [vmem:[%s5816_s2 + $0x2f0] sm:$0xff]  ;;  %v2812_v62 = vld [vmem:[%s5816_s2 + $0x2a0] sm:$0xff]  ;;  %v2811_v63 = vld [vmem:[%s5816_s2 + $0x298] sm:$0xff] }
  0x39   : > { %2861 = vmatpush.msra.mxu3 %v2805_v45  ;;  %2157 = vmatpush.msra.mxu1 %v2804_v41  ;;  %v3733_v3 = vld [vmem:[%s3572_s20 + $0x1] ss:$0 sm:$0xff]  ;;  %v2815_v6 = vld [vmem:[%s5816_s2 + $0x2b8] sm:$0xff]  ;;  %v2814_v7 = vld [vmem:[%s5816_s2 + $0x2b0] sm:$0xff] }
  0x3a   : > { %2094 = vmatpush.msra.mxu0 %v2786_v22  ;;  %2848 = vmatpush.msra.mxu2 %v2786_v22  ;;  %v417_v4 = vld [vmem:[%s5816_s2] sm:$0xff]  ;;  %v418_v13 = vld [vmem:[%s5816_s2 + $0x8] sm:$0xff] }
  0x3b   : > { %2862 = vmatpush.msra.mxu3 %v2804_v41  ;;  %2158 = vmatpush.msra.mxu1 %v2803_v46  ;;  %v2817_v20 = vld [vmem:[%s5816_s2 + $0x2c8] sm:$0xff] }
  0x3c   : > { %1307 = vperm.xlu0 %3051, %v2786_v22   ;;  %2095 = vmatpush.msra.mxu0 %v2785_v36 }
  0x3d   : > { %3050 = vset.pattern.permute.xlu2 %v5818_v17  ;;  %3049 = vset.pattern.permute.xlu1 %v5818_v17 }
  0x3e   : > { %1262 = vperm.xlu2 %3050, %v3589_v23   ;;  %1257 = vperm.xlu1 %3049, %v3594_v24  }
  0x3f   : > { %2849 = vmatpush.msra.mxu2 %v2785_v36  ;;  %2096 = vmatpush.msra.mxu0 %v2784_v38 }
  0x40   : > { %2863 = vmatpush.msra.mxu3 %v2803_v46  ;;  %2159 = vmatpush.msra.mxu1 %v2802_v49 }
  0x41   : > { %2850 = vmatpush.msra.mxu2 %v2784_v38  ;;  %2097 = vmatpush.msra.mxu0 %v2783_v19 }
  0x42   : > { %2864 = vmatpush.msra.mxu3 %v2802_v49  ;;  %2160 = vmatpush.msra.mxu1 %v2801_v40 }
  0x43   : > { %2098 = vmatpush.msra.mxu0 %v2782_v32  ;;  %2851 = vmatpush.msra.mxu2 %v2783_v19  ;;  %v2818_v19 = vld [vmem:[%s5816_s2 + $0x2d0] sm:$0xff] }
  0x44   : > { %1322 = vperm.xlu0 %3051, %v2789_v25   ;;  %2865 = vmatpush.msra.mxu3 %v2801_v40 }
  0x45   : > { %2099 = vmatpush.msra.mxu0 %v2781_v33  ;;  %2852 = vmatpush.msra.mxu2 %v2782_v32 }
  0x46   : > { %1277 = vperm.xlu2 %3050, %v2780_v26   ;;  %1272 = vperm.xlu1 %3049, %v2779_v27  }
  0x47   : > { %2100 = vmatpush.msra.mxu0 %v2780_v26  ;;  %2853 = vmatpush.msra.mxu2 %v2781_v33 }
  0x48   : > { %2161 = vmatpush.msra.mxu1 %v2800_v50  ;;  %2866 = vmatpush.msra.mxu3 %v2800_v50 }
  0x49   : > { %2101 = vmatpush.msra.mxu0 %v2779_v27  ;;  %2854 = vmatpush.msra.mxu2 %v2780_v26 }
  0x4a   : > { %2162 = vmatpush.msra.mxu1 %v2799_v52  ;;  %2867 = vmatpush.msra.mxu3 %v2799_v52 }
  0x4b   : > { %2102 = vmatpush.msra.mxu0 %v3557_v14  ;;  %2855 = vmatpush.msra.mxu2 %v2779_v27 }
  0x4c   : > { %1337 = vperm.xlu0 %3051, %v3618_v30   ;;  %2163 = vmatpush.msra.mxu1 %v2798_v39 }
  0x4d   : > { %2103 = vmatpush.msra.mxu0 %v3589_v23  ;;  %2856 = vmatpush.msra.mxu2 %v3557_v14 }
  0x4e   : > { %1287 = vperm.xlu2 %3050, %v2782_v32   ;;  %1282 = vperm.xlu1 %3049, %v2781_v33  }
  0x4f   : > { %2104 = vmatpush.msra.mxu0 %v3594_v24  ;;  %2857 = vmatpush.msra.mxu2 %v3589_v23 }
  0x50   : > { %2868 = vmatpush.msra.mxu3 %v2798_v39  ;;  %2164 = vmatpush.msra.mxu1 %v2797_v47 }
  0x51   : > { %2858 = vmatpush.msra.mxu2 %v3594_v24 }
  0x52   : > { %2869 = vmatpush.msra.mxu3 %v2797_v47  ;;  %2165 = vmatpush.msra.mxu1 %v2796_v48 }
  0x54   : > { %1352 = vperm.xlu0 %3051, %v3642_v37   ;;  %2870 = vmatpush.msra.mxu3 %v2796_v48 }
  0x55   : > { %2166 = vmatpush.msra.mxu1 %v3642_v37 }
  0x56   : > { %1302 = vperm.xlu2 %3050, %v2785_v36   ;;  %1297 = vperm.xlu1 %3049, %v2784_v38   ;;  %v2820_v36 = vld [vmem:[%s5816_s2 + $0x2e0] sm:$0xff] }
  0x57   : > { %2871 = vmatpush.msra.mxu3 %v3642_v37  ;;  %2167 = vmatpush.msra.mxu1 %v2794_v42 }
  0x59   : > { %2872 = vmatpush.msra.mxu3 %v2794_v42  ;;  %2168 = vmatpush.msra.mxu1 %v2793_v43 }
  0x5b   : > { %2873 = vmatpush.msra.mxu3 %v2793_v43  ;;  %2169 = vmatpush.msra.mxu1 %v3618_v30 }
  0x5c   : > { %1367 = vperm.xlu0 %3051, %v2798_v39  }
  0x5d   : > { %2874 = vmatpush.msra.mxu3 %v3618_v30  ;;  %v423_v30 = vld [vmem:[%s5816_s2 + $0x30] sm:$0xff] }
  0x5e   : > { %1317 = vperm.xlu2 %3050, %v2788_v31   ;;  %1312 = vperm.xlu1 %3049, %v2787_v34  }
  0x64   : > { %1382 = vperm.xlu0 %3051, %v2801_v40  }
  0x66   : > { %1332 = vperm.xlu2 %3050, %v2791_v28   ;;  %1327 = vperm.xlu1 %3049, %v2790_v29  }
  0x6c   : > { %1397 = vperm.xlu0 %3051, %v2804_v41  }
  0x6e   : > { %1347 = vperm.xlu2 %3050, %v2794_v42   ;;  %1342 = vperm.xlu1 %3049, %v2793_v43  }
  0x74   : > { %1412 = vperm.xlu0 %3051, %v2807_v35   ;;  %v2821_v35 = vld [vmem:[%s5816_s2 + $0x2e8] sm:$0xff] }
  0x76   : > { %1362 = vperm.xlu2 %3050, %v2797_v47   ;;  %1357 = vperm.xlu1 %3049, %v2796_v48   ;;  %v2823_v48 = vld [vmem:[%s5816_s2 + $0x2f8] sm:$0xff] }
  0x7c   : > { %1427 = vperm.xlu0 %3051, %v2810_v51  }
  0x7e   : > { %1377 = vperm.xlu2 %3050, %v2800_v50   ;;  %1372 = vperm.xlu1 %3049, %v2799_v52  }
  0x84   : > { %1442 = vperm.xlu0 %3051, %v2813_v53  }
  0x86   : > { %1392 = vperm.xlu2 %3050, %v2803_v46   ;;  %1387 = vperm.xlu1 %3049, %v2802_v49   ;;  %v424_v49 = vld [vmem:[%s5816_s2 + $0x38] sm:$0xff] }
  0x87   : > { %v3701_v54 = vpop.permute.xlu2 %488 }
  0x8c   : > { %1457 = vperm.xlu0 %3051, %v2816_v55  }
  0x8e   : > { %1407 = vperm.xlu2 %3050, %v2806_v44   ;;  %1402 = vperm.xlu1 %3049, %v2805_v45   ;;  %v425_v45 = vld [vmem:[%s5816_s2 + $0x40] sm:$0xff] }
  0x8f   : > { %v3708_v56 = vpop.permute.xlu2 %493 }
  0x94   : > { %1472 = vperm.xlu0 %3051, %v2819_v57  }
  0x96   : > { %1422 = vperm.xlu2 %3050, %v2809_v58   ;;  %1417 = vperm.xlu1 %3049, %v2808_v59  }
  0x98   : > { %v3719_v60 = vpop.permute.xlu2 %1262 }
  0x99   : > { %v1499_v50 = vadd.f32 %v3733_v3, %v3719_v60 }
  0x9b   : > { %v1547_v59 = vmul.f32 0.01, %v1499_v50 }
  0x9c   : > { %1487 = vperm.xlu0 %3051, %v2822_v61  }
  0x9e   : > { %1437 = vperm.xlu2 %3050, %v2812_v62   ;;  %1432 = vperm.xlu1 %3049, %v2811_v63   ;;  %v1268_v0 = vpop.permute.xlu0 %1267  ;;  %v430_v62 = vld [vmem:[%s5816_s2 + $0x68] sm:$0xff] }
  0x9f   : > { %v3730_v1 = vpop.permute.xlu1 %478  ;;  %v1500_v5 = vadd.f32 %v3733_v3, %v1268_v0 }
  0xa0   : > { %v1278_v2 = vpop.permute.xlu2 %1277 }
  0xa1   : > { %v1548_v9 = vmul.f32 0.01, %v1500_v5  ;;  %v1502_v15 = vadd.f32 %v3733_v3, %v1278_v2  ;;  %v426_v2 = vld [vmem:[%s5816_s2 + $0x48] sm:$0xff] }
  0xa3   : > { %v3752_v14 = vmax.f32 %v1500_v5, %v1548_v9  ;;  %v1550_v23 = vmul.f32 0.01, %v1502_v15  ;;  %v3819_v5 = vmax.f32 %v1499_v50, %v1547_v59 }
  0xa4   : > { %3052 = vset.pattern.permute.xlu0 %v3488_v18 }
  0xa5   : > { %468 = vperm.xlu0 %3052, %v417_v4   ;;  %v3770_v31 = vmax.f32 %v1502_v15, %v1550_v23  ;;  %v427_v4 = vld [vmem:[%s5816_s2 + $0x50] sm:$0xff] }
  0xa6   : > { %1452 = vperm.xlu2 %3050, %v2815_v6   ;;  %1447 = vperm.xlu1 %3049, %v2814_v7   ;;  %v1293_v8 = vpop.permute.xlu0 %1292 }
  0xa7   : > { %v3746_v10 = vpop.permute.xlu1 %483  ;;  %v1505_v32 = vadd.f32 %v3733_v3, %v1293_v8 }
  0xa8   : > { %v1288_v11 = vpop.permute.xlu2 %1287 }
  0xa9   : > { %v1504_v12 = vadd.f32 %v3733_v3, %v1288_v11  ;;  %v1553_v40 = vmul.f32 0.01, %v1505_v32 }
  0xab   : > { %v1552_v16 = vmul.f32 0.01, %v1504_v12  ;;  %v3792_v46 = vmax.f32 %v1505_v32, %v1553_v40 }
  0xad   : > { %v3761_v21 = vmax.f32 %v1504_v12, %v1552_v16  ;;  %473 = vperm.xlu0 %3052, %v418_v13  }
  0xae   : > { %1467 = vperm.xlu2 %3050, %v2818_v19   ;;  %1462 = vperm.xlu1 %3049, %v2817_v20   ;;  %v1308_v22 = vpop.permute.xlu0 %1307 }
  0xaf   : > { %v1644_v24 = vmax.f32 %v3752_v14, %v3761_v21  ;;  %v1508_v25 = vadd.f32 %v3733_v3, %v1308_v22  ;;  %v433_v22 = vld [vmem:[%s5816_s2 + $0x80] sm:$0xff] }
  0xb0   : > { %v1303_v26 = vpop.permute.xlu2 %1302  ;;  %v1258_v27 = vpop.permute.xlu1 %1257 }
  0xb1   : > { %v1556_v28 = vmul.f32 0.01, %v1508_v25  ;;  %v1498_v29 = vadd.f32 %v3733_v3, %v1258_v27  ;;  %v1507_v53 = vadd.f32 %v3733_v3, %v1303_v26  ;;  %v428_v26 = vld [vmem:[%s5816_s2 + $0x58] sm:$0xff]  ;;  %v429_v27 = vld [vmem:[%s5816_s2 + $0x60] sm:$0xff] }
  0xb3   : > { %v3773_v33 = vmax.f32 %v1508_v25, %v1556_v28  ;;  %v1546_v34 = vmul.f32 0.01, %v1498_v29  ;;  %v1555_v63 = vmul.f32 0.01, %v1507_v53 }
  0xb5   : > { %5977 = vst [vmem:[#allocation4_spill] sm:$0xff] %v3773_v33  ;;  %v3782_v37 = vmax.f32 %v1644_v24, %v3773_v33  ;;  %v3784_v38 = vmax.f32 %v1498_v29, %v1546_v34  ;;  %498 = vperm.xlu0 %3052, %v423_v30   ;;  %v3826_v9 = vmax.f32 %v1507_v53, %v1555_v63 }
  0xb6   : > { %1482 = vperm.xlu2 %3050, %v2821_v35   ;;  %1477 = vperm.xlu1 %3049, %v2820_v36   ;;  %v1323_v39 = vpop.permute.xlu0 %1322 }
  0xb7   : > { %v1642_v41 = vmax.f32 %v3784_v38, %v3770_v31  ;;  %v1511_v61 = vadd.f32 %v3733_v3, %v1323_v39  ;;  %5978 = vst [vmem:[#allocation5_spill] sm:$0xff] %v3826_v9 }
  0xb8   : > { %v1318_v42 = vpop.permute.xlu2 %1317  ;;  %v1273_v43 = vpop.permute.xlu1 %1272 }
  0xb9   : > { %v1501_v44 = vadd.f32 %v3733_v3, %v1273_v43  ;;  %v1559_v6 = vmul.f32 0.01, %v1511_v61  ;;  %v1510_v11 = vadd.f32 %v3733_v3, %v1318_v42 }
  0xbb   : > { %v1549_v47 = vmul.f32 0.01, %v1501_v44  ;;  %v3833_v16 = vmax.f32 %v1511_v61, %v1559_v6  ;;  %v1558_v23 = vmul.f32 0.01, %v1510_v11 }
  0xbd   : > { %v3802_v51 = vmax.f32 %v1501_v44, %v1549_v47  ;;  %508 = vperm.xlu0 %3052, %v425_v45   ;;  %5979 = vst [vmem:[#allocation6_spill] sm:$0xff] %v3833_v16  ;;  %v3852_v32 = vmax.f32 %v1510_v11, %v1558_v23  ;;  %v436_v44 = vld [vmem:[%s5816_s2 + $0x98] sm:$0xff] }
  0xbe   : > { %3053 = vset.pattern.permute.xlu2 %v3488_v18  ;;  %1492 = vperm.xlu1 %3049, %v2823_v48   ;;  %v1338_v52 = vpop.permute.xlu0 %1337 }
  0xbf   : > { %v1645_v55 = vmax.f32 %v3802_v51, %v3792_v46  ;;  %503 = vperm.xlu2 %3053, %v424_v49   ;;  %v1514_v19 = vadd.f32 %v3733_v3, %v1338_v52  ;;  %5980 = vst [vmem:[#allocation7_spill] sm:$0xff] %v3852_v32  ;;  %v432_v49 = vld [vmem:[%s5816_s2 + $0x78] sm:$0xff] }
  0xc0   : > { %v1333_v57 = vpop.permute.xlu2 %1332  ;;  %v1283_v58 = vpop.permute.xlu1 %1282 }
  0xc1   : > { %v1503_v60 = vadd.f32 %v3733_v3, %v1283_v58  ;;  %v1562_v28 = vmul.f32 0.01, %v1514_v19  ;;  %v1513_v34 = vadd.f32 %v3733_v3, %v1333_v57 }
  0xc3   : > { %v1551_v0 = vmul.f32 0.01, %v1503_v60  ;;  %v3856_v39 = vmax.f32 %v1514_v19, %v1562_v28  ;;  %v1561_v45 = vmul.f32 0.01, %v1513_v34 }
  0xc5   : > { %v3821_v7 = vmax.f32 %v1503_v60, %v1551_v0  ;;  %533 = vperm.xlu0 %3052, %v430_v62   ;;  %5981 = vst [vmem:[#allocation8_spill] sm:$0xff] %v3856_v39  ;;  %v3876_v52 = vmax.f32 %v1513_v34, %v1561_v45  ;;  %v439_v60 = vld [vmem:[%s5816_s2 + $0xb0] sm:$0xff]  ;;  %v440_v34 = vld [vmem:[%s5816_s2 + $0xb8] sm:$0xff] }
  0xc6   : > { %3054 = vset.pattern.permute.xlu1 %v3488_v18  ;;  %v3824_v8 = vpop.permute.xlu0 %1352  ;;  %v435_v0 = vld [vmem:[%s5816_s2 + $0x90] sm:$0xff] }
  0xc7   : > { %v1643_v12 = vmax.f32 %v3819_v5, %v3821_v7  ;;  %513 = vperm.xlu1 %3054, %v426_v2   ;;  %518 = vperm.xlu2 %3053, %v427_v4  }
  0xc8   : > { %v3831_v13 = vpop.permute.xlu2 %1347  ;;  %v1298_v15 = vpop.permute.xlu1 %1297 }
  0xc9   : > { %v1647_v18 = vmax.f32 %v1643_v12, %v3826_v9  ;;  %v1506_v20 = vadd.f32 %v3733_v3, %v1298_v15  ;;  %v442_v15 = vld [vmem:[%s5816_s2 + $0xc8] sm:$0xff] }
  0xcb   : > { %v1554_v24 = vmul.f32 0.01, %v1506_v20  ;;  %v1651_v25 = vmax.f32 %v1647_v18, %v3833_v16  ;;  %v437_v18 = vld [vmem:[%s5816_s2 + $0xa0] sm:$0xff] }
  0xcd   : > { %v3848_v29 = vmax.f32 %v1506_v20, %v1554_v24  ;;  %548 = vperm.xlu0 %3052, %v433_v22   ;;  %v438_v20 = vld [vmem:[%s5816_s2 + $0xa8] sm:$0xff] }
  0xce   : > { %v3850_v30 = vpop.permute.xlu0 %1367 }
  0xcf   : > { %v1646_v35 = vmax.f32 %v1642_v41, %v3848_v29  ;;  %523 = vperm.xlu1 %3054, %v428_v26   ;;  %528 = vperm.xlu2 %3053, %v429_v27   ;;  %v431_v41 = vld [vmem:[%s5816_s2 + $0x70] sm:$0xff]  ;;  %v445_v27 = vld [vmem:[%s5816_s2 + $0xe0] sm:$0xff] }
  0xd0   : > { %v1313_v36 = vpop.permute.xlu1 %1312  ;;  %v3860_v43 = vpop.permute.xlu2 %1362 }
  0xd1   : > { %v1650_v40 = vmax.f32 %v1646_v35, %v3852_v32  ;;  %v1509_v42 = vadd.f32 %v3733_v3, %v1313_v36  ;;  %v441_v35 = vld [vmem:[%s5816_s2 + $0xc0] sm:$0xff] }
  0xd3   : > { %v1557_v47 = vmul.f32 0.01, %v1509_v42  ;;  %v3866_v48 = vmax.f32 %v1650_v40, %v3856_v39  ;;  %v448_v40 = vld [vmem:[%s5816_s2 + $0xf8] sm:$0xff] }
  0xd5   : > { %v3874_v50 = vmax.f32 %v1509_v42, %v1557_v47  ;;  %563 = vperm.xlu0 %3052, %v436_v44   ;;  %v443_v42 = vld [vmem:[%s5816_s2 + $0xd0] sm:$0xff]  ;;  %v444_v44 = vld [vmem:[%s5816_s2 + $0xd8] sm:$0xff] }
  0xd6   : > { %v3881_v57 = vpop.permute.xlu0 %1382 }
  0xd7   : > { %5982 = vst [vmem:[#allocation9_spill] sm:$0xff] %v3874_v50  ;;  %v3879_v53 = vmax.f32 %v1645_v55, %v3874_v50  ;;  %538 = vperm.xlu1 %3054, %v431_v41   ;;  %543 = vperm.xlu2 %3053, %v432_v49   ;;  %v434_v55 = vld [vmem:[%s5816_s2 + $0x88] sm:$0xff]  ;;  %v451_v49 = vld [vmem:[%s5816_s2 + $0x110] sm:$0xff] }
  0xd8   : > { %v1328_v58 = vpop.permute.xlu1 %1327  ;;  %v3889_v63 = vpop.permute.xlu2 %1377 }
  0xd9   : > { %v1512_v61 = vadd.f32 %v3733_v3, %v1328_v58  ;;  %v446_v58 = vld [vmem:[%s5816_s2 + $0xe8] sm:$0xff] }
  0xdb   : > { %v1560_v62 = vmul.f32 0.01, %v1512_v61 }
  0xdd   : > { %v3897_v2 = vmax.f32 %v1512_v61, %v1560_v62  ;;  %578 = vperm.xlu0 %3052, %v439_v60   ;;  %v447_v61 = vld [vmem:[%s5816_s2 + $0xf0] sm:$0xff] }
  0xde   : > { %v3902_v12 = vpop.permute.xlu0 %1397 }
  0xdf   : > { %553 = vperm.xlu1 %3054, %v434_v55   ;;  %558 = vperm.xlu2 %3053, %v435_v0   ;;  %v454_v55 = vld [vmem:[%s5816_s2 + $0x128] sm:$0xff] }
  0xe0   : > { %v1343_v6 = vpop.permute.xlu1 %1342  ;;  %v3915_v23 = vpop.permute.xlu2 %1392 }
  0xe1   : > { %v1515_v11 = vadd.f32 %v3733_v3, %v1343_v6  ;;  %v449_v6 = vld [vmem:[%s5816_s2 + $0x100] sm:$0xff]  ;;  %v1525_v17 = vadd.f32 %v3733_v3, %v3915_v23 }
  0xe3   : > { %v1563_v19 = vmul.f32 0.01, %v1515_v11 }
  0xe5   : > { %v3913_v22 = vmax.f32 %v1515_v11, %v1563_v19  ;;  %593 = vperm.xlu0 %3052, %v442_v15   ;;  %v450_v11 = vld [vmem:[%s5816_s2 + $0x108] sm:$0xff] }
  0xe6   : > { %v3923_v28 = vpop.permute.xlu0 %1412 }
  0xe7   : > { %5983 = vst [vmem:[#allocation10_spill] sm:$0xff] %v3913_v22  ;;  %v3918_v24 = vmax.f32 %v1651_v25, %v3913_v22  ;;  %568 = vperm.xlu1 %3054, %v437_v18   ;;  %573 = vperm.xlu2 %3053, %v438_v20   ;;  %v457_v18 = vld [vmem:[%s5816_s2 + $0x140] sm:$0xff]  ;;  %v452_v20 = vld [vmem:[%s5816_s2 + $0x118] sm:$0xff] }
  0xe8   : > { %v1358_v26 = vpop.permute.xlu1 %1357  ;;  %v3931_v25 = vpop.permute.xlu2 %1407 }
  0xed   : > { %608 = vperm.xlu0 %3052, %v445_v27   ;;  %v453_v27 = vld [vmem:[%s5816_s2 + $0x120] sm:$0xff] }
  0xee   : > { %v3942_v45 = vpop.permute.xlu0 %1427 }
  0xef   : > { %583 = vperm.xlu1 %3054, %v440_v34   ;;  %588 = vperm.xlu2 %3053, %v441_v35   ;;  %v1518_v35 = vadd.f32 %v3733_v3, %v1358_v26  ;;  %v1520_v26 = vadd.f32 %v3733_v3, %v3850_v30  ;;  %v1522_v30 = vadd.f32 %v3733_v3, %v3889_v63 }
  0xf0   : > { %v1373_v36 = vpop.permute.xlu1 %1372  ;;  %v1423_v41 = vpop.permute.xlu2 %1422 }
  0xf5   : > { %623 = vperm.xlu0 %3052, %v448_v40   ;;  %v1519_v40 = vadd.f32 %v3733_v3, %v3860_v43  ;;  %v1523_v43 = vadd.f32 %v3733_v3, %v3881_v57 }
  0xf6   : > { %v3953_v60 = vpop.permute.xlu0 %1442 }
  0xf7   : > { %598 = vperm.xlu1 %3054, %v443_v42   ;;  %603 = vperm.xlu2 %3053, %v444_v44   ;;  %v1516_v44 = vadd.f32 %v3733_v3, %v3831_v13  ;;  %v456_v13 = vld [vmem:[%s5816_s2 + $0x138] sm:$0xff]  ;;  %v1571_v22 = vmul.f32 0.01, %v1523_v43 }
  0xf8   : > { %v1388_v47 = vpop.permute.xlu1 %1387  ;;  %v3958_v0 = vpop.permute.xlu2 %1437 }
  0xf9   : > { %v1524_v63 = vadd.f32 %v3733_v3, %v1388_v47  ;;  %v463_v47 = vld [vmem:[%s5816_s2 + $0x170] sm:$0xff] }
  0xfd   : > { %638 = vperm.xlu0 %3052, %v451_v49   ;;  %v1517_v49 = vadd.f32 %v3733_v3, %v3824_v8  ;;  %v455_v8 = vld [vmem:[%s5816_s2 + $0x130] sm:$0xff] }
  0xfe   : > { %v3966_v19 = vpop.permute.xlu0 %1457 }
  0xff   : > { %613 = vperm.xlu1 %3054, %v446_v58   ;;  %618 = vperm.xlu2 %3053, %v447_v61   ;;  %v460_v58 = vld [vmem:[%s5816_s2 + $0x158] sm:$0xff]  ;;  %v1566_v61 = vmul.f32 0.01, %v1518_v35  ;;  %v1565_v57 = vmul.f32 0.01, %v1517_v49 }
 0x100   : > { %v1403_v62 = vpop.permute.xlu1 %1402  ;;  %v3977_v34 = vpop.permute.xlu2 %1452 }
 0x101   : > { %v4011_v59 = vmax.f32 %v1518_v35, %v1566_v61  ;;  %v4021_v23 = vmax.f32 %v1517_v49, %v1565_v57 }
 0x103   : > { %v1658_v49 = vmax.f32 %v3866_v48, %v4011_v59  ;;  %v5990_v48 = vmax.f32 %v3879_v53, %v3876_v52  ;;  %v1534_v53 = vadd.f32 %v3733_v3, %v3958_v0 }
 0x105   : > { %653 = vperm.xlu0 %3052, %v454_v55   ;;  %v1567_v55 = vmul.f32 0.01, %v1519_v40 }
 0x107   : > { %628 = vperm.xlu1 %3054, %v449_v6   ;;  %633 = vperm.xlu2 %3053, %v450_v11   ;;  %v1527_v6 = vadd.f32 %v3733_v3, %v1403_v62  ;;  %v3996_v11 = vpop.permute.xlu0 %1472  ;;  %v1521_v62 = vadd.f32 %v3733_v3, %v1373_v36  ;;  %v4013_v4 = vmax.f32 %v1519_v40, %v1567_v55  ;;  %v1570_v36 = vmul.f32 0.01, %v1522_v30 }
 0x108   : > { %v1418_v15 = vpop.permute.xlu1 %1417  ;;  %v4016_v16 = vpop.permute.xlu2 %1467  ;;  %v1531_v40 = vadd.f32 %v3733_v3, %v1423_v41  ;;  %v1572_v41 = vmul.f32 0.01, %v1524_v63 }
 0x109   : > { %v1575_v39 = vmul.f32 0.01, %v1527_v6  ;;  %v1530_v50 = vadd.f32 %v3733_v3, %v1418_v15  ;;  %v1659_v35 = vmax.f32 %v3918_v24, %v4013_v4  ;;  %v1569_v61 = vmul.f32 0.01, %v1521_v62 }
 0x10a   : > { %v1573_v15 = vmul.f32 0.01, %v1525_v17  ;;  %v1528_v24 = vadd.f32 %v3733_v3, %v3931_v25  ;;  %v4046_v57 = vmax.f32 %v1522_v30, %v1570_v36 }
 0x10b   : > { %v4054_v25 = vmax.f32 %v1521_v62, %v1569_v61  ;;  %v1529_v62 = vadd.f32 %v3733_v3, %v3923_v28  ;;  %v4069_v61 = vmax.f32 %v1524_v63, %v1572_v41  ;;  %v1538_v63 = vadd.f32 %v3733_v3, %v3966_v19 }
 0x10c   : > { %5988 = vst [vmem:[#allocation14_spill] sm:$0xff] %v4046_v57  ;;  %v4061_v30 = vmax.f32 %v1525_v17, %v1573_v15  ;;  %v1576_v36 = vmul.f32 0.01, %v1528_v24  ;;  %v1532_v17 = vadd.f32 %v3733_v3, %v3942_v45 }
 0x10d   : > { %668 = vperm.xlu0 %3052, %v457_v18   ;;  %v1564_v18 = vmul.f32 0.01, %v1516_v44  ;;  %5991 = vst [vmem:[#allocation16_spill] sm:$0xff] %v4054_v25 }
 0x10e   : > { %5992 = vst [vmem:[#allocation17_spill] sm:$0xff] %v4061_v30 }
 0x10f   : > { %643 = vperm.xlu1 %3054, %v452_v20   ;;  %648 = vperm.xlu2 %3053, %v453_v27   ;;  %v1526_v20 = vadd.f32 %v3733_v3, %v3902_v12  ;;  %v1568_v27 = vmul.f32 0.01, %v1520_v26  ;;  %5993 = vst [vmem:[#allocation18_spill] sm:$0xff] %v4069_v61 }
 0x110   : > { %v3982_v42 = vpop.permute.xlu1 %1432  ;;  %v1483_v41 = vpop.permute.xlu2 %1482 }
 0x111   : > { %v1574_v32 = vmul.f32 0.01, %v1526_v20  ;;  %v4029_v55 = vmax.f32 %v1520_v26, %v1568_v27  ;;  %v458_v26 = vld [vmem:[%s5816_s2 + $0x148] sm:$0xff]  ;;  %v1579_v27 = vmul.f32 0.01, %v1531_v40  ;;  %v1533_v0 = vadd.f32 %v3733_v3, %v3982_v42 }
 0x113   : > { %5984 = vst [vmem:[#allocation11_spill] sm:$0xff] %v4029_v55  ;;  %v4079_v15 = vmax.f32 %v1531_v40, %v1579_v27  ;;  %v1580_v27 = vmul.f32 0.01, %v1532_v17 }
 0x115   : > { %683 = vperm.xlu0 %3052, %v460_v58   ;;  %v4018_v58 = vmax.f32 %v1516_v44, %v1564_v18  ;;  %v5985_v44 = vmax.f32 %v3782_v37, %v3897_v2  ;;  %v4041_v18 = vmax.f32 %v1527_v6, %v1575_v39  ;;  %v4048_v37 = vmax.f32 %v1526_v20, %v1574_v32 }
 0x116   : > { %v1535_v39 = vadd.f32 %v3733_v3, %v3953_v60  ;;  %v1662_v32 = vmax.f32 %v1658_v49, %v4046_v57  ;;  %5995 = vst [vmem:[#allocation20_spill] sm:$0xff] %v4079_v15  ;;  %v6021_v57 = vld [vmem:[#allocation6_spill] sm:$0xff] }
 0x117   : > { %658 = vperm.xlu1 %3054, %v455_v8   ;;  %663 = vperm.xlu2 %3053, %v456_v13   ;;  %v1656_v8 = vmax.f32 %v5985_v44, %v4018_v58  ;;  %v4037_v13 = vmax.f32 %v1523_v43, %v1571_v22  ;;  %5987 = vst [vmem:[#allocation13_spill] sm:$0xff] %v4041_v18  ;;  %v1578_v43 = vmul.f32 0.01, %v1530_v50  ;;  %v4059_v44 = vpop.permute.xlu0 %1487 }
 0x118   : > { %v1448_v12 = vpop.permute.xlu1 %1447  ;;  %5989 = vst [vmem:[#allocation15_spill] sm:$0xff] %v4048_v37  ;;  %v1657_v22 = vmax.f32 %v5990_v48, %v4021_v23  ;;  %v1583_v49 = vmul.f32 0.01, %v1535_v39  ;;  %v1666_v48 = vmax.f32 %v1662_v32, %v4048_v37  ;;  %v1581_v32 = vmul.f32 0.01, %v1533_v0 }
 0x119   : > { %5986 = vst [vmem:[#allocation12_spill] sm:$0xff] %v4037_v13  ;;  %v1663_v6 = vmax.f32 %v1659_v35, %v4037_v13  ;;  %v1660_v20 = vmax.f32 %v1656_v8, %v4029_v55 }
 0x11a   : > { %v1661_v28 = vmax.f32 %v1657_v22, %v4054_v25  ;;  %v461_v22 = vld [vmem:[%s5816_s2 + $0x160] sm:$0xff] }
 0x11b   : > { %v1667_v60 = vmax.f32 %v1663_v6, %v4041_v18  ;;  %v4086_v6 = vmax.f32 %v1528_v24, %v1576_v36  ;;  %v1664_v42 = vmax.f32 %v1660_v20, %v4069_v61  ;;  %v5997_v18 = vmov 33  }
 0x11c   : > { %v4097_v24 = vmax.f32 %v1535_v39, %v1583_v49  ;;  %v1586_v36 = vmul.f32 0.01, %v1538_v63  ;;  %v1537_v20 = vadd.f32 %v3733_v3, %v3977_v34 }
 0x11d   : > { %698 = vperm.xlu0 %3052, %v463_v47   ;;  %v4074_v47 = vmax.f32 %v1530_v50, %v1578_v43  ;;  %v1536_v50 = vadd.f32 %v3733_v3, %v1448_v12  ;;  %v1577_v43 = vmul.f32 0.01, %v1529_v62  ;;  %5996 = vst [vmem:[#allocation21_spill] sm:$0xff] %v4086_v6  ;;  %v1671_v40 = vmax.f32 %v1667_v60, %v4079_v15 }
 0x11e   : > { %v1665_v12 = vmax.f32 %v1661_v28, %v4061_v30  ;;  %5998 = vst [vmem:[#allocation22_spill] sm:$0xff] %v4097_v24 }
 0x11f   : > { %673 = vperm.xlu1 %3054, %v458_v26   ;;  %5994 = vst [vmem:[#allocation19_spill] sm:$0xff] %v4074_v47  ;;  %v1582_v26 = vmul.f32 0.01, %v1534_v53  ;;  %v1670_v19 = vmax.f32 %v1666_v48, %v4074_v47  ;;  %v1584_v15 = vmul.f32 0.01, %v1536_v50  ;;  %v4105_v48 = vmax.f32 %v1529_v62, %v1577_v43  ;;  %v4110_v28 = vpop.permute.xlu0 %468  ;;  %v4202_v47 = vld [vmem:[%s4174_s8 + $0x18] sm:$0xff] }
 0x120   : > { %v1463_v35 = vpop.permute.xlu1 %1462  ;;  %v1675_v39 = vmax.f32 %v1671_v40, %v4097_v24  ;;  %v4119_v62 = vmax.f32 %v1538_v63, %v1586_v36  ;;  %v1585_v43 = vmul.f32 0.01, %v1537_v20  ;;  %v1541_v40 = vadd.f32 %v3733_v3, %v3996_v11 }
 0x121   : > { %v1539_v8 = vadd.f32 %v3733_v3, %v1463_v35  ;;  %v1543_v35 = vadd.f32 %v3733_v3, %v1483_v41  ;;  %v4101_v60 = vmax.f32 %v1534_v53, %v1582_v26  ;;  %6001 = vst [vmem:[#allocation25_spill] sm:$0xff] %v4105_v48  ;;  %v1668_v41 = vmax.f32 %v1664_v42, %v4086_v6 }
 0x122   : > { %v4114_v26 = vmax.f32 %v1533_v0, %v1581_v32  ;;  %6004 = vst [vmem:[#allocation28_spill] sm:$0xff] %v4119_v62  ;;  %v1669_v42 = vmax.f32 %v1665_v12, %v4105_v48  ;;  %v1544_v63 = vadd.f32 %v3733_v3, %v4059_v44  ;;  %v464_v32 = vld [vmem:[%s5816_s2 + $0x178] sm:$0xff]  ;;  %v4142_v36 = vmax.f32 %v1537_v20, %v1585_v43 }
 0x123   : > { %v1587_v45 = vmul.f32 0.01, %v1539_v8  ;;  %5999 = vst [vmem:[#allocation23_spill] sm:$0xff] %v4101_v60  ;;  %v1674_v34 = vmax.f32 %v1670_v19, %v4101_v60  ;;  %v1591_v53 = vmul.f32 0.01, %v1543_v35  ;;  %v333_v6 = vunpack.c.0.s8 %v4202_v47 }
 0x124   : > { %6002 = vst [vmem:[#allocation26_spill] sm:$0xff] %v4114_v26  ;;  %v1673_v11 = vmax.f32 %v1669_v42, %v4114_v26  ;;  %v1592_v42 = vmul.f32 0.01, %v1544_v63 }
 0x125   : > { %3167 = vset.pattern.permute.xlu0 %v5997_v18  ;;  %v4103_v37 = vmax.f32 %v1539_v8, %v1587_v45  ;;  %v1540_v18 = vadd.f32 %v3733_v3, %v4016_v16  ;;  %v4117_v45 = vmax.f32 %v1532_v17, %v1580_v27  ;;  %v459_v16 = vld [vmem:[%s5816_s2 + $0x150] sm:$0xff]  ;;  %v4136_v12 = vmax.f32 %v1543_v35, %v1591_v53 }
 0x126   : > { %678 = vperm.xlu2 %3053, %v459_v16   ;;  %6008 = vst [vmem:[#allocation32_spill] sm:$0xff] %v4142_v36 }
 0x127   : > { %6000 = vst [vmem:[#allocation24_spill] sm:$0xff] %v4103_v37  ;;  %688 = vperm.xlu1 %3054, %v461_v22   ;;  %v4127_v22 = vmax.f32 %v1536_v50, %v1584_v15  ;;  %v1679_v0 = vmax.f32 %v1675_v39, %v4103_v37  ;;  %v1588_v17 = vmul.f32 0.01, %v1540_v18  ;;  %v1672_v27 = vmax.f32 %v1668_v41, %v4117_v45  ;;  %v4347_v37 = vld [vmem:[%s4174_s8 + $0x38] sm:$0xff] }
 0x128   : > { %v1478_v49 = vpop.permute.xlu1 %1477  ;;  %6003 = vst [vmem:[#allocation27_spill] sm:$0xff] %v4117_v45  ;;  %v1678_v50 = vmax.f32 %v1674_v34, %v4119_v62  ;;  %v1589_v39 = vmul.f32 0.01, %v1541_v40  ;;  %v4151_v34 = vpop.permute.xlu0 %473 }
 0x129   : > { %v1542_v8 = vadd.f32 %v3733_v3, %v1478_v49  ;;  %6005 = vst [vmem:[#allocation29_spill] sm:$0xff] %v4127_v22  ;;  %v1676_v49 = vmax.f32 %v1672_v27, %v4127_v22  ;;  %v1683_v44 = vmax.f32 %v1679_v0, %v4136_v12  ;;  %v4147_v35 = vmax.f32 %v1540_v18, %v1588_v17  ;;  %v4164_v17 = vld [vmem:[%s3572_s20] ss:$0 sm:$0xff] }
 0x12a   : > { %6006 = vst [vmem:[#allocation30_spill] sm:$0xff] %v4136_v12  ;;  %v4153_v43 = vmax.f32 %v1541_v40, %v1589_v39  ;;  %v4156_v27 = vmax.f32 %v1544_v63, %v1592_v42  ;;  %v713_v40 = vadd.f32 %v4164_v17, %v3701_v54  ;;  %v714_v63 = vadd.f32 %v4164_v17, %v3708_v56 }
 0x12b   : > { %v1590_v19 = vmul.f32 0.01, %v1542_v8  ;;  %6009 = vst [vmem:[#allocation33_spill] sm:$0xff] %v4147_v35  ;;  %v1680_v0 = vmax.f32 %v1676_v49, %v4147_v35  ;;  %v711_v45 = vadd.f32 %v4164_v17, %v3730_v1 }
 0x12c   : > { %6010 = vst [vmem:[#allocation34_spill] sm:$0xff] %v4153_v43  ;;  %v761_v42 = vmul.f32 0.01, %v713_v40 }
 0x12d   : > { %v4139_v15 = vmax.f32 %v1542_v8, %v1590_v19  ;;  %v1677_v8 = vmax.f32 %v1673_v11, %v4142_v36  ;;  %6011 = vst [vmem:[#allocation35_spill] sm:$0xff] %v4156_v27  ;;  %v759_v30 = vmul.f32 0.01, %v711_v45 }
 0x12f   : > { %6007 = vst [vmem:[#allocation31_spill] sm:$0xff] %v4139_v15  ;;  %v1682_v41 = vmax.f32 %v1678_v50, %v4139_v15  ;;  %703 = vperm.xlu1 %3054, %v464_v32   ;;  %v1681_v18 = vmax.f32 %v1677_v8, %v4153_v43  ;;  %v1684_v32 = vmax.f32 %v1680_v0, %v4156_v27  ;;  %v762_v8 = vmul.f32 0.01, %v714_v63 }
 0x130   : > { %v1493_v53 = vpop.permute.xlu1 %1492  ;;  %v4172_v49 = vpop.permute.xlu0 %498  ;;  %v4261_v55 = vmax.f32 %v711_v45, %v759_v30 }
 0x131   : > { %v1686_v16 = vmax.f32 %v1682_v41, %v1683_v44  ;;  %v1545_v20 = vadd.f32 %v3733_v3, %v1493_v53  ;;  %v4177_v44 = vld [vmem:[%s4174_s8 + $0x8] sm:$0xff]  ;;  %v4180_v41 = vld [vmem:[%s4174_s8] sm:$0xff] }
 0x132   : > { %v326_v56 = vunpack.c.1.s8 %v4177_v44  ;;  %v323_v0 = vunpack.c.2.s8 %v4180_v41  ;;  %6022 = vst [vmem:[#allocation6_spill] sm:$0xff] %v4261_v55 }
 0x133   : > { %v1593_v19 = vmul.f32 0.01, %v1545_v20 }
 0x134   : > { %v4204_v48 = vcvt.s32.f32 %v323_v0 }
 0x135   : > { %v4158_v50 = vmax.f32 %v1545_v20, %v1593_v19  ;;  %v325_v20 = vunpack.c.0.s8 %v4177_v44 }
 0x136   : > { %6018 = vst [vmem:[#allocation42_spill] sm:$0xff] %v4204_v48 }
 0x137   : > { %6012 = vst [vmem:[#allocation36_spill] sm:$0xff] %v4158_v50  ;;  %v1685_v3 = vmax.f32 %v1681_v18, %v4158_v50  ;;  %v504_v18 = vpop.permute.xlu2 %503  ;;  %v4193_v60 = vcvt.s32.f32 %v325_v20  ;;  %v336_v50 = vunpack.c.3.s8 %v4202_v47 }
 0x138   : > { %v4215_v1 = vpop.permute.xlu0 %508 }
 0x139   : > { %v1687_v11 = vmax.f32 %v1684_v32, %v1685_v3  ;;  %v4186_v32 = vmax.f32 %v713_v40, %v761_v42  ;;  %v4188_v3 = vmax.f32 %v714_v63, %v762_v8  ;;  %6015 = vst [vmem:[#allocation39_spill] sm:$0xff] %v4193_v60  ;;  %v328_v40 = vunpack.c.3.s8 %v4177_v44  ;;  %v4209_v42 = vld [vmem:[%s4174_s8 + $0x20] sm:$0xff] }
 0x13a   : > { %v324_v63 = vunpack.c.3.s8 %v4180_v41  ;;  %v337_v61 = vunpack.c.0.s8 %v4209_v42  ;;  %v716_v60 = vadd.f32 %v4164_v17, %v504_v18 }
 0x13b   : > { %v1688_v39 = vmax.f32 %v1686_v16, %v1687_v11  ;;  %v322_v16 = vunpack.c.1.s8 %v4180_v41  ;;  %6013 = vst [vmem:[#allocation37_spill] sm:$0xff] %v4186_v32  ;;  %v4191_v11 = vld [vmem:[%s4174_s8 + $0x10] sm:$0xff]  ;;  %v853_v0 = vmax.f32 %v4188_v3, %v4186_v32  ;;  %v4272_v13 = vcvt.s32.f32 %v328_v40 }
 0x13c   : > { %6014 = vst [vmem:[#allocation38_spill] sm:$0xff] %v4188_v3  ;;  %v331_v20 = vunpack.c.2.s8 %v4191_v11  ;;  %v6024_v3 = vld [vmem:[#allocation10_spill] sm:$0xff]  ;;  %v4274_v30 = vcvt.s32.f32 %v324_v63  ;;  %v4286_v32 = vcvt.s32.f32 %v333_v6  ;;  %v4291_v63 = vcvt.s32.f32 %v337_v61  ;;  %v4308_v61 = vld [vmem:[%s4174_s8 + $0x28] sm:$0xff] }
 0x13d   : > { %v1689_v53 = vrot.slane %v1688_v39, 4  ;;  %v856_v40 = vmax.f32 %v4261_v55, %v853_v0  ;;  %v764_v48 = vmul.f32 0.01, %v716_v60  ;;  %v342_v15 = vunpack.c.1.s8 %v4308_v61 }
 0x13e   : > { %6025 = vst [vmem:[#allocation10_spill] sm:$0xff] %v4274_v30  ;;  %v332_v43 = vunpack.c.3.s8 %v4191_v11 }
 0x13f   : > { %v1690_v54 = vmax.f32 %v1688_v39, %v1689_v53  ;;  %v4195_v39 = vcvt.s32.f32 %v326_v56  ;;  %v4197_v53 = vcvt.s32.f32 %v322_v16  ;;  %v330_v56 = vunpack.c.1.s8 %v4191_v11  ;;  %6030 = vst [vmem:[#allocation47_spill] sm:$0xff] %v4291_v63 }
 0x140   : > { %v321_v16 = vunpack.c.0.s8 %v4180_v41  ;;  %v709_v41 = vadd.f32 %v4164_v17, %v4110_v28  ;;  %v4288_v18 = vpop.permute.xlu0 %533  ;;  %v339_v63 = vunpack.c.2.s8 %v4209_v42 }
 0x141   : > { %v1691_v19 = vrot.slane %v1690_v54, 2  ;;  %6016 = vst [vmem:[#allocation40_spill] sm:$0xff] %v4195_v39  ;;  %v4280_v25 = vcvt.s32.f32 %v330_v56  ;;  %v462_v56 = vld [vmem:[%s5816_s2 + $0x168] sm:$0xff] }
 0x142   : > { %6017 = vst [vmem:[#allocation41_spill] sm:$0xff] %v4197_v53  ;;  %v757_v9 = vmul.f32 0.01, %v709_v41  ;;  %693 = vperm.xlu2 %3053, %v462_v56   ;;  %v343_v56 = vunpack.c.2.s8 %v4308_v61  ;;  %v4358_v62 = vcvt.s32.f32 %v339_v63  ;;  %v4373_v63 = vcvt.s32.f32 %v342_v15 }
 0x143   : > { %v1692_v24 = vmax.f32 %v1690_v54, %v1691_v19  ;;  %v327_v54 = vunpack.c.2.s8 %v4177_v44  ;;  %v334_v19 = vunpack.c.1.s8 %v4202_v47  ;;  %v712_v44 = vadd.f32 %v4164_v17, %v3746_v10  ;;  %6027 = vst [vmem:[#allocation44_spill] sm:$0xff] %v4280_v25 }
 0x144   : > { %v4282_v10 = vcvt.s32.f32 %v321_v16  ;;  %v4299_v16 = vpop.permute.xlu1 %513  ;;  %v4303_v6 = vmax.f32 %v709_v41, %v757_v9  ;;  %v4319_v9 = vld [vmem:[%s4174_s8 + $0x30] sm:$0xff]  ;;  %6037 = vst [vmem:[#allocation53_spill] sm:$0xff] %v4358_v62 }
 0x145   : > { %v1693_v8 = vrot.slane %v1692_v24, 1  ;;  %v760_v33 = vmul.f32 0.01, %v712_v44  ;;  %v4276_v45 = vcvt.s32.f32 %v327_v54  ;;  %v4284_v28 = vcvt.s32.f32 %v334_v19  ;;  %6041 = vst [vmem:[#allocation56_spill] sm:$0xff] %v4373_v63 }
 0x146   : > { %6028 = vst [vmem:[#allocation45_spill] sm:$0xff] %v4282_v10  ;;  %v4293_v54 = vcvt.s32.f32 %v336_v50  ;;  %v710_v50 = vadd.f32 %v4164_v17, %v4151_v34  ;;  %v329_v34 = vunpack.c.0.s8 %v4191_v11  ;;  %v345_v12 = vunpack.c.0.s8 %v4319_v9 }
 0x147   : > { %v4221_v39 = vmax.f32 %v1692_v24, %v1693_v8  ;;  %v4236_v8 = vpop.permute.xlu2 %518  ;;  %6026 = vst [vmem:[#allocation43_spill] sm:$0xff] %v4276_v45  ;;  %v4278_v24 = vcvt.s32.f32 %v331_v20  ;;  %v340_v20 = vunpack.c.3.s8 %v4209_v42  ;;  %v4301_v19 = vmax.f32 %v712_v44, %v760_v33 }
 0x148   : > { %6029 = vst [vmem:[#allocation46_spill] sm:$0xff] %v4284_v28  ;;  %v715_v33 = vadd.f32 %v4164_v17, %v4172_v49  ;;  %v346_v49 = vunpack.c.1.s8 %v4319_v9  ;;  %v758_v44 = vmul.f32 0.01, %v710_v50  ;;  %v4356_v27 = vpop.permute.xlu0 %548  ;;  %v719_v36 = vadd.f32 %v4164_v17, %v4236_v8 }
 0x149   : > { %6031 = vst [vmem:[#allocation48_spill] sm:$0xff] %v4293_v54  ;;  %v854_v41 = vmax.f32 %v4301_v19, %v856_v40  ;;  %v4339_v35 = vcvt.s32.f32 %v340_v20  ;;  %v4351_v40 = vmax.f32 %v716_v60, %v764_v48  ;;  %v6036_v20 = vsub.f32 %v3784_v38, %v4221_v39 }
 0x14a   : > { %6032 = vst [vmem:[#allocation49_spill] sm:$0xff] %v4301_v19  ;;  %v763_v11 = vmul.f32 0.01, %v715_v33  ;;  %v6038_v22 = vsub.f32 %v3819_v5, %v4221_v39  ;;  %v4367_v60 = vcvt.s32.f32 %v329_v34  ;;  %v4369_v48 = vcvt.s32.f32 %v343_v56 }
 0x14b   : > { %6033 = vst [vmem:[#allocation50_spill] sm:$0xff] %v4303_v6  ;;  %v855_v0 = vmax.f32 %v4303_v6, %v854_v41  ;;  %v1743_v19 = vmul.f32 1.442695, %v6036_v20  ;;  %v335_v38 = vunpack.c.2.s8 %v4202_v47  ;;  %v349_v41 = vunpack.c.0.s8 %v4347_v37 }
 0x14c   : > { %6034 = vst [vmem:[#allocation51_spill] sm:$0xff] %v4339_v35  ;;  %v1745_v26 = vmul.f32 1.442695, %v6038_v22  ;;  %v4365_v35 = vpop.permute.xlu1 %523  ;;  %v4375_v20 = vcvt.s32.f32 %v332_v43  ;;  %v4377_v6 = vmax.f32 %v710_v50, %v758_v44  ;;  %v717_v5 = vadd.f32 %v4164_v17, %v4215_v1 }
 0x14d   : > { %6035 = vst [vmem:[#allocation52_spill] sm:$0xff] %v4351_v40  ;;  %v4381_v22 = vcvt.s32.f32 %v346_v49  ;;  %v4383_v8 = vcvt.s32.f32 %v345_v12  ;;  %v859_v34 = vmax.f32 %v855_v0, %v4351_v40  ;;  %3170 = vpow2.f32 %v1743_v19 }
 0x14e   : > { %6039 = vst [vmem:[#allocation54_spill] sm:$0xff] %v4367_v60  ;;  %v4388_v47 = vmax.f32 %v715_v33, %v763_v11  ;;  %v767_v15 = vmul.f32 0.01, %v719_v36  ;;  %v6046_v43 = vsub.f32 %v3752_v14, %v4221_v39  ;;  %3172 = vpow2.f32 %v1745_v26 }
 0x14f   : > { %v4329_v55 = vpop.permute.xlu2 %528  ;;  %6040 = vst [vmem:[#allocation55_spill] sm:$0xff] %v4369_v48  ;;  %v4393_v44 = vcvt.s32.f32 %v335_v38  ;;  %v4395_v1 = vcvt.s32.f32 %v349_v41  ;;  %v348_v12 = vunpack.c.3.s8 %v4319_v9  ;;  %v338_v0 = vunpack.c.1.s8 %v4209_v42  ;;  %v4411_v42 = vld [vmem:[%s4174_s8 + $0x40] sm:$0xff] }
 0x150   : > { %6042 = vst [vmem:[#allocation57_spill] sm:$0xff] %v4377_v6  ;;  %v1747_v50 = vmul.f32 1.442695, %v6046_v43  ;;  %v352_v19 = vunpack.c.3.s8 %v4347_v37  ;;  %v857_v33 = vmax.f32 %v4377_v6, %v859_v34  ;;  %v765_v49 = vmul.f32 0.01, %v717_v5  ;;  %v4408_v40 = vpop.permute.xlu0 %563 }
 0x151   : > { %6043 = vst [vmem:[#allocation58_spill] sm:$0xff] %v4381_v22  ;;  %v6049_v11 = vsub.f32 %v3802_v51, %v4221_v39  ;;  %v351_v43 = vunpack.c.2.s8 %v4347_v37  ;;  %v341_v26 = vunpack.c.0.s8 %v4308_v61  ;;  %v344_v38 = vunpack.c.3.s8 %v4308_v61 }
 0x152   : > { %6044 = vst [vmem:[#allocation59_spill] sm:$0xff] %v4383_v8  ;;  %v347_v41 = vunpack.c.2.s8 %v4319_v9  ;;  %v4414_v34 = vmax.f32 %v719_v36, %v767_v15  ;;  %v6052_v51 = vsub.f32 %v3770_v31, %v4221_v39  ;;  %3174 = vpow2.f32 %v1747_v50 }
 0x153   : > { %6045 = vst [vmem:[#allocation60_spill] sm:$0xff] %v4388_v47  ;;  %v1749_v14 = vmul.f32 1.442695, %v6049_v11  ;;  %v3171_v22 = vpop.eup %3170  ;;  %v4421_v8 = vcvt.s32.f32 %v348_v12  ;;  %v4423_v61 = vcvt.s32.f32 %v338_v0  ;;  %v350_v9 = vunpack.c.1.s8 %v4347_v37 }
 0x154   : > { %6047 = vst [vmem:[#allocation61_spill] sm:$0xff] %v4393_v44  ;;  %v1751_v11 = vmul.f32 1.442695, %v6052_v51  ;;  %v4419_v6 = vpop.permute.xlu1 %538  ;;  %v721_v48 = vadd.f32 %v4164_v17, %v4329_v55  ;;  %v4428_v36 = vcvt.s32.f32 %v352_v19  ;;  %v4430_v15 = vmax.f32 %v717_v5, %v765_v49 }
 0x155   : > { %6048 = vst [vmem:[#allocation62_spill] sm:$0xff] %v4395_v1  ;;  %v861_v1 = vmax.f32 %v857_v33, %v4388_v47  ;;  %v3173_v33 = vpop.eup %3172  ;;  %v6057_v31 = vsub.f32 %v3821_v7, %v4221_v39  ;;  %3176 = vpow2.f32 %v1749_v14  ;;  %v4435_v51 = vcvt.s32.f32 %v351_v43 }
 0x156   : > { %6050 = vst [vmem:[#allocation63_spill] sm:$0xff] %v4411_v42  ;;  %v4437_v12 = vcvt.s32.f32 %v341_v26  ;;  %v4440_v37 = vcvt.s32.f32 %v344_v38  ;;  %v4444_v55 = vcvt.s32.f32 %v347_v41  ;;  %v6062_v19 = vsub.f32 %v3761_v21, %v4221_v39  ;;  %v6068_v41 = vld [vmem:[#allocation16_spill] sm:$0xff]  ;;  %v6084_v42 = vld [vmem:[#allocation17_spill] sm:$0xff] }
 0x157   : > { %v4386_v56 = vpop.permute.xlu2 %543  ;;  %6051 = vst [vmem:[#allocation64_spill] sm:$0xff] %v4414_v34  ;;  %v1753_v50 = vmul.f32 1.442695, %v6057_v31  ;;  %v858_v5 = vmax.f32 %v4414_v34, %v861_v1  ;;  %3178 = vpow2.f32 %v1751_v11  ;;  %v4450_v49 = vcvt.s32.f32 %v350_v9 }
 0x158   : > { %6053 = vst [vmem:[#allocation65_spill] sm:$0xff] %v4421_v8  ;;  %v1755_v7 = vmul.f32 1.442695, %v6062_v19  ;;  %v769_v14 = vmul.f32 0.01, %v721_v48  ;;  %v4453_v43 = vmul.f32 %v3171_v22, %v4282_v10  ;;  %v4456_v26 = vmul.f32 %v3173_v33, %v4197_v53  ;;  %v3175_v38 = vpop.eup %3174  ;;  %v6067_v33 = vld [vmem:[#allocation11_spill] sm:$0xff]  ;;  %v4472_v0 = vpop.permute.xlu0 %578 }
 0x159   : > { %6054 = vst [vmem:[#allocation66_spill] sm:$0xff] %v4423_v61  ;;  %v865_v1 = vmax.f32 %v4430_v15, %v858_v5  ;;  %v6066_v21 = vsub.f32 %v3792_v46, %v4221_v39  ;;  %3180 = vpow2.f32 %v1753_v50  ;;  %v6069_v50 = vld [vmem:[#allocation14_spill] sm:$0xff]  ;;  %v6070_v11 = vsub.f32 %v3848_v29, %v4221_v39  ;;  %v6089_v8 = vld [vmem:[#allocation15_spill] sm:$0xff] }
 0x15a   : > { %6055 = vst [vmem:[#allocation67_spill] sm:$0xff] %v4428_v36  ;;  %3182 = vpow2.f32 %v1755_v7  ;;  %v4483_v9 = vmax.f32 %v721_v48, %v769_v14  ;;  %v722_v53 = vadd.f32 %v4164_v17, %v4288_v18  ;;  %v1887_v46 = vadd.f32 %v4456_v26, %v4453_v43  ;;  %v6076_v14 = vld [vmem:[#allocation12_spill] sm:$0xff] }
 0x15b   : > { %6056 = vst [vmem:[#allocation68_spill] sm:$0xff] %v4430_v15  ;;  %v1757_v31 = vmul.f32 1.442695, %v6066_v21  ;;  %v3177_v5 = vpop.eup %3176  ;;  %v1759_v34 = vmul.f32 1.442695, %v6070_v11  ;;  %v6072_v15 = vld [vmem:[#allocation42_spill] sm:$0xff]  ;;  %v718_v7 = vadd.f32 %v4164_v17, %v4299_v16  ;;  %v725_v48 = vadd.f32 %v4164_v17, %v4356_v27 }
 0x15c   : > { %6058 = vst [vmem:[#allocation69_spill] sm:$0xff] %v4435_v51  ;;  %v4481_v22 = vpop.permute.xlu1 %553  ;;  %v4486_v19 = vmul.f32 %v3175_v38, %v6072_v15  ;;  %v6074_v21 = vld [vmem:[#allocation5_spill] sm:$0xff]  ;;  %v4502_v18 = vmul.f32 %v3177_v5, %v4274_v30  ;;  %v770_v11 = vmul.f32 0.01, %v722_v53  ;;  %v860_v27 = vmax.f32 %v4483_v9, %v865_v1 }
 0x15d   : > { %6059 = vst [vmem:[#allocation70_spill] sm:$0xff] %v4437_v12  ;;  %v3179_v10 = vpop.eup %3178  ;;  %v6075_v36 = vsub.f32 %v6074_v21, %v4221_v39  ;;  %3184 = vpow2.f32 %v1757_v31  ;;  %v766_v16 = vmul.f32 0.01, %v718_v7  ;;  %v773_v51 = vmul.f32 0.01, %v725_v48 }
 0x15e   : > { %6060 = vst [vmem:[#allocation71_spill] sm:$0xff] %v4440_v37  ;;  %3186 = vpow2.f32 %v1759_v34  ;;  %v4514_v5 = vmax.f32 %v722_v53, %v770_v11 }
 0x15f   : > { %v4442_v47 = vpop.permute.xlu2 %558  ;;  %6061 = vst [vmem:[#allocation72_spill] sm:$0xff] %v4444_v55  ;;  %v1761_v29 = vmul.f32 1.442695, %v6075_v36  ;;  %v3181_v21 = vpop.eup %3180  ;;  %v6078_v36 = vld [vmem:[#allocation4_spill] sm:$0xff]  ;;  %v4521_v34 = vmax.f32 %v718_v7, %v766_v16  ;;  %v4527_v1 = vmax.f32 %v725_v48, %v773_v51  ;;  %v724_v16 = vadd.f32 %v4164_v17, %v4386_v56 }
 0x160   : > { %6063 = vst [vmem:[#allocation73_spill] sm:$0xff] %v4450_v49  ;;  %v6079_v31 = vsub.f32 %v6078_v36, %v4221_v39  ;;  %v6080_v49 = vld [vmem:[#allocation39_spill] sm:$0xff] }
 0x161   : > { %6064 = vst [vmem:[#allocation74_spill] sm:$0xff] %v4453_v43  ;;  %v4512_v38 = vmul.f32 %v3179_v10, %v6080_v49  ;;  %3188 = vpow2.f32 %v1761_v29  ;;  %v864_v10 = vmax.f32 %v860_v27, %v4514_v5  ;;  %v6094_v36 = vld [vmem:[#allocation7_spill] sm:$0xff]  ;;  %v772_v56 = vmul.f32 0.01, %v724_v16 }
 0x162   : > { %6065 = vst [vmem:[#allocation75_spill] sm:$0xff] %v4456_v26  ;;  %v1888_v26 = vadd.f32 %v1887_v46, %v4486_v19  ;;  %v1763_v15 = vmul.f32 1.442695, %v6079_v31  ;;  %v3183_v46 = vpop.eup %3182  ;;  %v6086_v31 = vld [vmem:[#allocation40_spill] sm:$0xff] }
 0x163   : > { %6071 = vst [vmem:[#allocation11_spill] sm:$0xff] %v4483_v9  ;;  %v4524_v55 = vmul.f32 %v3181_v21, %v6086_v31  ;;  %v3185_v11 = vpop.eup %3184  ;;  %v6090_v9 = vld [vmem:[#allocation9_spill] sm:$0xff]  ;;  %v720_v21 = vadd.f32 %v4164_v17, %v4365_v35  ;;  %v868_v48 = vmax.f32 %v864_v10, %v4521_v34  ;;  %v6095_v35 = vsub.f32 %v6094_v36, %v4221_v39 }
 0x164   : > { %6073 = vst [vmem:[#allocation16_spill] sm:$0xff] %v4486_v19  ;;  %v1889_v30 = vadd.f32 %v1888_v26, %v4502_v18  ;;  %v6083_v19 = vld [vmem:[#allocation18_spill] sm:$0xff]  ;;  %v4530_v26 = vpop.permute.xlu0 %593  ;;  %v6091_v29 = vsub.f32 %v6090_v9, %v4221_v39  ;;  %v4541_v51 = vpop.permute.xlu1 %568  ;;  %3190 = vpow2.f32 %v1763_v15  ;;  %v6093_v9 = vld [vmem:[#allocation13_spill] sm:$0xff]  ;;  %v6099_v36 = vsub.f32 %v6021_v57, %v4221_v39 }
 0x165   : > { %6077 = vst [vmem:[#allocation14_spill] sm:$0xff] %v4502_v18  ;;  %v3187_v18 = vpop.eup %3186  ;;  %v6096_v31 = vld [vmem:[#allocation21_spill] sm:$0xff]  ;;  %v863_v10 = vmax.f32 %v4527_v1, %v868_v48  ;;  %v4572_v15 = vmax.f32 %v724_v16, %v772_v56  ;;  %v728_v48 = vadd.f32 %v4164_v17, %v4408_v40  ;;  %v6104_v16 = vsub.f32 %v3897_v2, %v4221_v39 }
 0x166   : > { %6081 = vst [vmem:[#allocation5_spill] sm:$0xff] %v4512_v38  ;;  %v1890_v53 = vadd.f32 %v1889_v30, %v4512_v38  ;;  %v1765_v7 = vmul.f32 1.442695, %v6091_v29  ;;  %v4544_v30 = vmul.f32 %v3183_v46, %v4276_v45  ;;  %v1767_v38 = vmul.f32 1.442695, %v6095_v35  ;;  %v6098_v29 = vld [vmem:[#allocation25_spill] sm:$0xff] }
 0x167   : > { %v4505_v43 = vpop.permute.xlu2 %573  ;;  %6082 = vst [vmem:[#allocation12_spill] sm:$0xff] %v4514_v5  ;;  %v768_v5 = vmul.f32 0.01, %v720_v21  ;;  %v4556_v46 = vmul.f32 %v3185_v11, %v4272_v13  ;;  %v3189_v45 = vpop.eup %3188  ;;  %v1769_v35 = vmul.f32 1.442695, %v6099_v36  ;;  %v4570_v11 = vmul.f32 %v3187_v18, %v4367_v60  ;;  %v6103_v18 = vld [vmem:[#allocation20_spill] sm:$0xff] }
 0x168   : > { %6085 = vst [vmem:[#allocation4_spill] sm:$0xff] %v4521_v34  ;;  %v1891_v27 = vadd.f32 %v1890_v53, %v4524_v55  ;;  %3192 = vpow2.f32 %v1765_v7  ;;  %v1771_v56 = vmul.f32 1.442695, %v6104_v16  ;;  %v776_v40 = vmul.f32 0.01, %v728_v48  ;;  %v6108_v34 = vld [vmem:[#allocation8_spill] sm:$0xff] }
 0x169   : > { %6087 = vst [vmem:[#allocation18_spill] sm:$0xff] %v4524_v55  ;;  %v4567_v49 = vmax.f32 %v720_v21, %v768_v5  ;;  %3194 = vpow2.f32 %v1767_v38  ;;  %v723_v5 = vadd.f32 %v4164_v17, %v4419_v6  ;;  %v6105_v38 = vld [vmem:[#allocation27_spill] sm:$0xff]  ;;  %v6109_v60 = vsub.f32 %v6108_v34, %v4221_v39 }
 0x16a   : > { %6088 = vst [vmem:[#allocation17_spill] sm:$0xff] %v4527_v1  ;;  %v1892_v53 = vadd.f32 %v1891_v27, %v4544_v30  ;;  %v3191_v7 = vpop.eup %3190  ;;  %3196 = vpow2.f32 %v1769_v35  ;;  %v4601_v16 = vmax.f32 %v728_v48, %v776_v40  ;;  %v6111_v35 = vsub.f32 %v6024_v3, %v4221_v39 }
 0x16b   : > { %6092 = vst [vmem:[#allocation15_spill] sm:$0xff] %v4544_v30  ;;  %v6102_v30 = vld [vmem:[#allocation19_spill] sm:$0xff]  ;;  %v867_v57 = vmax.f32 %v863_v10, %v4567_v49  ;;  %v6106_v10 = vsub.f32 %v3876_v52, %v4221_v39  ;;  %v771_v21 = vmul.f32 0.01, %v723_v5  ;;  %v1775_v52 = vmul.f32 1.442695, %v6109_v60 }
 0x16c   : > { %6097 = vst [vmem:[#allocation9_spill] sm:$0xff] %v4556_v46  ;;  %v1893_v27 = vadd.f32 %v1892_v53, %v4556_v46  ;;  %v4588_v36 = vpop.permute.xlu0 %608  ;;  %v4596_v46 = vmul.f32 %v3189_v45, %v4280_v25  ;;  %v4598_v1 = vpop.permute.xlu1 %583  ;;  %v1777_v48 = vmul.f32 1.442695, %v6111_v35  ;;  %3198 = vpow2.f32 %v1771_v56 }
 0x16d   : > { %6100 = vst [vmem:[#allocation13_spill] sm:$0xff] %v4570_v11  ;;  %v1773_v6 = vmul.f32 1.442695, %v6106_v10  ;;  %v871_v2 = vmax.f32 %v867_v57, %v4572_v15  ;;  %v4609_v10 = vmul.f32 %v3191_v7, %v4278_v24  ;;  %v4611_v45 = vmax.f32 %v723_v5, %v771_v21 }
 0x16e   : > { %6101 = vst [vmem:[#allocation7_spill] sm:$0xff] %v4572_v15  ;;  %v1894_v53 = vadd.f32 %v1893_v27, %v4570_v11  ;;  %v727_v27 = vadd.f32 %v4164_v17, %v4442_v47  ;;  %v3193_v11 = vpop.eup %3192  ;;  %v6112_v60 = vsub.f32 %v4018_v58, %v4221_v39  ;;  %v6113_v5 = vsub.f32 %v4021_v23, %v4221_v39 }
 0x16f   : > { %v4560_v55 = vpop.permute.xlu2 %588  ;;  %6107 = vst [vmem:[#allocation21_spill] sm:$0xff] %v4596_v46  ;;  %v862_v57 = vmax.f32 %v4601_v16, %v871_v2  ;;  %v3195_v15 = vpop.eup %3194  ;;  %v731_v21 = vadd.f32 %v4164_v17, %v4472_v0  ;;  %3200 = vpow2.f32 %v1773_v6  ;;  %v4630_v56 = vmul.f32 %v3193_v11, %v4375_v20 }
 0x170   : > { %6110 = vst [vmem:[#allocation25_spill] sm:$0xff] %v4609_v10  ;;  %v1895_v25 = vadd.f32 %v1894_v53, %v4596_v46  ;;  %v775_v47 = vmul.f32 0.01, %v727_v27  ;;  %v1779_v34 = vmul.f32 1.442695, %v6112_v60  ;;  %v6115_v58 = vsub.f32 %v4011_v59, %v4221_v39  ;;  %v3197_v0 = vpop.eup %3196 }
 0x171   : > { %v1781_v7 = vmul.f32 1.442695, %v6113_v5  ;;  %6114 = vst [vmem:[#allocation19_spill] sm:$0xff] %v4630_v56  ;;  %v866_v53 = vmax.f32 %v862_v57, %v4611_v45  ;;  %3202 = vpow2.f32 %v1775_v52  ;;  %v779_v23 = vmul.f32 0.01, %v731_v21 }
 0x172   : > { %v1896_v3 = vadd.f32 %v1895_v25, %v4609_v10  ;;  %v4633_v2 = vmax.f32 %v727_v27, %v775_v47  ;;  %v1783_v35 = vmul.f32 1.442695, %v6115_v58  ;;  %v726_v60 = vadd.f32 %v4164_v17, %v4481_v22  ;;  %v3199_v10 = vpop.eup %3198 }
 0x173   : > { %v6116_v25 = vsub.f32 %v4013_v4, %v4221_v39  ;;  %3204 = vpow2.f32 %v1777_v48  ;;  %v4644_v11 = vmul.f32 %v3195_v15, %v4286_v32  ;;  %v6118_v59 = vsub.f32 %v6067_v33, %v4221_v39 }
 0x174   : > { %v1897_v27 = vadd.f32 %v1896_v3, %v4630_v56  ;;  %v624_v57 = vpop.permute.xlu0 %623  ;;  %v870_v47 = vmax.f32 %v866_v53, %v4633_v2  ;;  %v4651_v5 = vmax.f32 %v731_v21, %v779_v23  ;;  %v774_v22 = vmul.f32 0.01, %v726_v60  ;;  %v599_v58 = vpop.permute.xlu1 %598 }
 0x175   : > { %v1785_v6 = vmul.f32 1.442695, %v6116_v25  ;;  %6117 = vst [vmem:[#allocation20_spill] sm:$0xff] %v4644_v11  ;;  %v1787_v52 = vmul.f32 1.442695, %v6118_v59  ;;  %v6120_v4 = vsub.f32 %v6068_v41, %v4221_v39  ;;  %3206 = vpow2.f32 %v1779_v34  ;;  %v3201_v23 = vpop.eup %3200 }
 0x176   : > { %6119 = vst [vmem:[#allocation27_spill] sm:$0xff] %v4651_v5  ;;  %v730_v15 = vadd.f32 %v4164_v17, %v4505_v43  ;;  %v1898_v3 = vadd.f32 %v1897_v27, %v4644_v11  ;;  %3208 = vpow2.f32 %v1781_v7  ;;  %v4660_v33 = vmul.f32 %v3197_v0, %v4284_v28 }
 0x177   : > { %v4618_v40 = vpop.permute.xlu2 %603  ;;  %v1789_v48 = vmul.f32 1.442695, %v6120_v4  ;;  %v874_v21 = vmax.f32 %v870_v47, %v4651_v5  ;;  %v4663_v53 = vmax.f32 %v726_v60, %v774_v22  ;;  %v6122_v25 = vsub.f32 %v6069_v50, %v4221_v39  ;;  %v3203_v27 = vpop.eup %3202 }
 0x178   : > { %6121 = vst [vmem:[#allocation8_spill] sm:$0xff] %v4660_v33  ;;  %3210 = vpow2.f32 %v1783_v35  ;;  %v778_v34 = vmul.f32 0.01, %v730_v15  ;;  %v734_v43 = vadd.f32 %v4164_v17, %v4530_v26  ;;  %v4671_v7 = vmul.f32 %v3199_v10, %v4393_v44  ;;  %v320_v44 = vld [vmem:[%s4174_s8 + $0x58] sm:$0xff] }
 0x179   : > { %v1791_v41 = vmul.f32 1.442695, %v6122_v25  ;;  %3212 = vpow2.f32 %v1785_v6  ;;  %v869_v0 = vmax.f32 %v4663_v53, %v874_v21  ;;  %v1899_v60 = vadd.f32 %v1898_v3, %v4660_v33  ;;  %v3205_v47 = vpop.eup %3204  ;;  %v6125_v21 = vld [vmem:[#allocation47_spill] sm:$0xff] }
 0x17a   : > { %6123 = vst [vmem:[#allocation76_spill] sm:$0xff] %v4671_v7  ;;  %3214 = vpow2.f32 %v1787_v52  ;;  %v4675_v22 = vmax.f32 %v730_v15, %v778_v34  ;;  %v782_v50 = vmul.f32 0.01, %v734_v43  ;;  %v729_v35 = vadd.f32 %v4164_v17, %v4541_v51 }
 0x17b   : > { %v4680_v26 = vmul.f32 %v3201_v23, %v4293_v54  ;;  %v1900_v6 = vadd.f32 %v1899_v60, %v4671_v7  ;;  %v733_v10 = vadd.f32 %v4164_v17, %v4560_v55  ;;  %v737_v4 = vadd.f32 %v4164_v17, %v4588_v36  ;;  %v3207_v3 = vpop.eup %3206 }
 0x17c   : > { %v4688_v52 = vmul.f32 %v3203_v27, %v6125_v21  ;;  %v873_v15 = vmax.f32 %v869_v0, %v4675_v22  ;;  %v4691_v25 = vmax.f32 %v734_v43, %v782_v50  ;;  %v777_v51 = vmul.f32 0.01, %v729_v35  ;;  %v639_v34 = vpop.permute.xlu0 %638  ;;  %v3209_v23 = vpop.eup %3208 }
 0x17d   : > { %6124 = vst [vmem:[#allocation77_spill] sm:$0xff] %v4680_v26  ;;  %v4694_v33 = vmul.f32 %v3205_v47, %v4423_v61  ;;  %v781_v60 = vmul.f32 0.01, %v733_v10  ;;  %v1901_v55 = vadd.f32 %v1900_v6, %v4680_v26  ;;  %v785_v7 = vmul.f32 0.01, %v737_v4  ;;  %v614_v11 = vpop.permute.xlu1 %613 }
 0x17e   : > { %6126 = vst [vmem:[#allocation78_spill] sm:$0xff] %v4691_v25  ;;  %v3211_v36 = vpop.eup %3210  ;;  %v877_v56 = vmax.f32 %v873_v15, %v4691_v25  ;;  %v4698_v27 = vmax.f32 %v729_v35, %v777_v51  ;;  %v732_v43 = vadd.f32 %v4164_v17, %v4598_v1  ;;  %v736_v0 = vadd.f32 %v4164_v17, %v4618_v40 }
 0x17f   : > { %v619_v59 = vpop.permute.xlu2 %618  ;;  %v3213_v50 = vpop.eup %3212  ;;  %v4704_v46 = vmax.f32 %v733_v10, %v781_v60  ;;  %v4706_v47 = vmax.f32 %v737_v4, %v785_v7  ;;  %v1902_v6 = vadd.f32 %v1901_v55, %v4688_v52  ;;  %v740_v26 = vadd.f32 %v4164_v17, %v624_v57 }
 0x180   : > { %v3215_v61 = vpop.eup %3214  ;;  %v872_v15 = vmax.f32 %v4698_v27, %v877_v56  ;;  %v780_v35 = vmul.f32 0.01, %v732_v43  ;;  %v784_v51 = vmul.f32 0.01, %v736_v0  ;;  %v735_v25 = vadd.f32 %v4164_v17, %v599_v58 }
 0x181   : > { %6127 = vst [vmem:[#allocation79_spill] sm:$0xff] %v4704_v46  ;;  %v6129_v40 = vsub.f32 %v6076_v14, %v4221_v39  ;;  %3216 = vpow2.f32 %v1789_v48  ;;  %v4716_v7 = vmul.f32 %v3207_v3, %v4358_v62  ;;  %v1903_v10 = vadd.f32 %v1902_v6, %v4694_v33  ;;  %v6132_v14 = vld [vmem:[#allocation51_spill] sm:$0xff] }
 0x182   : > { %6128 = vst [vmem:[#allocation80_spill] sm:$0xff] %v4706_v47  ;;  %v876_v57 = vmax.f32 %v872_v15, %v4704_v46  ;;  %v4720_v4 = vmax.f32 %v732_v43, %v780_v35  ;;  %v788_v56 = vmul.f32 0.01, %v740_v26  ;;  %v739_v60 = vadd.f32 %v4164_v17, %v619_v59 }
 0x183   : > { %v1793_v21 = vmul.f32 1.442695, %v6129_v40  ;;  %v6131_v58 = vsub.f32 %v6083_v19, %v4221_v39  ;;  %3218 = vpow2.f32 %v1791_v41  ;;  %v4727_v40 = vmul.f32 %v3209_v23, %v6132_v14 }
 0x184   : > { %6130 = vst [vmem:[#allocation81_spill] sm:$0xff] %v4720_v4  ;;  %v1904_v48 = vadd.f32 %v1903_v10, %v4716_v7  ;;  %v880_v3 = vmax.f32 %v876_v57, %v4706_v47  ;;  %v4731_v6 = vmax.f32 %v736_v0, %v784_v51  ;;  %v783_v15 = vmul.f32 0.01, %v735_v25  ;;  %v654_v35 = vpop.permute.xlu0 %653 }
 0x185   : > { %v1795_v55 = vmul.f32 1.442695, %v6131_v58  ;;  %v743_v43 = vadd.f32 %v4164_v17, %v639_v34  ;;  %v6134_v59 = vsub.f32 %v6084_v42, %v4221_v39  ;;  %3220 = vpow2.f32 %v1793_v21  ;;  %v629_v23 = vpop.permute.xlu1 %628 }
 0x186   : > { %6133 = vst [vmem:[#allocation82_spill] sm:$0xff] %v4731_v6  ;;  %v4738_v19 = vmul.f32 %v3211_v36, %v4437_v12  ;;  %v1905_v41 = vadd.f32 %v1904_v48, %v4727_v40  ;;  %v875_v10 = vmax.f32 %v4720_v4, %v880_v3  ;;  %v4742_v57 = vmax.f32 %v740_v26, %v788_v56 }
 0x187   : > { %v634_v1 = vpop.permute.xlu2 %633  ;;  %v1797_v62 = vmul.f32 1.442695, %v6134_v59  ;;  %v787_v0 = vmul.f32 0.01, %v739_v60  ;;  %v738_v51 = vadd.f32 %v4164_v17, %v614_v11  ;;  %v3217_v34 = vpop.eup %3216  ;;  %v6136_v58 = vsub.f32 %v6089_v8, %v4221_v39 }
 0x188   : > { %6135 = vst [vmem:[#allocation83_spill] sm:$0xff] %v4742_v57  ;;  %3222 = vpow2.f32 %v1795_v55  ;;  %v4749_v21 = vmul.f32 %v3213_v50, %v4373_v63  ;;  %v1906_v36 = vadd.f32 %v1905_v41, %v4738_v19  ;;  %v879_v48 = vmax.f32 %v875_v10, %v4731_v6  ;;  %v6140_v55 = vld [vmem:[#allocation55_spill] sm:$0xff] }
 0x189   : > { %v1799_v42 = vmul.f32 1.442695, %v6136_v58  ;;  %v4753_v59 = vmax.f32 %v735_v25, %v783_v15  ;;  %v791_v26 = vmul.f32 0.01, %v743_v43  ;;  %v742_v56 = vadd.f32 %v4164_v17, %v634_v1  ;;  %v3219_v11 = vpop.eup %3218 }
 0x18a   : > { %6137 = vst [vmem:[#allocation84_spill] sm:$0xff] %v4749_v21  ;;  %v6139_v12 = vsub.f32 %v6093_v9, %v4221_v39  ;;  %3224 = vpow2.f32 %v1797_v62  ;;  %v4760_v58 = vmul.f32 %v3215_v61, %v6140_v55  ;;  %v1907_v50 = vadd.f32 %v1906_v36, %v4749_v21  ;;  %v6156_v55 = vld [vmem:[#allocation65_spill] sm:$0xff] }
 0x18b   : > { %6138 = vst [vmem:[#allocation85_spill] sm:$0xff] %v4753_v59  ;;  %v883_v41 = vmax.f32 %v879_v48, %v4742_v57  ;;  %v4764_v10 = vmax.f32 %v739_v60, %v787_v0  ;;  %v786_v25 = vmul.f32 0.01, %v738_v51  ;;  %v746_v15 = vadd.f32 %v4164_v17, %v654_v35  ;;  %v3221_v1 = vpop.eup %3220 }
 0x18c   : > { %v1801_v8 = vmul.f32 1.442695, %v6139_v12  ;;  %6141 = vst [vmem:[#allocation86_spill] sm:$0xff] %v4760_v58  ;;  %v6143_v63 = vsub.f32 %v6096_v31, %v4221_v39  ;;  %3226 = vpow2.f32 %v1799_v42  ;;  %v4771_v62 = vmul.f32 %v3217_v34, %v4440_v37  ;;  %v669_v36 = vpop.permute.xlu0 %668 }
 0x18d   : > { %6142 = vst [vmem:[#allocation87_spill] sm:$0xff] %v4764_v10  ;;  %v1908_v61 = vadd.f32 %v1907_v50, %v4760_v58  ;;  %v878_v12 = vmax.f32 %v4753_v59, %v883_v41  ;;  %v4775_v9 = vmax.f32 %v743_v43, %v791_v26  ;;  %v790_v60 = vmul.f32 0.01, %v742_v56  ;;  %v644_v50 = vpop.permute.xlu1 %643  ;;  %v6167_v58 = vld [vmem:[#allocation69_spill] sm:$0xff] }
 0x18e   : > { %v1803_v47 = vmul.f32 1.442695, %v6143_v63  ;;  %6144 = vst [vmem:[#allocation88_spill] sm:$0xff] %v4771_v62  ;;  %v741_v0 = vadd.f32 %v4164_v17, %v629_v23  ;;  %v3223_v35 = vpop.eup %3222  ;;  %v6145_v48 = vsub.f32 %v6098_v29, %v4221_v39  ;;  %3228 = vpow2.f32 %v1801_v8  ;;  %v6146_v63 = vld [vmem:[#allocation59_spill] sm:$0xff]  ;;  %v6150_v8 = vld [vmem:[#allocation58_spill] sm:$0xff] }
 0x18f   : > { %v649_v3 = vpop.permute.xlu2 %648  ;;  %v4782_v42 = vmul.f32 %v3219_v11, %v6146_v63  ;;  %v1909_v34 = vadd.f32 %v1908_v61, %v4771_v62  ;;  %v882_v41 = vmax.f32 %v878_v12, %v4764_v10  ;;  %v4786_v43 = vmax.f32 %v738_v51, %v786_v25 }
 0x190   : > { %v1805_v31 = vmul.f32 1.442695, %v6145_v48  ;;  %v794_v26 = vmul.f32 0.01, %v746_v15  ;;  %v745_v23 = vadd.f32 %v4164_v17, %v649_v3  ;;  %v3225_v37 = vpop.eup %3224  ;;  %v6149_v57 = vsub.f32 %v6102_v30, %v4221_v39 }
 0x191   : > { %6147 = vst [vmem:[#allocation89_spill] sm:$0xff] %v4782_v42  ;;  %3230 = vpow2.f32 %v1803_v47  ;;  %v4793_v48 = vmul.f32 %v3221_v1, %v6150_v8  ;;  %v1910_v11 = vadd.f32 %v1909_v34, %v4782_v42  ;;  %v886_v61 = vmax.f32 %v882_v41, %v4775_v9  ;;  %v6153_v47 = vld [vmem:[#allocation72_spill] sm:$0xff]  ;;  %v6155_v42 = vld [vmem:[#allocation63_spill] sm:$0xff] }
 0x192   : > { %6148 = vst [vmem:[#allocation90_spill] sm:$0xff] %v4786_v43  ;;  %v1807_v29 = vmul.f32 1.442695, %v6149_v57  ;;  %v4797_v62 = vmax.f32 %v742_v56, %v790_v60  ;;  %v789_v51 = vmul.f32 0.01, %v741_v0  ;;  %v749_v25 = vadd.f32 %v4164_v17, %v669_v36  ;;  %v3227_v3 = vpop.eup %3226 }
 0x193   : > { %6151 = vst [vmem:[#allocation91_spill] sm:$0xff] %v4793_v48  ;;  %v6152_v63 = vsub.f32 %v6103_v18, %v4221_v39  ;;  %3232 = vpow2.f32 %v1805_v31  ;;  %v4804_v57 = vmul.f32 %v3223_v35, %v6153_v47  ;;  %v1911_v1 = vadd.f32 %v1910_v11, %v4793_v48 }
 0x194   : > { %v881_v34 = vmax.f32 %v4786_v43, %v886_v61  ;;  %v4808_v41 = vmax.f32 %v746_v15, %v794_v26  ;;  %v793_v56 = vmul.f32 0.01, %v745_v23  ;;  %v744_v60 = vadd.f32 %v4164_v17, %v644_v50  ;;  %v3229_v36 = vpop.eup %3228  ;;  %v684_v26 = vpop.permute.xlu0 %683  ;;  %v6172_v43 = vld [vmem:[#allocation67_spill] sm:$0xff] }
 0x195   : > { %v1809_v30 = vmul.f32 1.442695, %v6152_v63  ;;  %6154 = vst [vmem:[#allocation92_spill] sm:$0xff] %v4804_v57  ;;  %v353_v8 = vunpack.c.0.s8 %v6155_v42  ;;  %3234 = vpow2.f32 %v1807_v29  ;;  %v4813_v18 = vmul.f32 %v3225_v37, %v6156_v55  ;;  %v6160_v29 = vld [vmem:[#allocation62_spill] sm:$0xff] }
 0x196   : > { %v1912_v31 = vadd.f32 %v1911_v1, %v4804_v57  ;;  %v885_v35 = vmax.f32 %v881_v34, %v4797_v62  ;;  %v4817_v63 = vmax.f32 %v741_v0, %v789_v51  ;;  %v797_v11 = vmul.f32 0.01, %v749_v25  ;;  %v659_v1 = vpop.permute.xlu1 %658 }
 0x197   : > { %v664_v12 = vpop.permute.xlu2 %663  ;;  %6157 = vst [vmem:[#allocation63_spill] sm:$0xff] %v4813_v18  ;;  %v3231_v61 = vpop.eup %3230  ;;  %v6159_v50 = vsub.f32 %v6105_v38, %v4221_v39  ;;  %3236 = vpow2.f32 %v1809_v30  ;;  %v4824_v47 = vmul.f32 %v3227_v3, %v6160_v29  ;;  %v4828_v0 = vmax.f32 %v745_v23, %v793_v56  ;;  %v6164_v30 = vld [vmem:[#allocation73_spill] sm:$0xff] }
 0x198   : > { %6158 = vst [vmem:[#allocation93_spill] sm:$0xff] %v4817_v63  ;;  %v748_v15 = vadd.f32 %v4164_v17, %v664_v12  ;;  %v1913_v37 = vadd.f32 %v1912_v31, %v4813_v18  ;;  %v889_v34 = vmax.f32 %v885_v35, %v4808_v41  ;;  %v792_v51 = vmul.f32 0.01, %v744_v60 }
 0x199   : > { %v1811_v48 = vmul.f32 1.442695, %v6159_v50  ;;  %6161 = vst [vmem:[#allocation94_spill] sm:$0xff] %v4824_v47  ;;  %v752_v12 = vadd.f32 %v4164_v17, %v684_v26  ;;  %v3233_v57 = vpop.eup %3232  ;;  %v355_v55 = vunpack.c.2.s8 %v6155_v42  ;;  %v6162_v38 = vunpack.c.1.s8 %v6155_v42 }
 0x19a   : > { %v4837_v3 = vmul.f32 %v3229_v36, %v6164_v30  ;;  %v1914_v31 = vadd.f32 %v1913_v37, %v4824_v47  ;;  %v884_v18 = vmax.f32 %v4817_v63, %v889_v34  ;;  %v4841_v35 = vmax.f32 %v749_v25, %v797_v11  ;;  %v6170_v63 = vld [vmem:[#allocation26_spill] sm:$0xff] }
 0x19b   : > { %v4834_v50 = vcvt.s32.f32 %v6162_v38  ;;  %v796_v23 = vmul.f32 0.01, %v748_v15  ;;  %v747_v56 = vadd.f32 %v4164_v17, %v659_v1  ;;  %v3235_v29 = vpop.eup %3234  ;;  %v4844_v10 = vcvt.s32.f32 %v353_v8  ;;  %v6169_v1 = vld [vmem:[#allocation23_spill] sm:$0xff] }
 0x19c   : > { %6165 = vst [vmem:[#allocation96_spill] sm:$0xff] %v4837_v3  ;;  %3238 = vpow2.f32 %v1811_v48  ;;  %v4847_v38 = vmul.f32 %v3231_v61, %v6167_v58  ;;  %v1915_v36 = vadd.f32 %v1914_v31, %v4837_v3  ;;  %v888_v30 = vmax.f32 %v884_v18, %v4828_v0  ;;  %v699_v3 = vpop.permute.xlu0 %698 }
 0x19d   : > { %6163 = vst [vmem:[#allocation95_spill] sm:$0xff] %v4834_v50  ;;  %v4851_v37 = vmax.f32 %v744_v60, %v792_v51  ;;  %v800_v34 = vmul.f32 0.01, %v752_v12  ;;  %v3237_v11 = vpop.eup %3236  ;;  %v1731_v47 = vsub.f32 %v6169_v1, %v4221_v39  ;;  %v6171_v8 = vsub.f32 %v6170_v63, %v4221_v39 }
 0x19e   : > { %6166 = vst [vmem:[#allocation97_spill] sm:$0xff] %v4844_v10  ;;  %v4860_v61 = vmul.f32 %v3233_v57, %v6172_v43  ;;  %v1916_v31 = vadd.f32 %v1915_v36, %v4847_v38  ;;  %v4863_v18 = vcvt.s32.f32 %v355_v55  ;;  %v892_v60 = vmax.f32 %v888_v30, %v4841_v35  ;;  %v674_v36 = vpop.permute.xlu1 %673  ;;  %v6175_v55 = vld [vmem:[#allocation22_spill] sm:$0xff]  ;;  %v4880_v43 = vld [vmem:[%s4174_s8 + $0x48] sm:$0xff] }
 0x19f   : > { %v679_v26 = vpop.permute.xlu2 %678  ;;  %6168 = vst [vmem:[#allocation98_spill] sm:$0xff] %v4847_v38  ;;  %v1813_v48 = vmul.f32 1.442695, %v6171_v8  ;;  %v4866_v51 = vmax.f32 %v748_v15, %v796_v23  ;;  %v356_v1 = vunpack.c.3.s8 %v6155_v42  ;;  %v4870_v58 = vmul.f32 %v3235_v29, %v4844_v10 }
 0x1a0   : > { %v751_v25 = vadd.f32 %v4164_v17, %v679_v26  ;;  %6173 = vst [vmem:[#allocation23_spill] sm:$0xff] %v4860_v61  ;;  %v795_v26 = vmul.f32 0.01, %v747_v56  ;;  %v1917_v63 = vadd.f32 %v1916_v31, %v4860_v61  ;;  %v755_v57 = vadd.f32 %v4164_v17, %v699_v3  ;;  %v3398_v61 = vld [vmem:[%s3572_s20] ss:$0 sm:$0xff] }
 0x1a1   : > { %6174 = vst [vmem:[#allocation26_spill] sm:$0xff] %v4863_v18  ;;  %v1732_v8 = vsub.f32 %v6175_v55, %v4221_v39  ;;  %v887_v30 = vmax.f32 %v4851_v37, %v892_v60  ;;  %v4877_v15 = vmax.f32 %v752_v12, %v800_v34  ;;  %v1815_v42 = vmul.f32 1.442695, %v1731_v47 }
 0x1a2   : > { %v799_v23 = vmul.f32 0.01, %v751_v25  ;;  %v3239_v38 = vpop.eup %3238  ;;  %3240 = vpow2.f32 %v1813_v48  ;;  %v4883_v29 = vmul.f32 %v3237_v11, %v4834_v50  ;;  %v1918_v31 = vadd.f32 %v1917_v63, %v4870_v58 }
 0x1a3   : > { %6176 = vst [vmem:[#allocation22_spill] sm:$0xff] %v4877_v15  ;;  %v891_v17 = vmax.f32 %v887_v30, %v4866_v51  ;;  %v4887_v3 = vmax.f32 %v747_v56, %v795_v26  ;;  %v803_v55 = vmul.f32 0.01, %v755_v57  ;;  %v750_v60 = vadd.f32 %v3398_v61, %v674_v36 }
 0x1a4   : > { %v357_v34 = vunpack.c.0.s8 %v4880_v43  ;;  %v4892_v14 = vmax.f32 %v751_v25, %v799_v23  ;;  %v1919_v47 = vadd.f32 %v1918_v31, %v4883_v29  ;;  %v4895_v11 = vcvt.s32.f32 %v356_v1 }
 0x1a5   : > { %v895_v10 = vmax.f32 %v891_v17, %v4877_v15  ;;  %v1817_v48 = vmul.f32 1.442695, %v1732_v8  ;;  %3242 = vpow2.f32 %v1815_v42  ;;  %v4898_v63 = vmul.f32 %v3239_v38, %v4863_v18  ;;  %v6180_v42 = vld [vmem:[#allocation29_spill] sm:$0xff]  ;;  %v6183_v18 = vld [vmem:[#allocation32_spill] sm:$0xff] }
 0x1a6   : > { %6177 = vst [vmem:[#allocation99_spill] sm:$0xff] %v4895_v11  ;;  %v4901_v26 = vmax.f32 %v755_v57, %v803_v55  ;;  %v798_v36 = vmul.f32 0.01, %v750_v60  ;;  %v689_v6 = vpop.permute.xlu1 %688  ;;  %v358_v1 = vunpack.c.1.s8 %v4880_v43  ;;  %v4906_v8 = vcvt.s32.f32 %v357_v34 }
 0x1a7   : > { %v694_v12 = vpop.permute.xlu2 %693  ;;  %v890_v56 = vmax.f32 %v4887_v3, %v895_v10  ;;  %v1920_v23 = vadd.f32 %v1919_v47, %v4898_v63  ;;  %v753_v31 = vadd.f32 %v3398_v61, %v689_v6  ;;  %v6181_v38 = vsub.f32 %v6180_v42, %v4221_v39 }
 0x1a8   : > { %6178 = vst [vmem:[#allocation100_spill] sm:$0xff] %v4901_v26  ;;  %v754_v30 = vadd.f32 %v3398_v61, %v694_v12  ;;  %v3241_v50 = vpop.eup %3240  ;;  %3244 = vpow2.f32 %v1817_v48  ;;  %v4915_v55 = vmax.f32 %v750_v60, %v798_v36  ;;  %v4918_v34 = vcvt.s32.f32 %v358_v1 }
 0x1a9   : > { %v894_v25 = vmax.f32 %v890_v56, %v4892_v14  ;;  %6179 = vst [vmem:[#allocation101_spill] sm:$0xff] %v4906_v8  ;;  %v1819_v17 = vmul.f32 1.442695, %v6181_v38  ;;  %v4912_v10 = vmul.f32 %v3241_v50, %v4895_v11  ;;  %v801_v47 = vmul.f32 0.01, %v753_v31  ;;  %v6186_v11 = vld [vmem:[#allocation28_spill] sm:$0xff] }
 0x1aa   : > { %v802_v12 = vmul.f32 0.01, %v754_v30  ;;  %6182 = vst [vmem:[#allocation29_spill] sm:$0xff] %v4918_v34  ;;  %v6184_v42 = vsub.f32 %v6183_v18, %v4221_v39  ;;  %v359_v50 = vunpack.c.2.s8 %v4880_v43  ;;  %v360_v46 = vunpack.c.3.s8 %v4880_v43 }
 0x1ab   : > { %v893_v57 = vmax.f32 %v4901_v26, %v894_v25  ;;  %v3243_v56 = vpop.eup %3242  ;;  %v1921_v6 = vadd.f32 %v1920_v23, %v4912_v10  ;;  %3246 = vpow2.f32 %v1819_v17  ;;  %v6187_v23 = vsub.f32 %v6186_v11, %v4221_v39 }
 0x1ac   : > { %v1821_v38 = vmul.f32 1.442695, %v6184_v42  ;;  %v4925_v48 = vmul.f32 %v3243_v56, %v4906_v8  ;;  %v4928_v36 = vmax.f32 %v754_v30, %v802_v12  ;;  %v4934_v18 = vmax.f32 %v753_v31, %v801_v47  ;;  %v319_v42 = vld [vmem:[%s4174_s8 + $0x50] sm:$0xff]  ;;  %v6189_v56 = vld [vmem:[#allocation24_spill] sm:$0xff]  ;;  %v6192_v31 = vld [vmem:[#allocation33_spill] sm:$0xff] }
 0x1ad   : > { %v897_v60 = vmax.f32 %v893_v57, %v4915_v55  ;;  %v1823_v1 = vmul.f32 1.442695, %v6187_v23  ;;  %v6190_v8 = vsub.f32 %v6189_v56, %v4221_v39  ;;  %v4941_v30 = vcvt.s32.f32 %v359_v50 }
 0x1ae   : > { %6185 = vst [vmem:[#allocation32_spill] sm:$0xff] %v4928_v36  ;;  %v3245_v25 = vpop.eup %3244  ;;  %v704_v59 = vpop.permute.xlu1 %703  ;;  %v1922_v21 = vadd.f32 %v1921_v6, %v4925_v48  ;;  %3248 = vpow2.f32 %v1821_v38  ;;  %v361_v43 = vunpack.c.0.s8 %v319_v42  ;;  %v4952_v50 = vcvt.s32.f32 %v360_v46 }
 0x1af   : > { %6188 = vst [vmem:[#allocation28_spill] sm:$0xff] %v4934_v18  ;;  %v756_v17 = vadd.f32 %v3398_v61, %v704_v59  ;;  %v1825_v57 = vmul.f32 1.442695, %v6190_v8  ;;  %v4944_v12 = vmul.f32 %v3245_v25, %v4918_v34  ;;  %v896_v11 = vmax.f32 %v4928_v36, %v897_v60  ;;  %v6215_v36 = vld [vmem:[#allocation6_spill] sm:$0xff] }
 0x1b0   : > { %6191 = vst [vmem:[#allocation24_spill] sm:$0xff] %v4941_v30  ;;  %v6193_v59 = vsub.f32 %v6192_v31, %v4221_v39  ;;  %3250 = vpow2.f32 %v1823_v1  ;;  %v362_v25 = vunpack.c.1.s8 %v319_v42  ;;  %v4957_v54 = vcvt.s32.f32 %v361_v43 }
 0x1b1   : > { %v804_v23 = vmul.f32 0.01, %v756_v17  ;;  %v3247_v6 = vpop.eup %3246  ;;  %v898_v47 = vmax.f32 %v4934_v18, %v896_v11  ;;  %v1923_v8 = vadd.f32 %v1922_v21, %v4944_v12  ;;  %3252 = vpow2.f32 %v1825_v57  ;;  %6194 = vst [vmem:[#allocation33_spill] sm:$0xff] %v4952_v50 }
 0x1b2   : > { %v1827_v61 = vmul.f32 1.442695, %v6193_v59  ;;  %v4955_v56 = vmul.f32 %v3247_v6, %v4941_v30  ;;  %6195 = vst [vmem:[#allocation102_spill] sm:$0xff] %v4957_v54  ;;  %v363_v31 = vunpack.c.2.s8 %v319_v42  ;;  %v4960_v4 = vcvt.s32.f32 %v362_v25 }
 0x1b3   : > { %v852_v38 = vmax.f32 %v756_v17, %v804_v23 }
 0x1b4   : > { %v3249_v34 = vpop.eup %3248  ;;  %3254 = vpow2.f32 %v1827_v61  ;;  %v1924_v59 = vadd.f32 %v1923_v8, %v4955_v56  ;;  %6196 = vst [vmem:[#allocation103_spill] sm:$0xff] %v4960_v4  ;;  %v4965_v57 = vcvt.s32.f32 %v363_v31 }
 0x1b5   : > { %v899_v60 = vmax.f32 %v852_v38, %v898_v47  ;;  %v4963_v21 = vmul.f32 %v3249_v34, %v4952_v50  ;;  %v6198_v47 = vld [vmem:[#allocation34_spill] sm:$0xff] }
 0x1b6   : > { %v3251_v11 = vpop.eup %3250  ;;  %6197 = vst [vmem:[#allocation104_spill] sm:$0xff] %v4965_v57  ;;  %v6199_v8 = vsub.f32 %v6198_v47, %v4221_v39 }
 0x1b7   : > { %v900_v1 = vrot.slane %v899_v60, 4  ;;  %v3253_v17 = vpop.eup %3252  ;;  %v4968_v23 = vmul.f32 %v3251_v11, %v4957_v54  ;;  %v1925_v61 = vadd.f32 %v1924_v59, %v4963_v21 }
 0x1b8   : > { %v1829_v25 = vmul.f32 1.442695, %v6199_v8  ;;  %v4975_v30 = vmul.f32 %v3253_v17, %v4960_v4  ;;  %v364_v8 = vunpack.c.3.s8 %v319_v42  ;;  %v366_v42 = vunpack.c.1.s8 %v320_v44 }
 0x1b9   : > { %v901_v46 = vmax.f32 %v899_v60, %v900_v1  ;;  %v1926_v60 = vadd.f32 %v1925_v61, %v4968_v23  ;;  %v6200_v1 = vld [vmem:[#allocation31_spill] sm:$0xff]  ;;  %v6202_v61 = vld [vmem:[#allocation30_spill] sm:$0xff] }
 0x1ba   : > { %v3255_v43 = vpop.eup %3254  ;;  %v6201_v31 = vsub.f32 %v6200_v1, %v4221_v39  ;;  %3256 = vpow2.f32 %v1829_v25  ;;  %v6203_v1 = vsub.f32 %v6202_v61, %v4221_v39  ;;  %v4996_v5 = vcvt.s32.f32 %v364_v8 }
 0x1bb   : > { %v902_v6 = vrot.slane %v901_v46, 2  ;;  %v4982_v11 = vmul.f32 %v3255_v43, %v4965_v57  ;;  %v1927_v59 = vadd.f32 %v1926_v60, %v4975_v30  ;;  %v6204_v43 = vld [vmem:[#allocation36_spill] sm:$0xff]  ;;  %v5006_v8 = vcvt.s32.f32 %v366_v42 }
 0x1bc   : > { %v1831_v50 = vmul.f32 1.442695, %v6201_v31  ;;  %v1833_v31 = vmul.f32 1.442695, %v6203_v1  ;;  %v6205_v57 = vsub.f32 %v6204_v43, %v4221_v39  ;;  %6206 = vst [vmem:[#allocation34_spill] sm:$0xff] %v4996_v5 }
 0x1bd   : > { %v903_v34 = vmax.f32 %v901_v46, %v902_v6  ;;  %v1928_v17 = vadd.f32 %v1927_v59, %v4982_v11  ;;  %v365_v6 = vunpack.c.0.s8 %v320_v44  ;;  %v368_v59 = vunpack.c.3.s8 %v320_v44  ;;  %6210 = vst [vmem:[#allocation30_spill] sm:$0xff] %v5006_v8 }
 0x1be   : > { %3258 = vpow2.f32 %v1831_v50  ;;  %v1837_v4 = vmul.f32 1.442695, %v6205_v57 }
 0x1bf   : > { %v904_v54 = vrot.slane %v903_v34, 1  ;;  %v5001_v28 = vcvt.s32.f32 %v365_v6 }
 0x1c0   : > { %v3257_v50 = vpop.eup %3256 }
 0x1c1   : > { %v4986_v47 = vmax.f32 %v903_v34, %v904_v54  ;;  %v6207_v54 = vld [vmem:[#allocation35_spill] sm:$0xff]  ;;  %6209 = vst [vmem:[#allocation31_spill] sm:$0xff] %v5001_v28  ;;  %v5004_v57 = vmul.f32 %v3257_v50, %v4996_v5 }
 0x1c2   : > { %v6208_v25 = vsub.f32 %v6207_v54, %v4221_v39  ;;  %v416_v39 = vcvt.s32.f32 %v368_v59 }
 0x1c3   : > { %v953_v46 = vsub.f32 %v852_v38, %v4986_v47  ;;  %v367_v38 = vunpack.c.2.s8 %v320_v44  ;;  %v1929_v50 = vadd.f32 %v1928_v17, %v5004_v57 }
 0x1c4   : > { %v1835_v34 = vmul.f32 1.442695, %v6208_v25  ;;  %v3259_v61 = vpop.eup %3258  ;;  %v6213_v25 = vld [vmem:[#allocation50_spill] sm:$0xff] }
 0x1c5   : > { %v1048_v60 = vmul.f32 1.442695, %v953_v46  ;;  %v5008_v46 = vcvt.s32.f32 %v367_v38  ;;  %v5011_v1 = vmul.f32 %v3259_v61, %v5001_v28  ;;  %v906_v5 = vsub.f32 %v6213_v25, %v4986_v47 }
 0x1c7   : > { %3260 = vpow2.f32 %v1048_v60  ;;  %6211 = vst [vmem:[#allocation36_spill] sm:$0xff] %v5008_v46  ;;  %v954_v17 = vmul.f32 1.442695, %v906_v5 }
 0x1c8   : > { %3262 = vpow2.f32 %v1833_v31 }
 0x1c9   : > { %3264 = vpow2.f32 %v1837_v4  ;;  %v1930_v4 = vadd.f32 %v1929_v50, %v5011_v1 }
 0x1ca   : > { %3266 = vpow2.f32 %v1835_v34  ;;  %v6214_v34 = vld [vmem:[#allocation57_spill] sm:$0xff] }
 0x1cb   : > { %3268 = vpow2.f32 %v954_v17 }
 0x1cd   : > { %v3261_v43 = vpop.eup %3260 }
 0x1ce   : > { %v3263_v42 = vpop.eup %3262  ;;  %v5041_v60 = vmul.f32 %v3261_v43, %v416_v39  ;;  %v907_v43 = vsub.f32 %v6214_v34, %v4986_v47 }
 0x1cf   : > { %v3265_v54 = vpop.eup %3264  ;;  %v1884_v38 = vmul.f32 %v3263_v42, %v5006_v8  ;;  %v908_v42 = vsub.f32 %v6215_v36, %v4986_v47  ;;  %v6218_v36 = vld [vmem:[#allocation38_spill] sm:$0xff] }
 0x1d0   : > { %6212 = vst [vmem:[#allocation35_spill] sm:$0xff] %v5041_v60  ;;  %v3267_v31 = vpop.eup %3266  ;;  %v1886_v61 = vmul.f32 %v3265_v54, %v416_v39  ;;  %v956_v50 = vmul.f32 1.442695, %v907_v43  ;;  %v6217_v54 = vld [vmem:[#allocation37_spill] sm:$0xff] }
 0x1d1   : > { %v1885_v59 = vmul.f32 %v3267_v31, %v5008_v46  ;;  %v1931_v6 = vadd.f32 %v1930_v4, %v1884_v38  ;;  %v6216_v4 = vld [vmem:[#allocation49_spill] sm:$0xff]  ;;  %v910_v25 = vsub.f32 %v6217_v54, %v4986_v47  ;;  %v3269_v5 = vpop.eup %3268  ;;  %v6224_v46 = vld [vmem:[#allocation42_spill] sm:$0xff] }
 0x1d2   : > { %v909_v39 = vsub.f32 %v6216_v4, %v4986_v47  ;;  %3270 = vpow2.f32 %v956_v50  ;;  %v6219_v43 = vld [vmem:[#allocation45_spill] sm:$0xff]  ;;  %v6223_v4 = vld [vmem:[#allocation60_spill] sm:$0xff] }
 0x1d3   : > { %v1932_v44 = vadd.f32 %v1931_v6, %v1885_v59  ;;  %v958_v6 = vmul.f32 1.442695, %v908_v42  ;;  %v5060_v17 = vmul.f32 %v3269_v5, %v6219_v43  ;;  %v6221_v42 = vld [vmem:[#allocation41_spill] sm:$0xff] }
 0x1d4   : > { %v960_v34 = vmul.f32 1.442695, %v909_v39  ;;  %v912_v39 = vsub.f32 %v6223_v4, %v4986_v47 }
 0x1d5   : > { %v1933_v28 = vadd.f32 %v1932_v44, %v1886_v61  ;;  %3272 = vpow2.f32 %v958_v6  ;;  %6220 = vst [vmem:[#allocation50_spill] sm:$0xff] %v5060_v17 }
 0x1d7   : > { %v1934_v60 = vrot.slane %v1933_v28, 4 }
 0x1d9   : > { %v1935_v26 = vadd.f32 %v1934_v60, %v1933_v28  ;;  %v3271_v60 = vpop.eup %3270 }
 0x1da   : > { %v5063_v50 = vmul.f32 %v3271_v60, %v6221_v42  ;;  %v6226_v42 = vld [vmem:[#allocation10_spill] sm:$0xff] }
 0x1db   : > { %v1936_v8 = vrot.slane %v1935_v26, 2 }
 0x1dc   : > { %6222 = vst [vmem:[#allocation57_spill] sm:$0xff] %v5063_v50 }
 0x1dd   : > { %v1937_v18 = vadd.f32 %v1936_v8, %v1935_v26  ;;  %v911_v26 = vsub.f32 %v6218_v36, %v4986_v47  ;;  %v962_v8 = vmul.f32 1.442695, %v910_v25  ;;  %v1098_v25 = vadd.f32 %v5063_v50, %v5060_v17 }
 0x1de   : > { %v966_v36 = vmul.f32 1.442695, %v912_v39  ;;  %v6228_v39 = vld [vmem:[#allocation74_spill] sm:$0xff] }
 0x1df   : > { %v1938_v44 = vrot.slane %v1937_v18, 1 }
 0x1e1   : > { %v1939_v31 = vadd.f32 %v1938_v44, %v1937_v18  ;;  %v3273_v18 = vpop.eup %3272  ;;  %v964_v44 = vmul.f32 1.442695, %v911_v26 }
 0x1e2   : > { %v5068_v15 = vmul.f32 %v3273_v18, %v6224_v46  ;;  %v6227_v46 = vld [vmem:[#allocation68_spill] sm:$0xff] }
 0x1e3   : > { %v1940_v28 = vmax.f32 %v1939_v31, 1e-30 }
 0x1e4   : > { %v1099_v43 = vadd.f32 %v1098_v25, %v5068_v15  ;;  %v6229_v25 = vld [vmem:[#allocation39_spill] sm:$0xff] }
 0x1e5   : > { %3274 = vrcp.f32 %v1940_v28 }
 0x1e6   : > { %3276 = vpow2.f32 %v960_v34  ;;  %v6225_v34 = vld [vmem:[#allocation52_spill] sm:$0xff] }
 0x1e7   : > { %3278 = vpow2.f32 %v962_v8  ;;  %v913_v5 = vsub.f32 %v6225_v34, %v4986_v47 }
 0x1e8   : > { %3280 = vpow2.f32 %v964_v44 }
 0x1e9   : > { %v968_v18 = vmul.f32 1.442695, %v913_v5  ;;  %3282 = vpow2.f32 %v966_v36 }
 0x1eb   : > { %v3275_v6 = vpop.eup %3274  ;;  %3284 = vpow2.f32 %v968_v18 }
 0x1ec   : > { %v3277_v31 = vpop.eup %3276  ;;  %v1942_v54 = vmul.f32 %v3275_v6, %v1940_v28  ;;  %v914_v28 = vsub.f32 %v6227_v46, %v4986_v47  ;;  %v6232_v46 = vld [vmem:[#allocation75_spill] sm:$0xff] }
 0x1ed   : > { %v5076_v26 = vmul.f32 %v3277_v31, %v6226_v42  ;;  %v3279_v8 = vpop.eup %3278 }
 0x1ee   : > { %v1943_v60 = vsub.f32 2.0, %v1942_v54 }
 0x1ef   : > { %v1100_v17 = vadd.f32 %v1099_v43, %v5076_v26 }
 0x1f0   : > { %v5078_v4 = vmul.f32 %v3275_v6, %v1943_v60  ;;  %v5090_v6 = vmul.f32 %v3279_v8, %v6229_v25  ;;  %v3281_v60 = vpop.eup %3280  ;;  %v970_v8 = vmul.f32 1.442695, %v914_v28 }
 0x1f2   : > { %v1992_v50 = vmul.f32 %v5078_v4, %v1886_v61  ;;  %v1991_v54 = vmul.f32 %v5078_v4, %v1885_v59  ;;  %v1945_v44 = vmul.f32 %v5078_v4, %v6228_v39  ;;  %v1961_v31 = vmul.f32 %v5078_v4, %v4688_v52  ;;  %v6230_v52 = vld [vmem:[#allocation4_spill] sm:$0xff] }
 0x1f3   : > { %v1990_v34 = vmul.f32 %v5078_v4, %v1884_v38  ;;  %v1989_v5 = vmul.f32 %v5078_v4, %v5011_v1  ;;  %v1988_v59 = vmul.f32 %v5078_v4, %v5004_v57  ;;  %v1987_v61 = vmul.f32 %v5078_v4, %v4982_v11  ;;  %v6231_v38 = vld [vmem:[#allocation40_spill] sm:$0xff]  ;;  %v3283_v57 = vpop.eup %3282 }
 0x1f4   : > { %2950 = vmatpush.lsf.msrb.mxu2 %v1992_v50  ;;  %v3055_v36 = vpack.i.bf16 %v1961_v31, %v1945_v44  ;;  %v1101_v43 = vadd.f32 %v1100_v17, %v5090_v6  ;;  %v915_v42 = vsub.f32 %v6230_v52, %v4986_v47  ;;  %v5103_v1 = vmul.f32 %v3281_v60, %v6231_v38  ;;  %v6233_v39 = vld [vmem:[#allocation64_spill] sm:$0xff]  ;;  %v6234_v31 = vld [vmem:[#allocation43_spill] sm:$0xff] }
 0x1f5   : > { %v1986_v50 = vmul.f32 %v5078_v4, %v4975_v30  ;;  %v1985_v11 = vmul.f32 %v5078_v4, %v4968_v23  ;;  %v1946_v17 = vmul.f32 %v5078_v4, %v6232_v46  ;;  %v1962_v28 = vmul.f32 %v5078_v4, %v4694_v33  ;;  %v3285_v23 = vpop.eup %3284 }
 0x1f6   : > { %2951 = vmatpush.lsf.msrb.mxu2 %v1991_v54  ;;  %3056 = vxpose.xlu2.b32.start [1/16] %v3055_v36, 128  ;;  %v1102_v18 = vadd.f32 %v1101_v43, %v5103_v1  ;;  %v1984_v54 = vmul.f32 %v5078_v4, %v4963_v21  ;;  %v916_v44 = vsub.f32 %v6233_v39, %v4986_v47  ;;  %v972_v30 = vmul.f32 1.442695, %v915_v42  ;;  %v6235_v36 = vld [vmem:[#allocation11_spill] sm:$0xff]  ;;  %v6236_v42 = vld [vmem:[#allocation12_spill] sm:$0xff] }
 0x1f7   : > { %3286 = vpow2.f32 %v970_v8  ;;  %v5119_v25 = vmul.f32 %v3283_v57, %v6234_v31  ;;  %v3057_v33 = vpack.i.bf16 %v1962_v28, %v1946_v17  ;;  %v918_v21 = vsub.f32 %v6235_v36, %v4986_v47  ;;  %v6238_v17 = vld [vmem:[#allocation54_spill] sm:$0xff] }
 0x1f8   : > { %2952 = vmatpush.lsf.msrb.mxu2 %v1990_v34  ;;  %v917_v34 = vsub.f32 %v4567_v49, %v4986_v47  ;;  %v974_v43 = vmul.f32 1.442695, %v916_v44  ;;  %3288 = vpow2.f32 %v972_v30  ;;  %v5127_v52 = vmul.f32 %v3285_v23, %v4272_v13 }
 0x1f9   : > { %v1103_v60 = vadd.f32 %v1102_v18, %v5119_v25  ;;  %v919_v8 = vsub.f32 %v6236_v42, %v4986_v47  ;;  %v1963_v46 = vmul.f32 %v5078_v4, %v4716_v7  ;;  %v978_v13 = vmul.f32 1.442695, %v918_v21 }
 0x1fa   : > { %2953 = vmatpush.lsf.msrb.mxu2 %v1989_v5  ;;  %v976_v38 = vmul.f32 1.442695, %v917_v34  ;;  %3290 = vpow2.f32 %v974_v43  ;;  %v1983_v30 = vmul.f32 %v5078_v4, %v4955_v56  ;;  %v1982_v34 = vmul.f32 %v5078_v4, %v4944_v12 }
 0x1fb   : > { %v1104_v49 = vadd.f32 %v1103_v60, %v5127_v52  ;;  %v980_v44 = vmul.f32 1.442695, %v919_v8  ;;  %v923_v56 = vsub.f32 %v4663_v53, %v4986_v47  ;;  %v1981_v21 = vmul.f32 %v5078_v4, %v4925_v48 }
 0x1fc   : > { %2954 = vmatpush.lsf.msrb.mxu2 %v1988_v59  ;;  %v6237_v59 = vld [vmem:[#allocation16_spill] sm:$0xff]  ;;  %3292 = vpow2.f32 %v976_v38  ;;  %v1964_v12 = vmul.f32 %v5078_v4, %v4727_v40  ;;  %v924_v38 = vsub.f32 %v4633_v2, %v4986_v47  ;;  %v1980_v53 = vmul.f32 %v5078_v4, %v4912_v10 }
 0x1fd   : > { %v3287_v5 = vpop.eup %3286  ;;  %v1947_v57 = vmul.f32 %v5078_v4, %v6237_v59  ;;  %3294 = vpow2.f32 %v978_v13  ;;  %v1979_v40 = vmul.f32 %v5078_v4, %v4898_v63 }
 0x1fe   : > { %2955 = vmatpush.lsf.msrb.mxu2 %v1987_v61  ;;  %3058 = vxpose.xlu2.b32.cont [2/16] %v3057_v33, 128  ;;  %v920_v61 = vsub.f32 %v4611_v45, %v4986_v47  ;;  %v5139_v28 = vmul.f32 %v3287_v5, %v6238_v17  ;;  %v3289_v18 = vpop.eup %3288  ;;  %v6240_v45 = vld [vmem:[#allocation17_spill] sm:$0xff]  ;;  %v6241_v33 = vld [vmem:[#allocation44_spill] sm:$0xff]  ;;  %3296 = vpow2.f32 %v980_v44  ;;  %v6242_v5 = vld [vmem:[#allocation14_spill] sm:$0xff]  ;;  %v990_v17 = vmul.f32 1.442695, %v924_v38 }
 0x1ff   : > { %v3059_v31 = vpack.i.bf16 %v1963_v46, %v1947_v57  ;;  %v922_v23 = vsub.f32 %v6240_v45, %v4986_v47  ;;  %v5151_v60 = vmul.f32 %v3289_v18, %v6241_v33  ;;  %v1948_v42 = vmul.f32 %v5078_v4, %v6242_v5  ;;  %v6243_v44 = vld [vmem:[#allocation5_spill] sm:$0xff] }
 0x200   : > { %2956 = vmatpush.lsf.msrb.mxu2 %v1986_v50  ;;  %v6239_v50 = vld [vmem:[#allocation7_spill] sm:$0xff]  ;;  %v1105_v7 = vadd.f32 %v1104_v49, %v5139_v28  ;;  %v925_v57 = vsub.f32 %v4601_v16, %v4986_v47  ;;  %v988_v46 = vmul.f32 1.442695, %v923_v56  ;;  %v1978_v16 = vmul.f32 %v5078_v4, %v4883_v29 }
 0x201   : > { %v921_v39 = vsub.f32 %v6239_v50, %v4986_v47  ;;  %v986_v49 = vmul.f32 1.442695, %v922_v23  ;;  %v927_v50 = vsub.f32 %v4675_v22, %v4986_v47  ;;  %v1965_v29 = vmul.f32 %v5078_v4, %v4738_v19  ;;  %v6245_v22 = vld [vmem:[#allocation27_spill] sm:$0xff]  ;;  %v6247_v19 = vld [vmem:[#allocation81_spill] sm:$0xff] }
 0x202   : > { %2957 = vmatpush.lsf.msrb.mxu2 %v1985_v11  ;;  %v982_v11 = vmul.f32 1.442695, %v920_v61  ;;  %v1106_v43 = vadd.f32 %v1105_v7, %v5151_v60  ;;  %v3061_v61 = vpack.i.bf16 %v1964_v12, %v1948_v42  ;;  %v928_v23 = vsub.f32 %v6245_v22, %v4986_v47  ;;  %v6258_v22 = vld [vmem:[#allocation82_spill] sm:$0xff] }
 0x203   : > { %v984_v36 = vmul.f32 1.442695, %v921_v39  ;;  %v992_v39 = vmul.f32 1.442695, %v925_v57  ;;  %v929_v56 = vsub.f32 %v6247_v19, %v4986_v47 }
 0x204   : > { %2958 = vmatpush.lsf.msrb.mxu2 %v1984_v54  ;;  %v3291_v54 = vpop.eup %3290  ;;  %3298 = vpow2.f32 %v982_v11 }
 0x205   : > { %v3293_v8 = vpop.eup %3292  ;;  %v5167_v48 = vmul.f32 %v3291_v54, %v4278_v24  ;;  %3300 = vpow2.f32 %v984_v36  ;;  %v926_v24 = vsub.f32 %v4698_v27, %v4986_v47  ;;  %v1977_v27 = vmul.f32 %v5078_v4, %v4870_v58 }
 0x206   : > { %2959 = vmatpush.lsf.msrb.mxu2 %v1983_v30  ;;  %3060 = vxpose.xlu2.b32.cont [3/16] %v3059_v31, 128  ;;  %v3295_v59 = vpop.eup %3294  ;;  %v5174_v2 = vmul.f32 %v3293_v8, %v4375_v20  ;;  %3302 = vpow2.f32 %v986_v49  ;;  %v1949_v30 = vmul.f32 %v5078_v4, %v6243_v44  ;;  %v996_v36 = vmul.f32 1.442695, %v927_v50  ;;  %v6249_v8 = vld [vmem:[#allocation79_spill] sm:$0xff] }
 0x207   : > { %v1107_v13 = vadd.f32 %v1106_v43, %v5167_v48  ;;  %v3297_v10 = vpop.eup %3296  ;;  %v5182_v18 = vmul.f32 %v3295_v59, %v4286_v32  ;;  %3304 = vpow2.f32 %v988_v46  ;;  %v6244_v32 = vld [vmem:[#allocation46_spill] sm:$0xff]  ;;  %v994_v11 = vmul.f32 1.442695, %v926_v24  ;;  %v6248_v43 = vld [vmem:[#allocation48_spill] sm:$0xff] }
 0x208   : > { %2960 = vmatpush.lsf.msrb.mxu2 %v1982_v34  ;;  %v5194_v7 = vmul.f32 %v3297_v10, %v6244_v32  ;;  %3306 = vpow2.f32 %v990_v17  ;;  %v6246_v34 = vld [vmem:[#allocation61_spill] sm:$0xff]  ;;  %v930_v38 = vsub.f32 %v6249_v8, %v4986_v47  ;;  %v998_v49 = vmul.f32 1.442695, %v928_v23  ;;  %v6253_v10 = vld [vmem:[#allocation18_spill] sm:$0xff]  ;;  %v6254_v17 = vld [vmem:[#allocation84_spill] sm:$0xff] }
 0x209   : > { %v1108_v20 = vadd.f32 %v1107_v13, %v5174_v2  ;;  %3308 = vpow2.f32 %v992_v39  ;;  %v1000_v13 = vmul.f32 1.442695, %v929_v56  ;;  %v1950_v24 = vmul.f32 %v5078_v4, %v6253_v10  ;;  %v6265_v10 = vld [vmem:[#allocation86_spill] sm:$0xff] }
 0x20a   : > { %2961 = vmatpush.lsf.msrb.mxu2 %v1981_v21  ;;  %v3299_v63 = vpop.eup %3298  ;;  %v3063_v21 = vpack.i.bf16 %v1965_v29, %v1949_v30  ;;  %3310 = vpow2.f32 %v994_v11  ;;  %v1002_v30 = vmul.f32 1.442695, %v930_v38  ;;  %v6257_v29 = vld [vmem:[#allocation53_spill] sm:$0xff]  ;;  %v933_v23 = vsub.f32 %v6258_v22, %v4986_v47 }
 0x20b   : > { %v1109_v31 = vadd.f32 %v1108_v20, %v5182_v18  ;;  %v3301_v45 = vpop.eup %3300  ;;  %v5200_v58 = vmul.f32 %v3299_v63, %v6246_v34  ;;  %3312 = vpow2.f32 %v996_v36  ;;  %v6255_v20 = vld [vmem:[#allocation66_spill] sm:$0xff]  ;;  %v6259_v34 = vld [vmem:[#allocation51_spill] sm:$0xff]  ;;  %v6260_v36 = vld [vmem:[#allocation80_spill] sm:$0xff] }
 0x20c   : > { %2962 = vmatpush.lsf.msrb.mxu2 %v1980_v53  ;;  %v3303_v54 = vpop.eup %3302  ;;  %v5206_v5 = vmul.f32 %v3301_v45, %v6248_v43  ;;  %v6250_v53 = vld [vmem:[#allocation47_spill] sm:$0xff]  ;;  %3314 = vpow2.f32 %v998_v49  ;;  %v6262_v49 = vld [vmem:[#allocation90_spill] sm:$0xff] }
 0x20d   : > { %v1110_v33 = vadd.f32 %v1109_v31, %v5194_v7  ;;  %v3305_v12 = vpop.eup %3304  ;;  %v5212_v59 = vmul.f32 %v3303_v54, %v6250_v53  ;;  %3316 = vpow2.f32 %v1000_v13  ;;  %v935_v53 = vsub.f32 %v6262_v49, %v4986_v47 }
 0x20e   : > { %2963 = vmatpush.lsf.msrb.mxu2 %v1979_v40  ;;  %3062 = vxpose.xlu2.b32.cont [4/16] %v3061_v61, 128  ;;  %v3307_v46 = vpop.eup %3306  ;;  %v6252_v40 = vld [vmem:[#allocation78_spill] sm:$0xff]  ;;  %v5222_v63 = vmul.f32 %v3305_v12, %v6255_v20  ;;  %3318 = vpow2.f32 %v1002_v30  ;;  %v6266_v20 = vld [vmem:[#allocation87_spill] sm:$0xff] }
 0x20f   : > { %v1111_v42 = vadd.f32 %v1110_v33, %v5200_v58  ;;  %6251 = vst [vmem:[#allocation6_spill] sm:$0xff] %v5212_v59  ;;  %v931_v61 = vsub.f32 %v6252_v40, %v4986_v47  ;;  %v3309_v39 = vpop.eup %3308  ;;  %v5228_v32 = vmul.f32 %v3307_v46, %v6257_v29  ;;  %v6263_v46 = vld [vmem:[#allocation56_spill] sm:$0xff]  ;;  %v1012_v22 = vmul.f32 1.442695, %v935_v53  ;;  %v6272_v53 = vld [vmem:[#allocation58_spill] sm:$0xff] }
 0x210   : > { %2964 = vmatpush.lsf.msrb.mxu2 %v1978_v16  ;;  %v1966_v16 = vmul.f32 %v5078_v4, %v6254_v17  ;;  %v3311_v45 = vpop.eup %3310  ;;  %v5234_v33 = vmul.f32 %v3309_v39, %v6259_v34 }
 0x211   : > { %v1112_v57 = vadd.f32 %v1111_v42, %v5206_v5  ;;  %v1004_v11 = vmul.f32 1.442695, %v931_v61  ;;  %v3313_v56 = vpop.eup %3312  ;;  %v6261_v42 = vld [vmem:[#allocation70_spill] sm:$0xff]  ;;  %v6264_v61 = vld [vmem:[#allocation15_spill] sm:$0xff] }
 0x212   : > { %2965 = vmatpush.lsf.msrb.mxu2 %v1977_v27  ;;  %v6256_v27 = vld [vmem:[#allocation85_spill] sm:$0xff]  ;;  %v3065_v54 = vpack.i.bf16 %v1966_v16, %v1950_v24  ;;  %v5240_v12 = vmul.f32 %v3311_v45, %v6261_v42  ;;  %v3315_v38 = vpop.eup %3314  ;;  %v5246_v40 = vmul.f32 %v3313_v56, %v6263_v46  ;;  %v1951_v13 = vmul.f32 %v5078_v4, %v6264_v61 }
 0x213   : > { %2966 = vllmr.16.mxu2  ;;  %v1113_v50 = vadd.f32 %v1112_v57, %v5212_v59  ;;  %v932_v44 = vsub.f32 %v6256_v27, %v4986_v47  ;;  %v1008_v57 = vmul.f32 1.442695, %v933_v23  ;;  %3320 = vpow2.f32 %v1004_v11  ;;  %v3317_v16 = vpop.eup %3316  ;;  %v6267_v27 = vld [vmem:[#allocation55_spill] sm:$0xff]  ;;  %v6270_v56 = vld [vmem:[#allocation93_spill] sm:$0xff] }
 0x214   : > { %v1967_v24 = vmul.f32 %v5078_v4, %v6265_v10  ;;  %v3319_v29 = vpop.eup %3318  ;;  %v6269_v23 = vld [vmem:[#allocation71_spill] sm:$0xff]  ;;  %v6273_v46 = vld [vmem:[#allocation9_spill] sm:$0xff] }
 0x215   : > { %v1114_v31 = vadd.f32 %v1113_v50, %v5222_v63  ;;  %v1006_v43 = vmul.f32 1.442695, %v932_v44  ;;  %v936_v50 = vsub.f32 %v6266_v20, %v4986_v47  ;;  %v5256_v44 = vmul.f32 %v3315_v38, %v6267_v27  ;;  %v6275_v20 = vld [vmem:[#allocation72_spill] sm:$0xff] }
 0x216   : > { %3064 = vxpose.xlu2.b32.cont [5/16] %v3063_v21, 128  ;;  %v934_v21 = vsub.f32 %v6260_v36, %v4986_v47  ;;  %v5262_v11 = vmul.f32 %v3317_v16, %v6269_v23  ;;  %v3067_v34 = vpack.i.bf16 %v1967_v24, %v1951_v13  ;;  %v938_v36 = vsub.f32 %v6270_v56, %v4986_v47  ;;  %v6274_v13 = vld [vmem:[#allocation88_spill] sm:$0xff]  ;;  %v6279_v56 = vld [vmem:[#allocation62_spill] sm:$0xff] }
 0x217   : > { %v1115_v19 = vadd.f32 %v1114_v31, %v5228_v32  ;;  %3322 = vpow2.f32 %v1006_v43  ;;  %v6268_v31 = vld [vmem:[#allocation83_spill] sm:$0xff]  ;;  %v1952_v61 = vmul.f32 %v5078_v4, %v6273_v46  ;;  %v1968_v10 = vmul.f32 %v5078_v4, %v6274_v13  ;;  %v6283_v46 = vld [vmem:[#allocation89_spill] sm:$0xff] }
 0x218   : > { %v1010_v39 = vmul.f32 1.442695, %v934_v21  ;;  %v937_v45 = vsub.f32 %v6268_v31, %v4986_v47  ;;  %3324 = vpow2.f32 %v1008_v57  ;;  %v1014_v21 = vmul.f32 1.442695, %v936_v50  ;;  %v6271_v43 = vld [vmem:[#allocation59_spill] sm:$0xff]  ;;  %v6277_v31 = vld [vmem:[#allocation65_spill] sm:$0xff] }
 0x219   : > { %v1116_v8 = vadd.f32 %v1115_v19, %v5234_v33  ;;  %v3321_v19 = vpop.eup %3320  ;;  %v5268_v42 = vmul.f32 %v3319_v29, %v6271_v43  ;;  %v1018_v16 = vmul.f32 1.442695, %v938_v36  ;;  %v6280_v43 = vsub.f32 %v4851_v37, %v4986_v47  ;;  %v6285_v37 = vld [vmem:[#allocation69_spill] sm:$0xff] }
 0x21a   : > { %3326 = vpow2.f32 %v1010_v39  ;;  %v1016_v49 = vmul.f32 1.442695, %v937_v45  ;;  %v5272_v57 = vmul.f32 %v3321_v19, %v6272_v53  ;;  %v6282_v53 = vld [vmem:[#allocation13_spill] sm:$0xff] }
 0x21b   : > { %v1117_v17 = vadd.f32 %v1116_v8, %v5240_v12  ;;  %3328 = vpow2.f32 %v1012_v22  ;;  %v3069_v22 = vpack.i.bf16 %v1968_v10, %v1952_v61  ;;  %v1969_v61 = vmul.f32 %v5078_v4, %v6283_v46 }
 0x21c   : > { %3330 = vpow2.f32 %v1014_v21 }
 0x21d   : > { %v1118_v30 = vadd.f32 %v1117_v17, %v5246_v40  ;;  %v3323_v38 = vpop.eup %3322  ;;  %3332 = vpow2.f32 %v1016_v49 }
 0x21e   : > { %3066 = vxpose.xlu2.b32.cont [6/16] %v3065_v54, 128  ;;  %v3325_v17 = vpop.eup %3324  ;;  %v5280_v50 = vmul.f32 %v3323_v38, %v6275_v20  ;;  %3334 = vpow2.f32 %v1018_v16  ;;  %v6281_v38 = vld [vmem:[#allocation73_spill] sm:$0xff] }
 0x21f   : > { %v1119_v54 = vadd.f32 %v1118_v30, %v5256_v44  ;;  %v6276_v30 = vsub.f32 %v4797_v62, %v4986_v47  ;;  %v5287_v45 = vmul.f32 %v3325_v17, %v6277_v31 }
 0x220   : > { %v3327_v27 = vpop.eup %3326 }
 0x221   : > { %v1120_v8 = vadd.f32 %v1119_v54, %v5262_v11  ;;  %v1020_v29 = vmul.f32 1.442695, %v6276_v30  ;;  %v6278_v54 = vsub.f32 %v4775_v9, %v4986_v47  ;;  %v5294_v36 = vmul.f32 %v3327_v27, %v6279_v56 }
 0x222   : > { %v1953_v9 = vmul.f32 %v5078_v4, %v6282_v53  ;;  %v6286_v27 = vsub.f32 %v4808_v41, %v4986_v47  ;;  %v6293_v53 = vld [vmem:[#allocation21_spill] sm:$0xff] }
 0x223   : > { %v1121_v24 = vadd.f32 %v1120_v8, %v5268_v42  ;;  %v1022_v19 = vmul.f32 1.442695, %v6278_v54  ;;  %v1024_v8 = vmul.f32 1.442695, %v6280_v43  ;;  %3336 = vpow2.f32 %v1020_v29  ;;  %v6287_v29 = vld [vmem:[#allocation67_spill] sm:$0xff] }
 0x224   : > { %v1028_v30 = vmul.f32 1.442695, %v6286_v27 }
 0x225   : > { %v1122_v39 = vadd.f32 %v1121_v24, %v5272_v57  ;;  %v6284_v24 = vsub.f32 %v4828_v0, %v4986_v47  ;;  %3338 = vpow2.f32 %v1022_v19  ;;  %v6289_v19 = vld [vmem:[#allocation97_spill] sm:$0xff] }
 0x226   : > { %3068 = vxpose.xlu2.b32.cont [7/16] %v3067_v34, 128  ;;  %v3329_v34 = vpop.eup %3328  ;;  %3340 = vpow2.f32 %v1024_v8  ;;  %v6292_v8 = vld [vmem:[#allocation95_spill] sm:$0xff] }
 0x227   : > { %v1123_v23 = vadd.f32 %v1122_v39, %v5280_v50  ;;  %v3331_v21 = vpop.eup %3330  ;;  %v5301_v49 = vmul.f32 %v3329_v34, %v6281_v38  ;;  %v1026_v17 = vmul.f32 1.442695, %v6284_v24  ;;  %v6288_v34 = vsub.f32 %v4887_v3, %v4986_v47 }
 0x228   : > { %v3333_v10 = vpop.eup %3332  ;;  %v5312_v16 = vmul.f32 %v3331_v21, %v6285_v37  ;;  %v6291_v21 = vsub.f32 %v4866_v51, %v4986_v47  ;;  %v1954_v3 = vmul.f32 %v5078_v4, %v6293_v53  ;;  %v6296_v51 = vld [vmem:[#allocation26_spill] sm:$0xff] }
 0x229   : > { %v1124_v62 = vadd.f32 %v1123_v23, %v5287_v45  ;;  %v3335_v39 = vpop.eup %3334  ;;  %v5319_v31 = vmul.f32 %v3333_v10, %v6287_v29  ;;  %v1030_v54 = vmul.f32 1.442695, %v6288_v34  ;;  %3342 = vpow2.f32 %v1026_v17 }
 0x22a   : > { %v3337_v0 = vpop.eup %3336  ;;  %v5326_v56 = vmul.f32 %v3335_v39, %v6289_v19  ;;  %v1032_v43 = vmul.f32 1.442695, %v6291_v21  ;;  %3344 = vpow2.f32 %v1028_v30  ;;  %v6295_v10 = vsub.f32 %v4841_v35, %v4986_v47  ;;  %v6298_v30 = vld [vmem:[#allocation99_spill] sm:$0xff] }
 0x22b   : > { %v1125_v13 = vadd.f32 %v1124_v62, %v5294_v36  ;;  %v3339_v62 = vpop.eup %3338  ;;  %v5333_v38 = vmul.f32 %v3337_v0, %v6292_v8  ;;  %3346 = vpow2.f32 %v1030_v54  ;;  %v6297_v39 = vsub.f32 %v4915_v55, %v4986_v47  ;;  %v6300_v54 = vld [vmem:[#allocation101_spill] sm:$0xff] }
 0x22c   : > { %6290 = vst [vmem:[#allocation49_spill] sm:$0xff] %v5326_v56  ;;  %v1034_v24 = vmul.f32 1.442695, %v6295_v10  ;;  %v5344_v17 = vmul.f32 %v3339_v62, %v6296_v51  ;;  %3348 = vpow2.f32 %v1032_v43  ;;  %v6299_v0 = vsub.f32 %v4892_v14, %v4986_v47  ;;  %v6301_v62 = vld [vmem:[#allocation22_spill] sm:$0xff]  ;;  %v6303_v8 = vld [vmem:[#allocation29_spill] sm:$0xff]  ;;  %v6306_v10 = vld [vmem:[#allocation28_spill] sm:$0xff] }
 0x22d   : > { %v1126_v20 = vadd.f32 %v1125_v13, %v5301_v49  ;;  %v3341_v13 = vpop.eup %3340  ;;  %v1036_v27 = vmul.f32 1.442695, %v6297_v39  ;;  %v6302_v21 = vsub.f32 %v6301_v62, %v4986_v47 }
 0x22e   : > { %3070 = vxpose.xlu2.b32.cont [8/16] %v3069_v22, 128  ;;  %v3071_v22 = vpack.i.bf16 %v1969_v61, %v1953_v9  ;;  %v6294_v9 = vld [vmem:[#allocation91_spill] sm:$0xff]  ;;  %v5351_v29 = vmul.f32 %v3341_v13, %v6298_v30  ;;  %v1038_v34 = vmul.f32 1.442695, %v6299_v0  ;;  %3350 = vpow2.f32 %v1034_v24  ;;  %v6309_v30 = vld [vmem:[#allocation32_spill] sm:$0xff] }
 0x22f   : > { %v1127_v23 = vadd.f32 %v1126_v20, %v5312_v16  ;;  %v1970_v46 = vmul.f32 %v5078_v4, %v6294_v9  ;;  %v3343_v20 = vpop.eup %3342  ;;  %v1040_v43 = vmul.f32 1.442695, %v6302_v21  ;;  %3352 = vpow2.f32 %v1036_v27  ;;  %v6305_v9 = vld [vmem:[#allocation92_spill] sm:$0xff] }
 0x230   : > { %v3345_v35 = vpop.eup %3344  ;;  %v5358_v19 = vmul.f32 %v3343_v20, %v6300_v54  ;;  %v6307_v24 = vsub.f32 %v6306_v10, %v4986_v47  ;;  %3354 = vpow2.f32 %v1038_v34  ;;  %v6312_v34 = vld [vmem:[#allocation100_spill] sm:$0xff]  ;;  %v6317_v10 = vld [vmem:[#allocation63_spill] sm:$0xff] }
 0x231   : > { %v1128_v41 = vadd.f32 %v1127_v23, %v5319_v31  ;;  %v5365_v53 = vmul.f32 %v3345_v35, %v6303_v8  ;;  %3356 = vpow2.f32 %v1040_v43  ;;  %v6311_v35 = vld [vmem:[#allocation33_spill] sm:$0xff]  ;;  %v6314_v8 = vld [vmem:[#allocation102_spill] sm:$0xff]  ;;  %v6315_v43 = vld [vmem:[#allocation103_spill] sm:$0xff] }
 0x232   : > { %v1042_v51 = vmul.f32 1.442695, %v6307_v24  ;;  %v1972_v24 = vmul.f32 %v5078_v4, %v6317_v10  ;;  %v6323_v10 = vld [vmem:[#allocation94_spill] sm:$0xff] }
 0x233   : > { %v1129_v61 = vadd.f32 %v1128_v41, %v5326_v56  ;;  %v3347_v41 = vpop.eup %3346 }
 0x234   : > { %v3349_v13 = vpop.eup %3348  ;;  %3358 = vpow2.f32 %v1042_v51 }
 0x235   : > { %v1130_v37 = vadd.f32 %v1129_v61, %v5333_v38  ;;  %v3351_v27 = vpop.eup %3350  ;;  %v5383_v0 = vmul.f32 %v3349_v13, %v6311_v35 }
 0x236   : > { %3072 = vxpose.xlu2.b32.cont [9/16] %v3071_v22, 128  ;;  %v3073_v22 = vpack.i.bf16 %v1970_v46, %v1954_v3  ;;  %v6304_v3 = vld [vmem:[#allocation25_spill] sm:$0xff]  ;;  %v1971_v46 = vmul.f32 %v5078_v4, %v6305_v9  ;;  %v3353_v62 = vpop.eup %3352 }
 0x237   : > { %v1131_v23 = vadd.f32 %v1130_v37, %v5344_v17  ;;  %v1955_v14 = vmul.f32 %v5078_v4, %v6304_v3  ;;  %v6308_v37 = vld [vmem:[#allocation24_spill] sm:$0xff]  ;;  %v5390_v3 = vmul.f32 %v3351_v27, %v6314_v8  ;;  %v5394_v13 = vmul.f32 %v3353_v62, %v6315_v43  ;;  %v6320_v62 = vld [vmem:[#allocation31_spill] sm:$0xff]  ;;  %v6321_v43 = vld [vmem:[#allocation30_spill] sm:$0xff] }
 0x238   : > { %v5376_v20 = vmul.f32 %v3347_v41, %v6308_v37  ;;  %v6313_v41 = vsub.f32 %v6312_v34, %v4986_v47  ;;  %v6318_v37 = vld [vmem:[#allocation104_spill] sm:$0xff] }
 0x239   : > { %v1132_v55 = vadd.f32 %v1131_v23, %v5351_v29  ;;  %v3075_v54 = vpack.i.bf16 %v1971_v46, %v1955_v14  ;;  %v6316_v14 = vld [vmem:[#allocation19_spill] sm:$0xff] }
 0x23a   : > { %v1046_v21 = vmul.f32 1.442695, %v6313_v41  ;;  %v1956_v46 = vmul.f32 %v5078_v4, %v6316_v14 }
 0x23b   : > { %v1133_v61 = vadd.f32 %v1132_v55, %v5358_v19 }
 0x23c   : > { %v3077_v35 = vpack.i.bf16 %v1972_v24, %v1956_v46 }
 0x23d   : > { %v1134_v39 = vadd.f32 %v1133_v61, %v5365_v53  ;;  %v3355_v61 = vpop.eup %3354 }
 0x23e   : > { %3074 = vxpose.xlu2.b32.cont [10/16] %v3073_v22, 128  ;;  %v6310_v22 = vsub.f32 %v6309_v30, %v4986_v47  ;;  %v3357_v51 = vpop.eup %3356 }
 0x23f   : > { %v1135_v55 = vadd.f32 %v1134_v39, %v5376_v20  ;;  %v1092_v39 = vmul.f32 %v3355_v61, %v6318_v37  ;;  %v3359_v30 = vpop.eup %3358  ;;  %v1973_v61 = vmul.f32 %v5078_v4, %v6323_v10  ;;  %v6324_v37 = vld [vmem:[#allocation36_spill] sm:$0xff] }
 0x240   : > { %v1044_v23 = vmul.f32 1.442695, %v6310_v22  ;;  %v6319_v22 = vld [vmem:[#allocation34_spill] sm:$0xff]  ;;  %v1094_v34 = vmul.f32 %v3359_v30, %v6320_v62 }
 0x241   : > { %v1136_v9 = vadd.f32 %v1135_v55, %v5383_v0 }
 0x242   : > { %3360 = vpow2.f32 %v1044_v23  ;;  %v1093_v23 = vmul.f32 %v3357_v51, %v6319_v22  ;;  %v6326_v22 = vld [vmem:[#allocation8_spill] sm:$0xff] }
 0x243   : > { %v1137_v47 = vadd.f32 %v1136_v9, %v5390_v3  ;;  %3362 = vpow2.f32 %v1046_v21  ;;  %v6322_v9 = vld [vmem:[#allocation20_spill] sm:$0xff] }
 0x244   : > { %v1957_v21 = vmul.f32 %v5078_v4, %v6322_v9 }
 0x245   : > { %v1138_v27 = vadd.f32 %v1137_v47, %v5394_v13 }
 0x246   : > { %3076 = vxpose.xlu2.b32.cont [11/16] %v3075_v54, 128  ;;  %v3079_v46 = vpack.i.bf16 %v1973_v61, %v1957_v21  ;;  %v6329_v61 = vld [vmem:[#allocation98_spill] sm:$0xff] }
 0x247   : > { %v1139_v54 = vadd.f32 %v1138_v27, %v1092_v39  ;;  %v6325_v27 = vld [vmem:[#allocation35_spill] sm:$0xff] }
 0x248   : > { %v3361_v55 = vpop.eup %3360 }
 0x249   : > { %v1140_v41 = vadd.f32 %v1139_v54, %v1093_v23  ;;  %v3363_v8 = vpop.eup %3362  ;;  %v1095_v14 = vmul.f32 %v3361_v55, %v6321_v43  ;;  %v6327_v54 = vld [vmem:[#allocation96_spill] sm:$0xff] }
 0x24a   : > { %v1096_v56 = vmul.f32 %v3363_v8, %v6324_v37  ;;  %v1974_v55 = vmul.f32 %v5078_v4, %v6327_v54  ;;  %v6328_v8 = vld [vmem:[#allocation76_spill] sm:$0xff] }
 0x24b   : > { %v1141_v47 = vadd.f32 %v1140_v41, %v1094_v34  ;;  %v1959_v21 = vmul.f32 %v5078_v4, %v6328_v8 }
 0x24d   : > { %v1142_v51 = vadd.f32 %v1141_v47, %v1095_v14  ;;  %v1975_v47 = vmul.f32 %v5078_v4, %v6329_v61 }
 0x24e   : > { %3078 = vxpose.xlu2.b32.cont [12/16] %v3077_v35, 128  ;;  %v1958_v35 = vmul.f32 %v5078_v4, %v6326_v22 }
 0x24f   : > { %v1143_v24 = vadd.f32 %v1142_v51, %v1096_v56 }
 0x250   : > { %v3081_v9 = vpack.i.bf16 %v1974_v55, %v1958_v35 }
 0x251   : > { %v1144_v30 = vadd.f32 %v1143_v24, %v6325_v27  ;;  %v6330_v24 = vld [vmem:[#allocation77_spill] sm:$0xff] }
 0x252   : > { %v1960_v22 = vmul.f32 %v5078_v4, %v6330_v24  ;;  %v6335_v24 = vld [vmem:[#allocation49_spill] sm:$0xff] }
 0x253   : > { %v1145_v62 = vrot.slane %v1144_v30, 4 }
 0x255   : > { %v1146_v43 = vadd.f32 %v1145_v62, %v1144_v30  ;;  %v6331_v30 = vld [vmem:[#allocation23_spill] sm:$0xff] }
 0x256   : > { %3080 = vxpose.xlu2.b32.cont [13/16] %v3079_v46, 128  ;;  %v3083_v46 = vpack.i.bf16 %v1975_v47, %v1959_v21  ;;  %v1976_v35 = vmul.f32 %v5078_v4, %v6331_v30  ;;  %v3401_v30 = vld [vmem:[%s5816_s2 + $0xf0] sm:$0xff] }
 0x257   : > { %v1147_v59 = vrot.slane %v1146_v43, 2 }
 0x259   : > { %v1148_v41 = vadd.f32 %v1147_v59, %v1146_v43  ;;  %v3085_v59 = vpack.i.bf16 %v1976_v35, %v1960_v22 }
 0x25b   : > { %v1149_v10 = vrot.slane %v1148_v41, 1 }
 0x25d   : > { %v1150_v37 = vadd.f32 %v1149_v10, %v1148_v41 }
 0x25e   : > { %3082 = vxpose.xlu2.b32.cont [14/16] %v3081_v9, 128 }
 0x25f   : > { %v1151_v51 = vmax.f32 %v1150_v37, 1e-30 }
 0x261   : > { %3364 = vrcp.f32 %v1151_v51 }
 0x266   : > { %3084 = vxpose.xlu2.b32.cont [15/16] %v3083_v46, 128 }
 0x267   : > { %v3365_v54 = vpop.eup %3364 }
 0x268   : > { %v1153_v55 = vmul.f32 %v3365_v54, %v1151_v51 }
 0x26a   : > { %v1154_v62 = vsub.f32 2.0, %v1153_v55  ;;  %v3403_v55 = vld [vmem:[%s5816_s2 + $0xe8] sm:$0xff] }
 0x26c   : > { %v5424_v43 = vmul.f32 %v3365_v54, %v1154_v62 }
 0x26e   : > { %3086 = vxpose.xlu2.b32.end [16/16] %v3085_v59, 128  ;;  %v1171_v9 = vmul.f32 %v5424_v43, %v5206_v5  ;;  %v1187_v41 = vmul.f32 %v5424_v43, %v5319_v31  ;;  %v1203_v10 = vmul.f32 %v5424_v43, %v6325_v27  ;;  %v1186_v8 = vmul.f32 %v5424_v43, %v5312_v16  ;;  %v3402_v59 = vld [vmem:[%s5816_s2 + $0x170] sm:$0xff] }
 0x26f   : > { %v1202_v4 = vmul.f32 %v5424_v43, %v1096_v56  ;;  %v1170_v21 = vmul.f32 %v5424_v43, %v5200_v58  ;;  %v1201_v61 = vmul.f32 %v5424_v43, %v1095_v14  ;;  %v1200_v5 = vmul.f32 %v5424_v43, %v1094_v34 }
 0x270   : > { %2986 = vmatpush.lsf.msrb.mxu3 %v1171_v9  ;;  %2878 = vmatpush.lsf.msrb.mxu0 %v1187_v41  ;;  %v1199_v31 = vmul.f32 %v5424_v43, %v1093_v23  ;;  %v1169_v27 = vmul.f32 %v5424_v43, %v5194_v7  ;;  %v1185_v16 = vmul.f32 %v5424_v43, %v5301_v49  ;;  %v3405_v9 = vld [vmem:[%s5816_s2 + $0xe0] sm:$0xff] }
 0x271   : > { %2914 = vmatpush.lsf.msrb.mxu1 %v1203_v10  ;;  %v1198_v56 = vmul.f32 %v5424_v43, %v1092_v39  ;;  %v1197_v58 = vmul.f32 %v5424_v43, %v5394_v13  ;;  %v1168_v34 = vmul.f32 %v5424_v43, %v5182_v18  ;;  %v1184_v23 = vmul.f32 %v5424_v43, %v5294_v36  ;;  %v3406_v41 = vld [vmem:[%s5816_s2 + $0x160] sm:$0xff]  ;;  %v3407_v10 = vld [vmem:[%s5816_s2 + $0xd8] sm:$0xff] }
 0x272   : > { %2987 = vmatpush.lsf.msrb.mxu3 %v1170_v21  ;;  %2879 = vmatpush.lsf.msrb.mxu0 %v1186_v8  ;;  %v1196_v7 = vmul.f32 %v5424_v43, %v5390_v3  ;;  %v1195_v49 = vmul.f32 %v5424_v43, %v5383_v0  ;;  %v1167_v13 = vmul.f32 %v5424_v43, %v5174_v2  ;;  %v3408_v8 = vld [vmem:[%s5816_s2 + $0x158] sm:$0xff]  ;;  %v3409_v21 = vld [vmem:[%s5816_s2 + $0xd0] sm:$0xff] }
 0x273   : > { %2915 = vmatpush.lsf.msrb.mxu1 %v1202_v4  ;;  %v1183_v39 = vmul.f32 %v5424_v43, %v5287_v45  ;;  %v1194_v18 = vmul.f32 %v5424_v43, %v5376_v20  ;;  %v1193_v36 = vmul.f32 %v5424_v43, %v5365_v53  ;;  %v1192_v3 = vmul.f32 %v5424_v43, %v5358_v19  ;;  %v6332_v20 = vld [vmem:[#allocation57_spill] sm:$0xff] }
 0x274   : > { %2988 = vmatpush.lsf.msrb.mxu3 %v1169_v27  ;;  %2880 = vmatpush.lsf.msrb.mxu0 %v1185_v16  ;;  %v1166_v0 = vmul.f32 %v5424_v43, %v5167_v48  ;;  %v1182_v2 = vmul.f32 %v5424_v43, %v5280_v50  ;;  %v1191_v45 = vmul.f32 %v5424_v43, %v5351_v29  ;;  %v3411_v27 = vld [vmem:[%s5816_s2 + $0xc8] sm:$0xff] }
 0x275   : > { %2916 = vmatpush.lsf.msrb.mxu1 %v1201_v61  ;;  %v1165_v53 = vmul.f32 %v5424_v43, %v5151_v60  ;;  %v1181_v19 = vmul.f32 %v5424_v43, %v5272_v57  ;;  %v1164_v48 = vmul.f32 %v5424_v43, %v5139_v28  ;;  %v1180_v50 = vmul.f32 %v5424_v43, %v5268_v42  ;;  %v3412_v16 = vld [vmem:[%s5816_s2 + $0x148] sm:$0xff] }
 0x276   : > { %2989 = vmatpush.lsf.msrb.mxu3 %v1168_v34  ;;  %2881 = vmatpush.lsf.msrb.mxu0 %v1184_v23  ;;  %v1163_v29 = vmul.f32 %v5424_v43, %v5127_v52  ;;  %v1179_v60 = vmul.f32 %v5424_v43, %v5262_v11  ;;  %v1162_v57 = vmul.f32 %v5424_v43, %v5119_v25  ;;  %v3415_v34 = vld [vmem:[%s5816_s2 + $0xb8] sm:$0xff] }
 0x277   : > { %2917 = vmatpush.lsf.msrb.mxu1 %v1200_v5  ;;  %v1178_v28 = vmul.f32 %v5424_v43, %v5256_v44  ;;  %v1161_v42 = vmul.f32 %v5424_v43, %v5103_v1  ;;  %v1177_v52 = vmul.f32 %v5424_v43, %v5246_v40  ;;  %v1160_v11 = vmul.f32 %v5424_v43, %v5090_v6  ;;  %v3410_v5 = vld [vmem:[%s5816_s2 + $0x150] sm:$0xff]  ;;  %v3416_v23 = vld [vmem:[%s5816_s2 + $0x138] sm:$0xff] }
 0x278   : > { %2990 = vmatpush.lsf.msrb.mxu3 %v1167_v13  ;;  %2882 = vmatpush.lsf.msrb.mxu0 %v1183_v39  ;;  %v1176_v25 = vmul.f32 %v5424_v43, %v5240_v12  ;;  %v1159_v44 = vmul.f32 %v5424_v43, %v5076_v26  ;;  %v1175_v1 = vmul.f32 %v5424_v43, %v5234_v33  ;;  %v3418_v39 = vld [vmem:[%s5816_s2 + $0x130] sm:$0xff] }
 0x279   : > { %2918 = vmatpush.lsf.msrb.mxu1 %v1199_v31  ;;  %v1158_v40 = vmul.f32 %v5424_v43, %v5068_v15  ;;  %v1174_v6 = vmul.f32 %v5424_v43, %v5228_v32  ;;  %v1190_v12 = vmul.f32 %v5424_v43, %v5344_v17  ;;  %v1157_v26 = vmul.f32 %v5424_v43, %v6332_v20  ;;  %v6333_v32 = vld [vmem:[#allocation50_spill] sm:$0xff] }
 0x27a   : > { %2991 = vmatpush.lsf.msrb.mxu3 %v1166_v0  ;;  %2883 = vmatpush.lsf.msrb.mxu0 %v1182_v2  ;;  %v1173_v33 = vmul.f32 %v5424_v43, %v5222_v63  ;;  %v1189_v15 = vmul.f32 %v5424_v43, %v5333_v38  ;;  %v1156_v37 = vmul.f32 %v5424_v43, %v6333_v32  ;;  %v6334_v17 = vld [vmem:[#allocation6_spill] sm:$0xff]  ;;  %v3421_v0 = vld [vmem:[%s5816_s2 + $0xa0] sm:$0xff] }
 0x27b   : > { %2919 = vmatpush.lsf.msrb.mxu1 %v1198_v56  ;;  %v1172_v51 = vmul.f32 %v5424_v43, %v6334_v17  ;;  %v1188_v22 = vmul.f32 %v5424_v43, %v6335_v24  ;;  %v3399_v63 = vld [vmem:[%s5816_s2 + $0xf8] sm:$0xff]  ;;  %v3404_v43 = vld [vmem:[%s5816_s2 + $0x168] sm:$0xff]  ;;  %v3413_v56 = vld [vmem:[%s5816_s2 + $0xc0] sm:$0xff] }
 0x27c   : > { %2992 = vmatpush.lsf.msrb.mxu3 %v1165_v53  ;;  %2884 = vmatpush.lsf.msrb.mxu0 %v1181_v19  ;;  %v3400_v38 = vld [vmem:[%s5816_s2 + $0x178] sm:$0xff]  ;;  %v3422_v2 = vld [vmem:[%s5816_s2 + $0x120] sm:$0xff]  ;;  %v3434_v17 = vld [vmem:[%s5816_s2 + $0x70] sm:$0xff] }
 0x27d   : > { %2920 = vmatpush.lsf.msrb.mxu1 %v1197_v58  ;;  %v3414_v58 = vld [vmem:[%s5816_s2 + $0x140] sm:$0xff]  ;;  %v3424_v53 = vld [vmem:[%s5816_s2 + $0x118] sm:$0xff]  ;;  %v3436_v24 = vld [vmem:[%s5816_s2 + $0x68] sm:$0xff] }
 0x27e   : > { %2993 = vmatpush.lsf.msrb.mxu3 %v1164_v48  ;;  %2885 = vmatpush.lsf.msrb.mxu0 %v1180_v50  ;;  %v3425_v48 = vld [vmem:[%s5816_s2 + $0x90] sm:$0xff]  ;;  %v3432_v32 = vld [vmem:[%s5816_s2 + $0x78] sm:$0xff] }
 0x27f   : > { %2921 = vmatpush.lsf.msrb.mxu1 %v1196_v7 }
 0x280   : > { %2994 = vmatpush.lsf.msrb.mxu3 %v1163_v29  ;;  %2886 = vmatpush.lsf.msrb.mxu0 %v1179_v60  ;;  %v3426_v29 = vld [vmem:[%s5816_s2 + $0x110] sm:$0xff] }
 0x281   : > { %2922 = vmatpush.lsf.msrb.mxu1 %v1195_v49  ;;  %v3417_v49 = vld [vmem:[%s5816_s2 + $0xb0] sm:$0xff] }
 0x282   : > { %2995 = vmatpush.lsf.msrb.mxu3 %v1162_v57  ;;  %2887 = vmatpush.lsf.msrb.mxu0 %v1178_v28  ;;  %v3427_v57 = vld [vmem:[%s5816_s2 + $0x88] sm:$0xff] }
 0x283   : > { %2923 = vmatpush.lsf.msrb.mxu1 %v1194_v18  ;;  %v3428_v28 = vld [vmem:[%s5816_s2 + $0x108] sm:$0xff] }
 0x284   : > { %2996 = vmatpush.lsf.msrb.mxu3 %v1161_v42  ;;  %2888 = vmatpush.lsf.msrb.mxu0 %v1177_v52  ;;  %v3429_v42 = vld [vmem:[%s5816_s2 + $0x80] sm:$0xff] }
 0x285   : > { %2924 = vmatpush.lsf.msrb.mxu1 %v1193_v36  ;;  %v3419_v36 = vld [vmem:[%s5816_s2 + $0xa8] sm:$0xff]  ;;  %v3430_v52 = vld [vmem:[%s5816_s2 + $0x100] sm:$0xff] }
 0x286   : > { %2997 = vmatpush.lsf.msrb.mxu3 %v1160_v11  ;;  %2889 = vmatpush.lsf.msrb.mxu0 %v1176_v25 }
 0x287   : > { %2925 = vmatpush.lsf.msrb.mxu1 %v1192_v3  ;;  %v3420_v3 = vld [vmem:[%s5816_s2 + $0x128] sm:$0xff] }
 0x288   : > { %2998 = vmatpush.lsf.msrb.mxu3 %v1159_v44  ;;  %2890 = vmatpush.lsf.msrb.mxu0 %v1175_v1 }
 0x289   : > { %2926 = vmatpush.lsf.msrb.mxu1 %v1191_v45  ;;  %v3423_v45 = vld [vmem:[%s5816_s2 + $0x98] sm:$0xff] }
 0x28a   : > { %2999 = vmatpush.lsf.msrb.mxu3 %v1158_v40  ;;  %2891 = vmatpush.lsf.msrb.mxu0 %v1174_v6 }
 0x28b   : > { %2927 = vmatpush.lsf.msrb.mxu1 %v1190_v12 }
 0x28c   : > { %3000 = vmatpush.lsf.msrb.mxu3 %v1157_v26  ;;  %2892 = vmatpush.lsf.msrb.mxu0 %v1173_v33 }
 0x28d   : > { %2928 = vmatpush.lsf.msrb.mxu1 %v1189_v15 }
 0x28e   : > { %3001 = vmatpush.lsf.msrb.mxu3 %v1156_v37  ;;  %2893 = vmatpush.lsf.msrb.mxu0 %v1172_v51  ;;  %v3433_v37 = vld [vmem:[%s5816_s2 + $0x2f0] sm:$0xff] }
 0x28f   : > { %v3087_v14 = vpop.trf.xlu2  ;;  %2929 = vmatpush.lsf.msrb.mxu1 %v1188_v22  ;;  %3002 = vllmr.16.mxu3 }
 0x290   : > { %v3088_v47 = vunpack.i.l.bf16 %v3087_v14  ;;  %v3091_v46 = vunpack.i.h.bf16 %v3087_v14 }
 0x292   : > { %2105 = vmatmul.f32.vlgmr.msra.gmra.mxu0 %v3088_v47  ;;  %2170 = vmatmul.f32.vlgmr.msra.gmra.mxu1 %v3091_v46  ;;  %v3431_v47 = vld [vmem:[%s5816_s2 + $0x2f8] sm:$0xff]  ;;  %v3435_v46 = vld [vmem:[%s5816_s2 + $0x2e8] sm:$0xff] }
 0x293   : > { %2445 = vmatpush.msra.mxu0 %v3399_v63  ;;  %2510 = vmatpush.msra.mxu1 %v3400_v38  ;;  %v3437_v38 = vld [vmem:[%s5816_s2 + $0x2e0] sm:$0xff] }
 0x295   : > { %2446 = vmatpush.msra.mxu0 %v3401_v30  ;;  %2511 = vmatpush.msra.mxu1 %v3402_v59  ;;  %v3438_v30 = vld [vmem:[%s5816_s2 + $0x60] sm:$0xff]  ;;  %v3441_v59 = vld [vmem:[%s5816_s2 + $0x2d0] sm:$0xff] }
 0x297   : > { %v3092_v35 = vpop.trf.xlu2  ;;  %2447 = vmatpush.msra.mxu0 %v3403_v55  ;;  %2512 = vmatpush.msra.mxu1 %v3404_v43  ;;  %v3442_v55 = vld [vmem:[%s5816_s2 + $0x50] sm:$0xff]  ;;  %v3443_v43 = vld [vmem:[%s5816_s2 + $0x2c8] sm:$0xff] }
 0x298   : > { %v3093_v54 = vunpack.i.l.bf16 %v3092_v35  ;;  %v3096_v62 = vunpack.i.h.bf16 %v3092_v35  ;;  %v3439_v35 = vld [vmem:[%s5816_s2 + $0x2d8] sm:$0xff] }
 0x299   : > { %2894 = vllmr.16.mxu0  ;;  %2930 = vllmr.16.mxu1 }
 0x29a   : > { %2108 = vmatmul.f32.gmra.mxu0 %v3093_v54  ;;  %2513 = vmatpush.msra.mxu1 %v3406_v41  ;;  %v3440_v54 = vld [vmem:[%s5816_s2 + $0x58] sm:$0xff] }
 0x29b   : > { %2448 = vmatpush.msra.mxu0 %v3405_v9  ;;  %2173 = vmatmul.f32.gmra.mxu1 %v3096_v62  ;;  %v3444_v9 = vld [vmem:[%s5816_s2 + $0x48] sm:$0xff] }
 0x29c   : > { %2514 = vmatpush.msra.mxu1 %v3408_v8  ;;  %v3445_v8 = vld [vmem:[%s5816_s2 + $0x2c0] sm:$0xff] }
 0x29d   : > { %2449 = vmatpush.msra.mxu0 %v3407_v10 }
 0x29e   : > { %2515 = vmatpush.msra.mxu1 %v3410_v5  ;;  %v3449_v5 = vld [vmem:[%s5816_s2 + $0x2b0] sm:$0xff] }
 0x29f   : > { %v3097_v4 = vpop.trf.xlu2  ;;  %2450 = vmatpush.msra.mxu0 %v3409_v21  ;;  %v3447_v21 = vld [vmem:[%s5816_s2 + $0x2b8] sm:$0xff] }
 0x2a0   : > { %v3098_v61 = vunpack.i.l.bf16 %v3097_v4  ;;  %v3101_v31 = vunpack.i.h.bf16 %v3097_v4  ;;  %2516 = vmatpush.msra.mxu1 %v3412_v16  ;;  %v3446_v4 = vld [vmem:[%s5816_s2 + $0x40] sm:$0xff]  ;;  %v3451_v16 = vld [vmem:[%s5816_s2 + $0x2a8] sm:$0xff] }
 0x2a1   : > { %2451 = vmatpush.msra.mxu0 %v3411_v27 }
 0x2a2   : > { %2111 = vmatmul.f32.gmra.mxu0 %v3098_v61  ;;  %2517 = vmatpush.msra.mxu1 %v3414_v58  ;;  %v3448_v61 = vld [vmem:[%s5816_s2 + $0x38] sm:$0xff] }
 0x2a3   : > { %2452 = vmatpush.msra.mxu0 %v3413_v56  ;;  %2176 = vmatmul.f32.gmra.mxu1 %v3101_v31  ;;  %v3450_v31 = vld [vmem:[%s5816_s2 + $0x30] sm:$0xff]  ;;  %v3452_v56 = vld [vmem:[%s5816_s2 + $0x28] sm:$0xff] }
 0x2a4   : > { %2518 = vmatpush.msra.mxu1 %v3416_v23  ;;  %v3453_v23 = vld [vmem:[%s5816_s2 + $0x2a0] sm:$0xff] }
 0x2a5   : > { %2453 = vmatpush.msra.mxu0 %v3415_v34 }
 0x2a6   : > { %2519 = vmatpush.msra.mxu1 %v3418_v39  ;;  %v3457_v39 = vld [vmem:[%s5816_s2 + $0x290] sm:$0xff] }
 0x2a7   : > { %v3102_v7 = vpop.trf.xlu2  ;;  %2454 = vmatpush.msra.mxu0 %v3417_v49  ;;  %v3455_v49 = vld [vmem:[%s5816_s2 + $0x298] sm:$0xff] }
 0x2a8   : > { %v3103_v13 = vunpack.i.l.bf16 %v3102_v7  ;;  %v3106_v18 = vunpack.i.h.bf16 %v3102_v7  ;;  %2520 = vmatpush.msra.mxu1 %v3420_v3  ;;  %v3454_v7 = vld [vmem:[%s5816_s2 + $0x20] sm:$0xff]  ;;  %v3459_v3 = vld [vmem:[%s5816_s2 + $0x288] sm:$0xff] }
 0x2a9   : > { %2455 = vmatpush.msra.mxu0 %v3419_v36 }
 0x2aa   : > { %2114 = vmatmul.f32.gmra.mxu0 %v3103_v13  ;;  %2521 = vmatpush.msra.mxu1 %v3422_v2  ;;  %v3456_v13 = vld [vmem:[%s5816_s2 + $0x18] sm:$0xff] }
 0x2ab   : > { %2456 = vmatpush.msra.mxu0 %v3421_v0  ;;  %2179 = vmatmul.f32.gmra.mxu1 %v3106_v18  ;;  %v3458_v18 = vld [vmem:[%s5816_s2 + $0x10] sm:$0xff]  ;;  %v3460_v0 = vld [vmem:[%s5816_s2 + $0x8] sm:$0xff] }
 0x2ac   : > { %2522 = vmatpush.msra.mxu1 %v3424_v53  ;;  %v3461_v53 = vld [vmem:[%s5816_s2 + $0x280] sm:$0xff] }
 0x2ad   : > { %2457 = vmatpush.msra.mxu0 %v3423_v45 }
 0x2ae   : > { %2523 = vmatpush.msra.mxu1 %v3426_v29 }
 0x2af   : > { %v3107_v19 = vpop.trf.xlu2  ;;  %2458 = vmatpush.msra.mxu0 %v3425_v48 }
 0x2b0   : > { %v3108_v50 = vunpack.i.l.bf16 %v3107_v19  ;;  %v3111_v60 = vunpack.i.h.bf16 %v3107_v19  ;;  %2524 = vmatpush.msra.mxu1 %v3428_v28  ;;  %v3462_v19 = vld [vmem:[%s5816_s2] sm:$0xff] }
 0x2b1   : > { %2459 = vmatpush.msra.mxu0 %v3427_v57 }
 0x2b2   : > { %2117 = vmatmul.f32.gmra.mxu0 %v3108_v50  ;;  %2525 = vmatpush.msra.mxu1 %v3430_v52 }
 0x2b3   : > { %2460 = vmatpush.msra.mxu0 %v3429_v42  ;;  %2182 = vmatmul.f32.gmra.mxu1 %v3111_v60 }
 0x2b7   : > { %v3112_v11 = vpop.trf.xlu2 }
 0x2b8   : > { %v3113_v25 = vunpack.i.l.bf16 %v3112_v11  ;;  %v3116_v44 = vunpack.i.h.bf16 %v3112_v11 }
 0x2ba   : > { %2120 = vmatmul.f32.gmra.mxu0 %v3113_v25 }
 0x2bb   : > { %2185 = vmatmul.f32.gmra.mxu1 %v3116_v44 }
 0x2bf   : > { %v3117_v1 = vpop.trf.xlu2 }
 0x2c0   : > { %v3118_v40 = vunpack.i.l.bf16 %v3117_v1  ;;  %v3121_v6 = vunpack.i.h.bf16 %v3117_v1 }
 0x2c2   : > { %2123 = vmatmul.f32.gmra.mxu0 %v3118_v40 }
 0x2c3   : > { %2188 = vmatmul.f32.gmra.mxu1 %v3121_v6 }
 0x2c7   : > { %v3122_v12 = vpop.trf.xlu2 }
 0x2c8   : > { %v3123_v20 = vunpack.i.l.bf16 %v3122_v12  ;;  %v3126_v26 = vunpack.i.h.bf16 %v3122_v12 }
 0x2ca   : > { %2126 = vmatmul.f32.gmra.mxu0 %v3123_v20 }
 0x2cb   : > { %2191 = vmatmul.f32.gmra.mxu1 %v3126_v26 }
 0x2cf   : > { %v3127_v33 = vpop.trf.xlu2 }
 0x2d0   : > { %v3128_v14 = vunpack.i.l.bf16 %v3127_v33  ;;  %v3131_v15 = vunpack.i.h.bf16 %v3127_v33 }
 0x2d2   : > { %2129 = vmatmul.f32.vlgmr.msra.gmra.mxu2 %v3128_v14  ;;  %2194 = vmatmul.f32.vlgmr.msra.gmra.mxu3 %v3131_v15 }
 0x2d3   : > { %2219 = vmatpush.msra.mxu2 %v3431_v47  ;;  %2380 = vmatpush.msra.mxu3 %v3432_v32 }
 0x2d4   : > { %2895 = vmatmul.lmr.bf16.vlgmr.msra.gmra.16.mxu0  ;;  %2931 = vmatmul.lmr.bf16.vlgmr.msra.gmra.16.mxu1 }
 0x2d5   : > { %2220 = vmatpush.msra.mxu2 %v3433_v37  ;;  %2381 = vmatpush.msra.mxu3 %v3434_v17 }
 0x2d7   : > { %v3132_v51 = vpop.trf.xlu2  ;;  %2221 = vmatpush.msra.mxu2 %v3435_v46  ;;  %2382 = vmatpush.msra.mxu3 %v3436_v24 }
 0x2d8   : > { %v3133_v22 = vunpack.i.l.bf16 %v3132_v51  ;;  %v3136_v63 = vunpack.i.h.bf16 %v3132_v51 }
 0x2d9   : > { %2222 = vmatpush.msra.mxu2 %v3437_v38  ;;  %2383 = vmatpush.msra.mxu3 %v3438_v30 }
 0x2da   : > { %2132 = vmatmul.f32.gmra.mxu2 %v3133_v22  ;;  %2197 = vmatmul.f32.gmra.mxu3 %v3136_v63 }
 0x2db   : > { %2223 = vmatpush.msra.mxu2 %v3439_v35  ;;  %2384 = vmatpush.msra.mxu3 %v3440_v54 }
 0x2dc   : > { %2896 = vmatmul.lmr.bf16.gmra.16.mxu0  ;;  %2932 = vmatmul.lmr.bf16.gmra.16.mxu1 }
 0x2dd   : > { %2224 = vmatpush.msra.mxu2 %v3441_v59  ;;  %2385 = vmatpush.msra.mxu3 %v3442_v55 }
 0x2df   : > { %v3137_v62 = vpop.trf.xlu2  ;;  %2225 = vmatpush.msra.mxu2 %v3443_v43  ;;  %2386 = vmatpush.msra.mxu3 %v3444_v9 }
 0x2e0   : > { %v3138_v41 = vunpack.i.l.bf16 %v3137_v62  ;;  %v3141_v10 = vunpack.i.h.bf16 %v3137_v62 }
 0x2e1   : > { %2226 = vmatpush.msra.mxu2 %v3445_v8  ;;  %2387 = vmatpush.msra.mxu3 %v3446_v4 }
 0x2e2   : > { %2135 = vmatmul.f32.gmra.mxu2 %v3138_v41  ;;  %2200 = vmatmul.f32.gmra.mxu3 %v3141_v10 }
 0x2e3   : > { %2227 = vmatpush.msra.mxu2 %v3447_v21  ;;  %2388 = vmatpush.msra.mxu3 %v3448_v61 }
 0x2e4   : > { %2897 = vmatmul.lmr.bf16.gmra.16.mxu0  ;;  %2933 = vmatmul.lmr.bf16.gmra.16.mxu1 }
 0x2e5   : > { %2228 = vmatpush.msra.mxu2 %v3449_v5  ;;  %2389 = vmatpush.msra.mxu3 %v3450_v31 }
 0x2e7   : > { %v3142_v27 = vpop.trf.xlu2  ;;  %2229 = vmatpush.msra.mxu2 %v3451_v16  ;;  %2390 = vmatpush.msra.mxu3 %v3452_v56 }
 0x2e8   : > { %v3143_v58 = vunpack.i.l.bf16 %v3142_v27  ;;  %v3146_v34 = vunpack.i.h.bf16 %v3142_v27 }
 0x2e9   : > { %2230 = vmatpush.msra.mxu2 %v3453_v23  ;;  %2391 = vmatpush.msra.mxu3 %v3454_v7 }
 0x2ea   : > { %2138 = vmatmul.f32.gmra.mxu2 %v3143_v58  ;;  %2203 = vmatmul.f32.gmra.mxu3 %v3146_v34 }
 0x2eb   : > { %2231 = vmatpush.msra.mxu2 %v3455_v49  ;;  %2392 = vmatpush.msra.mxu3 %v3456_v13 }
 0x2ec   : > { %2898 = vmatmul.lmr.bf16.gmra.16.mxu0  ;;  %2934 = vmatmul.lmr.bf16.gmra.16.mxu1 }
 0x2ed   : > { %2232 = vmatpush.msra.mxu2 %v3457_v39  ;;  %2393 = vmatpush.msra.mxu3 %v3458_v18 }
 0x2ef   : > { %v3147_v36 = vpop.trf.xlu2  ;;  %2233 = vmatpush.msra.mxu2 %v3459_v3  ;;  %2394 = vmatpush.msra.mxu3 %v3460_v0 }
 0x2f0   : > { %v3148_v2 = vunpack.i.l.bf16 %v3147_v36  ;;  %v3151_v45 = vunpack.i.h.bf16 %v3147_v36 }
 0x2f1   : > { %2234 = vmatpush.msra.mxu2 %v3461_v53  ;;  %2395 = vmatpush.msra.mxu3 %v3462_v19 }
 0x2f2   : > { %2141 = vmatmul.f32.gmra.mxu2 %v3148_v2  ;;  %2206 = vmatmul.f32.gmra.mxu3 %v3151_v45 }
 0x2f4   : > { %2899 = vmatmul.lmr.bf16.gmra.16.mxu0  ;;  %2935 = vmatmul.lmr.bf16.gmra.16.mxu1 }
 0x2f7   : > { %v3152_v48 = vpop.trf.xlu2 }
 0x2f8   : > { %v3153_v50 = vunpack.i.l.bf16 %v3152_v48  ;;  %v3156_v29 = vunpack.i.h.bf16 %v3152_v48 }
 0x2fa   : > { %2144 = vmatmul.f32.gmra.mxu2 %v3153_v50  ;;  %2209 = vmatmul.f32.gmra.mxu3 %v3156_v29 }
 0x2fc   : > { %2900 = vmatmul.lmr.bf16.gmra.16.mxu0  ;;  %2936 = vmatmul.lmr.bf16.gmra.16.mxu1 }
 0x2ff   : > { %v3157_v60 = vpop.trf.xlu2 }
 0x300   : > { %v3158_v57 = vunpack.i.l.bf16 %v3157_v60  ;;  %v3161_v28 = vunpack.i.h.bf16 %v3157_v60 }
 0x302   : > { %2147 = vmatmul.f32.gmra.mxu2 %v3158_v57  ;;  %2212 = vmatmul.f32.gmra.mxu3 %v3161_v28 }
 0x304   : > { %2901 = vmatmul.lmr.bf16.gmra.16.mxu0  ;;  %2937 = vmatmul.lmr.bf16.gmra.16.mxu1 }
 0x307   : > { %v3162_v42 = vpop.trf.xlu2 }
 0x308   : > { %v3163_v52 = vunpack.i.l.bf16 %v3162_v42  ;;  %v3166_v11 = vunpack.i.h.bf16 %v3162_v42 }
 0x30a   : > { %2150 = vmatmul.f32.gmra.mxu2 %v3163_v52  ;;  %2215 = vmatmul.f32.gmra.mxu3 %v3166_v11 }
 0x30c   : > { %2902 = vmatmul.lmr.bf16.gmra.16.mxu0  ;;  %2938 = vmatmul.lmr.bf16.gmra.16.mxu1 }
 0x30f   : > { %v5709_v25 = vpop.f32.mrf.mxu0  ;;  %v5711_v44 = vpop.f32.mrf.mxu1 }
 0x310   : > { %v2172_v49 = vadd.f32 %v5711_v44, %v5709_v25 }
 0x312   : > { %2967 = vmatmul.lmr.bf16.vlgmr.msra.gmra.16.mxu2  ;;  %3003 = vmatmul.lmr.bf16.vlgmr.msra.gmra.16.mxu3 }
 0x314   : > { %2903 = vmatmul.lmr.bf16.gmra.16.mxu0  ;;  %2939 = vmatmul.lmr.bf16.gmra.16.mxu1 }
 0x317   : > { %v5713_v1 = vpop.f32.mrf.mxu0 }
 0x318   : > { %v5715_v40 = vpop.f32.mrf.mxu1 }
 0x319   : > { %v2175_v45 = vadd.f32 %v5715_v40, %v5713_v1 }
 0x31a   : > { %2968 = vmatmul.lmr.bf16.gmra.16.mxu2  ;;  %3004 = vmatmul.lmr.bf16.gmra.16.mxu3 }
 0x31c   : > { %2904 = vmatmul.lmr.bf16.gmra.16.mxu0  ;;  %2940 = vmatmul.lmr.bf16.gmra.16.mxu1 }
 0x31f   : > { %v5717_v6 = vpop.f32.mrf.mxu0 }
 0x320   : > { %v5719_v12 = vpop.f32.mrf.mxu1 }
 0x321   : > { %v2178_v11 = vadd.f32 %v5719_v12, %v5717_v6 }
 0x322   : > { %2969 = vmatmul.lmr.bf16.gmra.16.mxu2  ;;  %3005 = vmatmul.lmr.bf16.gmra.16.mxu3 }
 0x324   : > { %2905 = vmatmul.lmr.bf16.gmra.16.mxu0  ;;  %2941 = vmatmul.lmr.bf16.gmra.16.mxu1 }
 0x327   : > { %v5721_v20 = vpop.f32.mrf.mxu0 }
 0x328   : > { %v5723_v26 = vpop.f32.mrf.mxu1 }
 0x32a   : > { %2970 = vmatmul.lmr.bf16.gmra.16.mxu2  ;;  %3006 = vmatmul.lmr.bf16.gmra.16.mxu3 }
 0x32c   : > { %2906 = vmatmul.lmr.bf16.gmra.16.mxu0  ;;  %2942 = vmatmul.lmr.bf16.gmra.16.mxu1 }
 0x32f   : > { %v5727_v47 = vpop.f32.mrf.mxu0 }
 0x330   : > { %v5729_v32 = vpop.f32.mrf.mxu1 }
 0x332   : > { %2971 = vmatmul.lmr.bf16.gmra.16.mxu2  ;;  %3007 = vmatmul.lmr.bf16.gmra.16.mxu3 }
 0x334   : > { %2907 = vmatmul.lmr.bf16.gmra.16.mxu0  ;;  %2943 = vmatmul.lmr.bf16.gmra.16.mxu1 }
 0x337   : > { %v5733_v22 = vpop.f32.mrf.mxu0 }
 0x338   : > { %v5735_v63 = vpop.f32.mrf.mxu1 }
 0x33a   : > { %2972 = vmatmul.lmr.bf16.gmra.16.mxu2  ;;  %3008 = vmatmul.lmr.bf16.gmra.16.mxu3 }
 0x33c   : > { %2908 = vmatmul.lmr.bf16.gmra.16.mxu0  ;;  %2944 = vmatmul.lmr.bf16.gmra.16.mxu1 }
 0x33f   : > { %v5741_v59 = vpop.f32.mrf.mxu0 }
 0x340   : > { %v5743_v55 = vpop.f32.mrf.mxu1 }
 0x342   : > { %2973 = vmatmul.lmr.bf16.gmra.16.mxu2  ;;  %3009 = vmatmul.lmr.bf16.gmra.16.mxu3 }
 0x344   : > { %2909 = vmatmul.lmr.bf16.gmra.16.mxu0  ;;  %2945 = vmatmul.lmr.bf16.gmra.16.mxu1 }
 0x347   : > { %v5747_v41 = vpop.f32.mrf.mxu0 }
 0x348   : > { %v5749_v10 = vpop.f32.mrf.mxu1 }
 0x34a   : > { %2974 = vmatmul.lmr.bf16.gmra.16.mxu2  ;;  %3010 = vmatmul.lmr.bf16.gmra.16.mxu3 }
 0x34c   : > { %2910 = vmatmul.lmr.bf16.gmra.16.mxu0  ;;  %2946 = vmatmul.lmr.bf16.gmra.16.mxu1 }
 0x351   : > { %v2462_v61 = vpop.f32.mrf.mxu0  ;;  %v2527_v5 = vpop.f32.mrf.mxu1 }
 0x352   : > { %2975 = vmatmul.lmr.bf16.gmra.16.mxu2  ;;  %3011 = vmatmul.lmr.bf16.gmra.16.mxu3 }
 0x355   : > { %v2130_v33 = vpop.f32.mrf.mxu2  ;;  %v2195_v14 = vpop.f32.mrf.mxu3 }
 0x356   : > { %v5725_v15 = vadd.f32 %v2195_v14, %v2130_v33 }
 0x359   : > { %v2465_v56 = vpop.f32.mrf.mxu0  ;;  %v2530_v58 = vpop.f32.mrf.mxu1 }
 0x35a   : > { %2976 = vmatmul.lmr.bf16.gmra.16.mxu2  ;;  %3012 = vmatmul.lmr.bf16.gmra.16.mxu3 }
 0x35d   : > { %v2133_v37 = vpop.f32.mrf.mxu2  ;;  %v2198_v17 = vpop.f32.mrf.mxu3 }
 0x35e   : > { %v5731_v51 = vadd.f32 %v2198_v17, %v2133_v37 }
 0x361   : > { %v2468_v13 = vpop.f32.mrf.mxu0  ;;  %v2533_v39 = vpop.f32.mrf.mxu1 }
 0x362   : > { %2977 = vmatmul.lmr.bf16.gmra.16.mxu2  ;;  %3013 = vmatmul.lmr.bf16.gmra.16.mxu3 }
 0x365   : > { %v2136_v46 = vpop.f32.mrf.mxu2  ;;  %v2201_v24 = vpop.f32.mrf.mxu3 }
 0x366   : > { %v5737_v38 = vadd.f32 %v2201_v24, %v2136_v46 }
 0x369   : > { %v2471_v19 = vpop.f32.mrf.mxu0  ;;  %v2536_v48 = vpop.f32.mrf.mxu1 }
 0x36a   : > { %2978 = vmatmul.lmr.bf16.gmra.16.mxu2  ;;  %3014 = vmatmul.lmr.bf16.gmra.16.mxu3 }
 0x36d   : > { %v2139_v30 = vpop.f32.mrf.mxu2  ;;  %v2204_v35 = vpop.f32.mrf.mxu3 }
 0x36e   : > { %v5739_v54 = vadd.f32 %v2204_v35, %v2139_v30  ;;  %v2181_v35 = vadd.f32 %v5723_v26, %v5721_v20  ;;  %v2184_v20 = vadd.f32 %v5729_v32, %v5727_v47  ;;  %v2187_v47 = vadd.f32 %v5735_v63, %v5733_v22 }
 0x36f   : > { %v2190_v22 = vadd.f32 %v5743_v55, %v5741_v59  ;;  %v2193_v59 = vadd.f32 %v5749_v10, %v5747_v41 }
 0x371   : > { %v2474_v44 = vpop.f32.mrf.mxu0  ;;  %v2539_v33 = vpop.f32.mrf.mxu1 }
 0x372   : > { %2979 = vmatmul.lmr.bf16.gmra.16.mxu2  ;;  %3015 = vmatmul.lmr.bf16.gmra.16.mxu3 }
 0x375   : > { %v2142_v62 = vpop.f32.mrf.mxu2  ;;  %v2207_v43 = vpop.f32.mrf.mxu3 }
 0x376   : > { %v5745_v9 = vadd.f32 %v2207_v43, %v2142_v62 }
 0x379   : > { %v2477_v43 = vpop.f32.mrf.mxu0 }
 0x37a   : > { %2980 = vmatmul.lmr.bf16.gmra.16.mxu2  ;;  %3016 = vmatmul.lmr.bf16.gmra.16.mxu3 }
 0x37d   : > { %v2145_v8 = vpop.f32.mrf.mxu2  ;;  %v2210_v4 = vpop.f32.mrf.mxu3 }
 0x37e   : > { %v5751_v21 = vadd.f32 %v2210_v4, %v2145_v8  ;;  %v2542_v8 = vpop.f32.mrf.mxu1 }
 0x382   : > { %2981 = vmatmul.lmr.bf16.gmra.16.mxu2  ;;  %3017 = vmatmul.lmr.bf16.gmra.16.mxu3 }
 0x385   : > { %v2148_v31 = vpop.f32.mrf.mxu2  ;;  %v2213_v27 = vpop.f32.mrf.mxu3 }
 0x386   : > { %v5753_v16 = vadd.f32 %v2213_v27, %v2148_v31 }
 0x38a   : > { %2982 = vmatmul.lmr.bf16.gmra.16.mxu2  ;;  %3018 = vmatmul.lmr.bf16.gmra.16.mxu3 }
 0x38d   : > { %v2151_v34 = vpop.f32.mrf.mxu2  ;;  %v2216_v23 = vpop.f32.mrf.mxu3 }
 0x38e   : > { %v5755_v7 = vadd.f32 %v2216_v23, %v2151_v34 }
 0x395   : > { %v2236_v18 = vpop.f32.mrf.mxu2  ;;  %v2397_v36 = vpop.f32.mrf.mxu3 }
 0x396   : > { %v2237_v3 = vadd.f32 %v2236_v18, %v2172_v49 }
 0x398   : > { %v2398_v0 = vadd.f32 %v2397_v36, %v2237_v3 }
 0x39a   : > { %v2463_v2 = vadd.f32 %v2462_v61, %v2398_v0  ;;  %v2545_v0 = vpop.f32.mrf.mxu1 }
 0x39c   : > { %v2528_v53 = vadd.f32 %v2527_v5, %v2463_v2 }
 0x39d   : > { %v2239_v50 = vpop.f32.mrf.mxu2  ;;  %v2400_v29 = vpop.f32.mrf.mxu3 }
 0x39e   : > { %v2591_v60 = vmin.f32 %v2528_v53, 0.0  ;;  %v2240_v57 = vadd.f32 %v2239_v50, %v2175_v45  ;;  %vm2575_vm0 = vcmp.gt.f32.partialorder %v2528_v53, 0.0 }
 0x3a0   : > { %v2607_v28 = vmul.f32 1.442695, %v2591_v60  ;;  %v2401_v42 = vadd.f32 %v2400_v29, %v2240_v57 }
 0x3a2   : > { %3366 = vpow2.f32 %v2607_v28  ;;  %v2466_v52 = vadd.f32 %v2465_v56, %v2401_v42 }
 0x3a4   : > { %v2531_v25 = vadd.f32 %v2530_v58, %v2466_v52 }
 0x3a5   : > { %v2242_v1 = vpop.f32.mrf.mxu2  ;;  %v2403_v40 = vpop.f32.mrf.mxu3 }
 0x3a6   : > { %v2592_v14 = vmin.f32 %v2531_v25, 0.0  ;;  %v2243_v37 = vadd.f32 %v2242_v1, %v2178_v11  ;;  %vm2576_vm1 = vcmp.gt.f32.partialorder %v2531_v25, 0.0  ;;  %v2548_v1 = vpop.f32.mrf.mxu1 }
 0x3a8   : > { %v3367_v17 = vpop.eup %3366  ;;  %v2609_v46 = vmul.f32 1.442695, %v2592_v14  ;;  %v2404_v24 = vadd.f32 %v2403_v40, %v2243_v37 }
 0x3a9   : > { %v2825_v30 = vadd.f32 -1.0, %v3367_v17 }
 0x3aa   : > { %3368 = vpow2.f32 %v2609_v46  ;;  %v2469_v6 = vadd.f32 %v2468_v13, %v2404_v24  ;;  %v2480_v13 = vpop.f32.mrf.mxu0 }
 0x3ab   : > { %v2655_v12 = vsel %vm2575_vm0, %v2528_v53, %v2825_v30 }
 0x3ac   : > { %2671 = vst [vmem:[%s5768_s12] sm:$0xff] %v2655_v12  ;;  %v2534_v62 = vadd.f32 %v2533_v39, %v2469_v6 }
 0x3ad   : > { %v2245_v4 = vpop.f32.mrf.mxu2  ;;  %v2406_v61 = vpop.f32.mrf.mxu3 }
 0x3ae   : > { %v2593_v5 = vmin.f32 %v2534_v62, 0.0  ;;  %v2246_v31 = vadd.f32 %v2245_v4, %v2181_v35  ;;  %vm2577_vm2 = vcmp.gt.f32.partialorder %v2534_v62, 0.0 }
 0x3b0   : > { %v3369_v27 = vpop.eup %3368  ;;  %v2611_v56 = vmul.f32 1.442695, %v2593_v5  ;;  %v2407_v58 = vadd.f32 %v2406_v61, %v2246_v31 }
 0x3b1   : > { %v2826_v34 = vadd.f32 -1.0, %v3369_v27 }
 0x3b2   : > { %3370 = vpow2.f32 %v2611_v56  ;;  %v2472_v23 = vadd.f32 %v2471_v19, %v2407_v58  ;;  %v2483_v42 = vpop.f32.mrf.mxu0 }
 0x3b3   : > { %v2656_v49 = vsel %vm2576_vm1, %v2531_v25, %v2826_v34 }
 0x3b4   : > { %2672 = vst [vmem:[%s5768_s12 + $0x8] sm:$0xff] %v2656_v49  ;;  %v2537_v26 = vadd.f32 %v2536_v48, %v2472_v23 }
 0x3b5   : > { %v2248_v39 = vpop.f32.mrf.mxu2  ;;  %v2409_v18 = vpop.f32.mrf.mxu3 }
 0x3b6   : > { %v2594_v36 = vmin.f32 %v2537_v26, 0.0  ;;  %v2249_v3 = vadd.f32 %v2248_v39, %v2184_v20  ;;  %vm2578_vm3 = vcmp.gt.f32.partialorder %v2537_v26, 0.0 }
 0x3b8   : > { %v3371_v2 = vpop.eup %3370  ;;  %v2613_v45 = vmul.f32 1.442695, %v2594_v36  ;;  %v2410_v53 = vadd.f32 %v2409_v18, %v2249_v3 }
 0x3b9   : > { %v2827_v50 = vadd.f32 -1.0, %v3371_v2 }
 0x3ba   : > { %3372 = vpow2.f32 %v2613_v45  ;;  %v2475_v19 = vadd.f32 %v2474_v44, %v2410_v53  ;;  %v2486_v12 = vpop.f32.mrf.mxu0 }
 0x3bb   : > { %v2657_v29 = vsel %vm2577_vm2, %v2534_v62, %v2827_v50 }
 0x3bc   : > { %2673 = vst [vmem:[%s5768_s12 + $0x10] sm:$0xff] %v2657_v29  ;;  %v2540_v32 = vadd.f32 %v2539_v33, %v2475_v19 }
 0x3bd   : > { %v2251_v48 = vpop.f32.mrf.mxu2  ;;  %v2412_v60 = vpop.f32.mrf.mxu3 }
 0x3be   : > { %v2595_v57 = vmin.f32 %v2540_v32, 0.0  ;;  %v2252_v28 = vadd.f32 %v2251_v48, %v2187_v47  ;;  %vm2579_vm4 = vcmp.gt.f32.partialorder %v2540_v32, 0.0 }
 0x3c0   : > { %v3373_v52 = vpop.eup %3372  ;;  %v2615_v11 = vmul.f32 1.442695, %v2595_v57  ;;  %v2413_v25 = vadd.f32 %v2412_v60, %v2252_v28 }
 0x3c1   : > { %v2828_v40 = vadd.f32 -1.0, %v3373_v52 }
 0x3c2   : > { %3374 = vpow2.f32 %v2615_v11  ;;  %v2478_v44 = vadd.f32 %v2477_v43, %v2413_v25  ;;  %v2551_v43 = vpop.f32.mrf.mxu1  ;;  %v2489_v49 = vpop.f32.mrf.mxu0 }
 0x3c3   : > { %v2658_v14 = vsel %vm2578_vm3, %v2537_v26, %v2828_v40 }
 0x3c4   : > { %2674 = vst [vmem:[%s5768_s12 + $0x18] sm:$0xff] %v2658_v14  ;;  %v2543_v63 = vadd.f32 %v2542_v8, %v2478_v44 }
 0x3c5   : > { %v2254_v33 = vpop.f32.mrf.mxu2  ;;  %v2415_v37 = vpop.f32.mrf.mxu3 }
 0x3c6   : > { %v2596_v17 = vmin.f32 %v2543_v63, 0.0  ;;  %v2255_v46 = vadd.f32 %v2254_v33, %v2190_v22  ;;  %vm2580_vm5 = vcmp.gt.f32.partialorder %v2543_v63, 0.0 }
 0x3c8   : > { %v3375_v24 = vpop.eup %3374  ;;  %v2617_v30 = vmul.f32 1.442695, %v2596_v17  ;;  %v2416_v6 = vadd.f32 %v2415_v37, %v2255_v46 }
 0x3c9   : > { %v2829_v35 = vadd.f32 -1.0, %v3375_v24 }
 0x3ca   : > { %3376 = vpow2.f32 %v2617_v30  ;;  %v2481_v62 = vadd.f32 %v2480_v13, %v2416_v6  ;;  %v2554_v41 = vpop.f32.mrf.mxu1  ;;  %v2492_v19 = vpop.f32.mrf.mxu0 }
 0x3cb   : > { %v2659_v4 = vsel %vm2579_vm4, %v2540_v32, %v2829_v35 }
 0x3cc   : > { %2675 = vst [vmem:[%s5768_s12 + $0x20] sm:$0xff] %v2659_v4  ;;  %v2546_v55 = vadd.f32 %v2545_v0, %v2481_v62 }
 0x3cd   : > { %v2257_v8 = vpop.f32.mrf.mxu2  ;;  %v2418_v61 = vpop.f32.mrf.mxu3 }
 0x3ce   : > { %v2597_v5 = vmin.f32 %v2546_v55, 0.0  ;;  %v2258_v31 = vadd.f32 %v2257_v8, %v2193_v59  ;;  %vm2581_vm6 = vcmp.gt.f32.partialorder %v2546_v55, 0.0 }
 0x3d0   : > { %v3377_v27 = vpop.eup %3376  ;;  %v2619_v56 = vmul.f32 1.442695, %v2597_v5  ;;  %v2419_v58 = vadd.f32 %v2418_v61, %v2258_v31 }
 0x3d1   : > { %v2830_v34 = vadd.f32 -1.0, %v3377_v27 }
 0x3d2   : > { %3378 = vpow2.f32 %v2619_v56  ;;  %v2484_v23 = vadd.f32 %v2483_v42, %v2419_v58  ;;  %v2557_v60 = vpop.f32.mrf.mxu1  ;;  %v2495_v22 = vpop.f32.mrf.mxu0 }
 0x3d3   : > { %v2660_v20 = vsel %vm2580_vm5, %v2543_v63, %v2830_v34 }
 0x3d4   : > { %2676 = vst [vmem:[%s5768_s12 + $0x28] sm:$0xff] %v2660_v20  ;;  %v2549_v26 = vadd.f32 %v2548_v1, %v2484_v23 }
 0x3d5   : > { %v2260_v10 = vpop.f32.mrf.mxu2  ;;  %v2421_v13 = vpop.f32.mrf.mxu3 }
 0x3d6   : > { %v2598_v39 = vmin.f32 %v2549_v26, 0.0  ;;  %v2261_v18 = vadd.f32 %v2260_v10, %v5725_v15  ;;  %vm2582_vm7 = vcmp.gt.f32.partialorder %v2549_v26, 0.0 }
 0x3d8   : > { %v3379_v36 = vpop.eup %3378  ;;  %v2621_v3 = vmul.f32 1.442695, %v2598_v39  ;;  %v2422_v0 = vadd.f32 %v2421_v13, %v2261_v18 }
 0x3d9   : > { %v2831_v2 = vadd.f32 -1.0, %v3379_v36 }
 0x3da   : > { %3380 = vpow2.f32 %v2621_v3  ;;  %v2487_v45 = vadd.f32 %v2486_v12, %v2422_v0  ;;  %v2560_v37 = vpop.f32.mrf.mxu1  ;;  %v2498_v59 = vpop.f32.mrf.mxu0 }
 0x3db   : > { %v2661_v53 = vsel %vm2581_vm6, %v2546_v55, %v2831_v2 }
 0x3dc   : > { %2677 = vst [vmem:[%s5768_s12 + $0x30] sm:$0xff] %v2661_v53  ;;  %v2552_v50 = vadd.f32 %v2551_v43, %v2487_v45 }
 0x3dd   : > { %v2263_v29 = vpop.f32.mrf.mxu2  ;;  %v2424_v47 = vpop.f32.mrf.mxu3 }
 0x3de   : > { %v2599_v32 = vmin.f32 %v2552_v50, 0.0  ;;  %v2264_v48 = vadd.f32 %v2263_v29, %v5731_v51  ;;  %vm2583_vm8 = vcmp.gt.f32.partialorder %v2552_v50, 0.0 }
 0x3e0   : > { %v3381_v57 = vpop.eup %3380  ;;  %v2623_v15 = vmul.f32 1.442695, %v2599_v32  ;;  %v2425_v28 = vadd.f32 %v2424_v47, %v2264_v48 }
 0x3e1   : > { %v2832_v42 = vadd.f32 -1.0, %v3381_v57 }
 0x3e2   : > { %3382 = vpow2.f32 %v2623_v15  ;;  %v2490_v52 = vadd.f32 %v2489_v49, %v2425_v28  ;;  %v2563_v61 = vpop.f32.mrf.mxu1 }
 0x3e3   : > { %v2662_v11 = vsel %vm2582_vm7, %v2549_v26, %v2832_v42 }
 0x3e4   : > { %2678 = vst [vmem:[%s5768_s12 + $0x38] sm:$0xff] %v2662_v11  ;;  %v2555_v25 = vadd.f32 %v2554_v41, %v2490_v52  ;;  %v2501_v41 = vpop.f32.mrf.mxu0 }
 0x3e5   : > { %v2266_v1 = vpop.f32.mrf.mxu2  ;;  %v2427_v40 = vpop.f32.mrf.mxu3 }
 0x3e6   : > { %v2600_v44 = vmin.f32 %v2555_v25, 0.0  ;;  %v2267_v14 = vadd.f32 %v2266_v1, %v5737_v38  ;;  %vm2584_vm9 = vcmp.gt.f32.partialorder %v2555_v25, 0.0 }
 0x3e8   : > { %v3383_v63 = vpop.eup %3382  ;;  %v2625_v51 = vmul.f32 1.442695, %v2600_v44  ;;  %v2428_v33 = vadd.f32 %v2427_v40, %v2267_v14 }
 0x3e9   : > { %v2833_v17 = vadd.f32 -1.0, %v3383_v63 }
 0x3ea   : > { %3384 = vpow2.f32 %v2625_v51  ;;  %v2493_v46 = vadd.f32 %v2492_v19, %v2428_v33  ;;  %v2566_v39 = vpop.f32.mrf.mxu1 }
 0x3eb   : > { %v2663_v24 = vsel %vm2583_vm8, %v2552_v50, %v2833_v17 }
 0x3ec   : > { %2679 = vst [vmem:[%s5768_s12 + $0x40] sm:$0xff] %v2663_v24  ;;  %v2558_v30 = vadd.f32 %v2557_v60, %v2493_v46  ;;  %v2504_v47 = vpop.f32.mrf.mxu0 }
 0x3ed   : > { %v2269_v6 = vpop.f32.mrf.mxu2  ;;  %v2430_v12 = vpop.f32.mrf.mxu3 }
 0x3ee   : > { %v2601_v35 = vmin.f32 %v2558_v30, 0.0  ;;  %v2270_v62 = vadd.f32 %v2269_v6, %v5739_v54  ;;  %vm2585_vm10 = vcmp.gt.f32.partialorder %v2558_v30, 0.0 }
 0x3f0   : > { %v3385_v43 = vpop.eup %3384  ;;  %v2627_v38 = vmul.f32 1.442695, %v2601_v35  ;;  %v2431_v4 = vadd.f32 %v2430_v12, %v2270_v62 }
 0x3f1   : > { %v2834_v55 = vadd.f32 -1.0, %v3385_v43 }
 0x3f2   : > { %3386 = vpow2.f32 %v2627_v38  ;;  %v2496_v8 = vadd.f32 %v2495_v22, %v2431_v4  ;;  %v2569_v15 = vpop.f32.mrf.mxu1 }
 0x3f3   : > { %v2664_v5 = vsel %vm2584_vm9, %v2555_v25, %v2834_v55 }
 0x3f4   : > { %2680 = vst [vmem:[%s5768_s12 + $0x48] sm:$0xff] %v2664_v5  ;;  %v2561_v31 = vadd.f32 %v2560_v37, %v2496_v8  ;;  %v2507_v63 = vpop.f32.mrf.mxu0 }
 0x3f5   : > { %v2272_v27 = vpop.f32.mrf.mxu2  ;;  %v2433_v56 = vpop.f32.mrf.mxu3 }
 0x3f6   : > { %v2602_v58 = vmin.f32 %v2561_v31, 0.0  ;;  %v2273_v34 = vadd.f32 %v2272_v27, %v5745_v9  ;;  %vm2586_vm11 = vcmp.gt.f32.partialorder %v2561_v31, 0.0 }
 0x3f8   : > { %v3387_v23 = vpop.eup %3386  ;;  %v2629_v54 = vmul.f32 1.442695, %v2602_v58  ;;  %v2434_v49 = vadd.f32 %v2433_v56, %v2273_v34 }
 0x3f9   : > { %v2835_v20 = vadd.f32 -1.0, %v3387_v23 }
 0x3fa   : > { %3388 = vpow2.f32 %v2629_v54  ;;  %v2499_v26 = vadd.f32 %v2498_v59, %v2434_v49  ;;  %v2572_v17 = vpop.f32.mrf.mxu1 }
 0x3fb   : > { %v2665_v10 = vsel %vm2585_vm10, %v2558_v30, %v2835_v20 }
 0x3fc   : > { %2681 = vst [vmem:[%s5768_s12 + $0x50] sm:$0xff] %v2665_v10  ;;  %v2564_v13 = vadd.f32 %v2563_v61, %v2499_v26 }
 0x3fd   : > { %v2275_v18 = vpop.f32.mrf.mxu2  ;;  %v2436_v36 = vpop.f32.mrf.mxu3 }
 0x3fe   : > { %v2603_v3 = vmin.f32 %v2564_v13, 0.0  ;;  %v2276_v0 = vadd.f32 %v2275_v18, %v5751_v21  ;;  %vm2587_vm12 = vcmp.gt.f32.partialorder %v2564_v13, 0.0 }
 0x400   : > { %v3389_v2 = vpop.eup %3388  ;;  %v2631_v9 = vmul.f32 1.442695, %v2603_v3  ;;  %v2437_v45 = vadd.f32 %v2436_v36, %v2276_v0 }
 0x401   : > { %v2836_v53 = vadd.f32 -1.0, %v3389_v2 }
 0x402   : > { %3390 = vpow2.f32 %v2631_v9  ;;  %v2502_v50 = vadd.f32 %v2501_v41, %v2437_v45 }
 0x403   : > { %v2666_v19 = vsel %vm2586_vm11, %v2561_v31, %v2836_v53 }
 0x404   : > { %2682 = vst [vmem:[%s5768_s12 + $0x58] sm:$0xff] %v2666_v19  ;;  %v2567_v29 = vadd.f32 %v2566_v39, %v2502_v50 }
 0x405   : > { %v2278_v32 = vpop.f32.mrf.mxu2  ;;  %v2439_v48 = vpop.f32.mrf.mxu3 }
 0x406   : > { %v2604_v60 = vmin.f32 %v2567_v29, 0.0  ;;  %v2279_v57 = vadd.f32 %v2278_v32, %v5753_v16  ;;  %vm2588_vm13 = vcmp.gt.f32.partialorder %v2567_v29, 0.0 }
 0x408   : > { %v3391_v28 = vpop.eup %3390  ;;  %v2633_v21 = vmul.f32 1.442695, %v2604_v60  ;;  %v2440_v42 = vadd.f32 %v2439_v48, %v2279_v57 }
 0x409   : > { %v2837_v52 = vadd.f32 -1.0, %v3391_v28 }
 0x40a   : > { %3392 = vpow2.f32 %v2633_v21  ;;  %v2505_v11 = vadd.f32 %v2504_v47, %v2440_v42 }
 0x40b   : > { %v2667_v25 = vsel %vm2587_vm12, %v2564_v13, %v2837_v52 }
 0x40c   : > { %2683 = vst [vmem:[%s5768_s12 + $0x60] sm:$0xff] %v2667_v25  ;;  %v2570_v1 = vadd.f32 %v2569_v15, %v2505_v11 }
 0x40d   : > { %v2281_v40 = vpop.f32.mrf.mxu2  ;;  %v2442_v44 = vpop.f32.mrf.mxu3 }
 0x40e   : > { %v2605_v14 = vmin.f32 %v2570_v1, 0.0  ;;  %v2282_v22 = vadd.f32 %v2281_v40, %v5755_v7  ;;  %vm2589_vm14 = vcmp.gt.f32.partialorder %v2570_v1, 0.0 }
 0x410   : > { %v3393_v51 = vpop.eup %3392  ;;  %v2635_v16 = vmul.f32 1.442695, %v2605_v14  ;;  %v2443_v33 = vadd.f32 %v2442_v44, %v2282_v22 }
 0x411   : > { %v2838_v37 = vadd.f32 -1.0, %v3393_v51 }
 0x412   : > { %3394 = vpow2.f32 %v2635_v16  ;;  %v2508_v46 = vadd.f32 %v2507_v63, %v2443_v33 }
 0x413   : > { %v2668_v24 = vsel %vm2588_vm13, %v2567_v29, %v2838_v37 }
 0x414   : > { %2684 = vst [vmem:[%s5768_s12 + $0x68] sm:$0xff] %v2668_v24  ;;  %v2573_v30 = vadd.f32 %v2572_v17, %v2508_v46 }
 0x416   : > { %v2606_v6 = vmin.f32 %v2573_v30, 0.0  ;;  %vm2590_vm15 = vcmp.gt.f32.partialorder %v2573_v30, 0.0 }
 0x418   : > { %v3395_v12 = vpop.eup %3394  ;;  %v2637_v35 = vmul.f32 1.442695, %v2606_v6 }
 0x419   : > { %v2839_v62 = vadd.f32 -1.0, %v3395_v12 }
 0x41a   : > { %3396 = vpow2.f32 %v2637_v35 }
 0x41b   : > { %v2669_v7 = vsel %vm2589_vm14, %v2570_v1, %v2839_v62 }
 0x41c   : > { %2685 = vst [vmem:[%s5768_s12 + $0x70] sm:$0xff] %v2669_v7 }
 0x420   : > { %v3397_v43 = vpop.eup %3396 }
 0x421   : > { %v2840_v38 = vadd.f32 -1.0, %v3397_v43 }
 0x423   : > { %v2670_v4 = vsel %vm2590_vm15, %v2573_v30, %v2840_v38 }
 0x424   : > { %2686 = vst [vmem:[%s5768_s12 + $0x78] sm:$0xff] %v2670_v4 }
 0x425 PF: > { %p10_p9 = scmp.ge.s32.totalorder %s3530_s16, 5   ;;  %s6336_s12 = smov %s3481_s13 }
 0x426   : > { %s6337_s13 = smov %s3539_s19  ;;  %s6338_s14 = smov %s3530_s16 }
 0x427   :  { %12 = sbr.rel (!%p10_p9) target bundleno = 2 (0x2), region = 149 }

// kernel: graph_network.3
= control target key start
LH: loop header
LB: loop body
LE: loop exit
PB: predicated region body
PF: predicated region fallthrough
CT: control target
= control target key end

     0   :  { %s1898_s12 = smov 0   ;;  %s1900_s13 = smov 0   ;;  %s2812_s0 = inlined_call_operand.vmem [shape: f32[1,1,384], index: 0, kind: input, shape index: {}]   ;;  %s2813_s1 = inlined_call_operand.vmem [shape: s8[384,384], index: 1, kind: input, shape index: {}]   ;;  %s2814_s2 = inlined_call_operand.vmem [shape: f32[1,384,128], index: 2, kind: input, shape index: {}]   ;;  %s2815_s3 = inlined_call_operand.vmem [shape: f32[384,128], index: 3, kind: output, shape index: {}]  }
   0x1   :  { %s1902_s14 = smov 0  }
   0x2 LB: > { %s1914_s15 = sadd.s32 4294967295, %s1875_s14   ;;  %s1917_s16 = sadd.s32 1, %s1875_s14   ;;  %s1875_s14 = sphi %s1902_s14, %s2874_s14   ;;  %s1871_s13 = sphi %s1900_s13, %s2873_s13   ;;  %s1867_s12 = sphi %s1898_s12, %s2872_s12  }
   0x3   : > { %s43_s17 = ssub.s32 %s1875_s14, %s1917_s16  ;;  %s46_s18 = sadd.s32 1, %s1871_s13 }
   0x4   : > { %p44_p0 = scmp.eq.s32.totalorder %s43_s17, 0  ;;  %p53_p1 = scmp.ne.s32.totalorder %s1871_s13, %s1867_s12 }
   0x5   : > { %p54_p2 = scmp.eq.s32.totalorder %s1875_s14, 0  ;;  %p1541_p4 = scmp.ge.s32.totalorder %s1875_s14, 3 }
   0x6   : > { %s1926_s19 = scalar_select %p44_p0, %s1871_s13, %s46_s18  }
   0x7   : > { %p55_p3 = por %p54_p2, %p53_p1  ;;  %129 = sbr.rel (%p1541_p4) target bundleno = 28 (0x1c), region = 20 }
   0xc   : > { %138 = sbr.rel (!%p55_p3) target bundleno = 28 (0x1c), region = 28  ;;  %s140_s20 = sand.u32 (%p55_p3), 1, %s1871_s13  }
   0xd   : > { %s1542_s21 = sshll.u32 (%p55_p3), %s1875_s14, 3  ;;  %s1596_s22 = smul.u32 (%p55_p3), 96, %s140_s20 }
   0xe   : > { %s144_s25 = scalar_lea.vmem (%p55_p3), %s2813_s1, %s1542_s21 }
   0xf   : > { %v195_v0 = vld [vmem:[%s144_s25] sm:$0xff] (%p55_p3)  ;;  %v197_v1 = vld [vmem:[%s144_s25 + $0x18] sm:$0xff] (%p55_p3)  ;;  %v199_v2 = vld [vmem:[%s144_s25 + $0x30] sm:$0xff] (%p55_p3)  ;;  %s142_s26 = scalar_lea.vmem (%p55_p3), [#allocation2], %s1596_s22 }
  0x10   : > { %196 = vst [vmem:[%s142_s26] sm:$0xff] (%p55_p3), %v195_v0  ;;  %v201_v3 = vld [vmem:[%s144_s25 + $0x48] sm:$0xff] (%p55_p3)  ;;  %v203_v4 = vld [vmem:[%s144_s25 + $0x60] sm:$0xff] (%p55_p3)  ;;  %v205_v5 = vld [vmem:[%s144_s25 + $0x78] sm:$0xff] (%p55_p3) }
  0x11   : > { %198 = vst [vmem:[%s142_s26 + $0x8] sm:$0xff] %v197_v1  ;;  %v207_v6 = vld [vmem:[%s144_s25 + $0x90] sm:$0xff]  ;;  %v209_v7 = vld [vmem:[%s144_s25 + $0xa8] sm:$0xff]  ;;  %v211_v8 = vld [vmem:[%s144_s25 + $0xc0] sm:$0xff] }
  0x12   : > { %200 = vst [vmem:[%s142_s26 + $0x10] sm:$0xff] %v199_v2  ;;  %v213_v9 = vld [vmem:[%s144_s25 + $0xd8] sm:$0xff]  ;;  %v215_v10 = vld [vmem:[%s144_s25 + $0xf0] sm:$0xff]  ;;  %v217_v11 = vld [vmem:[%s144_s25 + $0x108] sm:$0xff] }
  0x13   : > { %202 = vst [vmem:[%s142_s26 + $0x18] sm:$0xff] %v201_v3 }
  0x14   : > { %204 = vst [vmem:[%s142_s26 + $0x20] sm:$0xff] %v203_v4 }
  0x15   : > { %206 = vst [vmem:[%s142_s26 + $0x28] sm:$0xff] %v205_v5 }
  0x16   : > { %208 = vst [vmem:[%s142_s26 + $0x30] sm:$0xff] %v207_v6 }
  0x17   : > { %210 = vst [vmem:[%s142_s26 + $0x38] sm:$0xff] %v209_v7 }
  0x18   : > { %212 = vst [vmem:[%s142_s26 + $0x40] sm:$0xff] %v211_v8 }
  0x19   : > { %214 = vst [vmem:[%s142_s26 + $0x48] sm:$0xff] %v213_v9 }
  0x1a   : > { %216 = vst [vmem:[%s142_s26 + $0x50] sm:$0xff] %v215_v10 }
  0x1b   : > { %218 = vst [vmem:[%s142_s26 + $0x58] sm:$0xff] %v217_v11 }
  0x1c PF: > { %p1543_p5 = scmp.ge.s32.totalorder %s1875_s14, 1  ;;  %p223_p6 = scmp.lt.s32.totalorder %s1875_s14, 4 }
  0x1e   : > { %p224_p7 = pnand %p1543_p5, %p223_p6 }
  0x20   : > { %227 = sbr.rel (%p224_p7) target bundleno = 925 (0x39d), region = 66 }
  0x25   : > { %v1939_v12 = vld [vmem:[%s2814_s2 + $0x20] sm:$0xff]  ;;  %v1944_v13 = vld [vmem:[%s2814_s2 + $0x10] sm:$0xff]  ;;  %p256_p8 = scmp.lt.s32.totalorder %s1914_s15, 2  ;;  %v1877_v15 = vmov 8   ;;  %v378_v16 = vld [vmem:[%s2814_s2 + $0x28] sm:$0xff]  ;;  %s230_s25 = sand.u32 1, %s1867_s12  }
  0x26   : > { %v1949_v14 = vld [vmem:[%s2814_s2] sm:$0xff]  ;;  %1625 = vset.pattern.permute.xlu2 %v1877_v15  ;;  %1624 = vset.pattern.permute.xlu1 %v1877_v15  ;;  %v376_v17 = vld [vmem:[%s2814_s2 + $0x18] sm:$0xff]  ;;  %v374_v18 = vld [vmem:[%s2814_s2 + $0x8] sm:$0xff]  ;;  %s1597_s12 = smul.u32 96, %s230_s25  ;;  %s1544_s21 = sshll.u32 %s1914_s15, 4 }
  0x27   : > { %1623 = vset.pattern.permute.xlu0 %v1877_v15  ;;  %444 = vperm.xlu2 %1625, %v1939_v12   ;;  %s1954_s6 = scalar_select %p256_p8, %s1914_s15, 2  ;;  %v388_v19 = vld [vmem:[%s2814_s2 + $0x78] sm:$0xff]  ;;  %v387_v20 = vld [vmem:[%s2814_s2 + $0x70] sm:$0xff]  ;;  %v381_v21 = vld [vmem:[%s2814_s2 + $0x40] sm:$0xff] }
  0x28   : > { %434 = vperm.xlu1 %1624, %v1944_v13   ;;  %424 = vperm.xlu0 %1623, %v1949_v14   ;;  %v386_v22 = vld [vmem:[%s2814_s2 + $0x68] sm:$0xff]  ;;  %v380_v23 = vld [vmem:[%s2814_s2 + $0x38] sm:$0xff]  ;;  %v379_v24 = vld [vmem:[%s2814_s2 + $0x30] sm:$0xff]  ;;  %s2401_s26 = scalar_lea.vmem [#allocation2], %s1597_s12  ;;  %p260_p9 = scmp.lt.s32.totalorder %s1544_s21, 47 }
  0x29   : > { %s258_s9 = scalar_lea.vmem %s2812_s0, %s1954_s6  ;;  %1256 = vmatpush.msra.mxu0 %v388_v19  ;;  %1548 = vmatpush.msra.mxu3 %v388_v19  ;;  %v385_v25 = vld [vmem:[%s2814_s2 + $0x60] sm:$0xff]  ;;  %v384_v26 = vld [vmem:[%s2814_s2 + $0x58] sm:$0xff]  ;;  %v383_v27 = vld [vmem:[%s2814_s2 + $0x50] sm:$0xff] }
  0x2a   : > { %v382_v28 = vld [vmem:[%s2814_s2 + $0x48] sm:$0xff]  ;;  %v2011_v30 = vld [vmem:[%s2814_s2 + $0x80] sm:$0xff]  ;;  %v392_v32 = vld [vmem:[%s2814_s2 + $0x98] sm:$0xff]  ;;  %s2876_s21 = smov (!%p260_p9, %s1544_s21), 47 }
  0x2b   : > { %1257 = vmatpush.msra.mxu0 %v387_v20  ;;  %1549 = vmatpush.msra.mxu3 %v387_v20  ;;  %v2006_v29 = vld [vmem:[%s2814_s2 + $0x88] sm:$0xff]  ;;  %v393_v31 = vld [vmem:[%s2814_s2 + $0xa0] sm:$0xff]  ;;  %v391_v33 = vld [vmem:[%s2814_s2 + $0x90] sm:$0xff]  ;;  %s1545_s30 = sshll.u32 %s2876_s21, 3 }
  0x2c   : > { %v404_v34 = vld [vmem:[%s2814_s2 + $0xf8] sm:$0xff]  ;;  %v403_v35 = vld [vmem:[%s2814_s2 + $0xf0] sm:$0xff]  ;;  %v402_v37 = vld [vmem:[%s2814_s2 + $0xe8] sm:$0xff]  ;;  %s2781_s10 = scalar_lea.vmem %s2815_s3, %s1545_s30 }
  0x2d   : > { %1258 = vmatpush.msra.mxu0 %v386_v22  ;;  %1550 = vmatpush.msra.mxu3 %v386_v22  ;;  %v396_v36 = vld [vmem:[%s2814_s2 + $0xb8] sm:$0xff]  ;;  %v395_v38 = vld [vmem:[%s2814_s2 + $0xb0] sm:$0xff]  ;;  %v394_v39 = vld [vmem:[%s2814_s2 + $0xa8] sm:$0xff] }
  0x2e   : > { %1321 = vmatpush.msra.mxu1 %v404_v34  ;;  %v401_v40 = vld [vmem:[%s2814_s2 + $0xe0] sm:$0xff]  ;;  %v400_v41 = vld [vmem:[%s2814_s2 + $0xd8] sm:$0xff]  ;;  %v399_v42 = vld [vmem:[%s2814_s2 + $0xd0] sm:$0xff] }
  0x2f   : > { %449 = vperm.xlu2 %1625, %v378_v16   ;;  %1259 = vmatpush.msra.mxu0 %v385_v25  ;;  %v398_v43 = vld [vmem:[%s2814_s2 + $0xc8] sm:$0xff]  ;;  %v397_v44 = vld [vmem:[%s2814_s2 + $0xc0] sm:$0xff]  ;;  %v408_v46 = vld [vmem:[%s2814_s2 + $0x118] sm:$0xff] }
  0x30   : > { %439 = vperm.xlu1 %1624, %v376_v17   ;;  %429 = vperm.xlu0 %1623, %v374_v18   ;;  %v2064_v45 = vld [vmem:[%s2814_s2 + $0x100] sm:$0xff]  ;;  %v407_v47 = vld [vmem:[%s2814_s2 + $0x110] sm:$0xff]  ;;  %v406_v48 = vld [vmem:[%s2814_s2 + $0x108] sm:$0xff] }
  0x31   : > { %1260 = vmatpush.msra.mxu0 %v384_v26  ;;  %1551 = vmatpush.msra.mxu3 %v385_v25  ;;  %v2084_v49 = vld [vmem:[%s258_s9] ss:$0 sm:$0xff]  ;;  %v420_v50 = vld [vmem:[%s2814_s2 + $0x178] sm:$0xff]  ;;  %v419_v53 = vld [vmem:[%s2814_s2 + $0x170] sm:$0xff] }
  0x32   : > { %1322 = vmatpush.msra.mxu1 %v403_v35  ;;  %1386 = vmatpush.msra.mxu2 %v420_v50  ;;  %v411_v54 = vld [vmem:[%s2814_s2 + $0x130] sm:$0xff]  ;;  %v418_v55 = vld [vmem:[%s2814_s2 + $0x168] sm:$0xff]  ;;  %v409_v57 = vld [vmem:[%s2814_s2 + $0x120] sm:$0xff] }
  0x33   : > { %1261 = vmatpush.msra.mxu0 %v383_v27  ;;  %1552 = vmatpush.msra.mxu3 %v384_v26  ;;  %v410_v56 = vld [vmem:[%s2814_s2 + $0x128] sm:$0xff]  ;;  %v417_v58 = vld [vmem:[%s2814_s2 + $0x160] sm:$0xff]  ;;  %v416_v59 = vld [vmem:[%s2814_s2 + $0x158] sm:$0xff] }
  0x34   : > { %1323 = vmatpush.msra.mxu1 %v402_v37  ;;  %1387 = vmatpush.msra.mxu2 %v419_v53  ;;  %v415_v62 = vld [vmem:[%s2814_s2 + $0x150] sm:$0xff]  ;;  %v414_v63 = vld [vmem:[%s2814_s2 + $0x148] sm:$0xff]  ;;  %v413_v0 = vld [vmem:[%s2814_s2 + $0x140] sm:$0xff] }
  0x35   : > { %1262 = vmatpush.msra.mxu0 %v382_v28  ;;  %1553 = vmatpush.msra.mxu3 %v383_v27  ;;  %v412_v1 = vld [vmem:[%s2814_s2 + $0x138] sm:$0xff] }
  0x36   : > { %1324 = vmatpush.msra.mxu1 %v401_v40  ;;  %1388 = vmatpush.msra.mxu2 %v418_v55 }
  0x37   : > { %464 = vperm.xlu2 %1625, %v381_v21   ;;  %1263 = vmatpush.msra.mxu0 %v381_v21 }
  0x38   : > { %459 = vperm.xlu1 %1624, %v380_v23   ;;  %454 = vperm.xlu0 %1623, %v379_v24  }
  0x39   : > { %1264 = vmatpush.msra.mxu0 %v380_v23  ;;  %1554 = vmatpush.msra.mxu3 %v382_v28 }
  0x3a   : > { %1325 = vmatpush.msra.mxu1 %v400_v41  ;;  %1389 = vmatpush.msra.mxu2 %v417_v58 }
  0x3b   : > { %1265 = vmatpush.msra.mxu0 %v379_v24  ;;  %1555 = vmatpush.msra.mxu3 %v381_v21 }
  0x3c   : > { %1326 = vmatpush.msra.mxu1 %v399_v42  ;;  %1390 = vmatpush.msra.mxu2 %v416_v59 }
  0x3d   : > { %1266 = vmatpush.msra.mxu0 %v378_v16  ;;  %1556 = vmatpush.msra.mxu3 %v380_v23 }
  0x3e   : > { %1327 = vmatpush.msra.mxu1 %v398_v43  ;;  %1391 = vmatpush.msra.mxu2 %v415_v62 }
  0x3f   : > { %479 = vperm.xlu2 %1625, %v384_v26   ;;  %1267 = vmatpush.msra.mxu0 %v1939_v12 }
  0x40   : > { %474 = vperm.xlu1 %1624, %v383_v27   ;;  %469 = vperm.xlu0 %1623, %v382_v28  }
  0x41   : > { %1268 = vmatpush.msra.mxu0 %v376_v17  ;;  %1557 = vmatpush.msra.mxu3 %v379_v24 }
  0x42   : > { %1328 = vmatpush.msra.mxu1 %v397_v44  ;;  %1392 = vmatpush.msra.mxu2 %v414_v63 }
  0x43   : > { %1269 = vmatpush.msra.mxu0 %v1944_v13  ;;  %1558 = vmatpush.msra.mxu3 %v378_v16 }
  0x44   : > { %1329 = vmatpush.msra.mxu1 %v396_v36  ;;  %1393 = vmatpush.msra.mxu2 %v413_v0 }
  0x45   : > { %1270 = vmatpush.msra.mxu0 %v374_v18  ;;  %1559 = vmatpush.msra.mxu3 %v1939_v12 }
  0x46   : > { %1330 = vmatpush.msra.mxu1 %v395_v38  ;;  %1394 = vmatpush.msra.mxu2 %v412_v1 }
  0x47   : > { %494 = vperm.xlu2 %1625, %v387_v20   ;;  %1271 = vmatpush.msra.mxu0 %v1949_v14 }
  0x48   : > { %489 = vperm.xlu1 %1624, %v386_v22   ;;  %484 = vperm.xlu0 %1623, %v385_v25  }
  0x49   : > { %1560 = vmatpush.msra.mxu3 %v376_v17  ;;  %1331 = vmatpush.msra.mxu1 %v394_v39 }
  0x4a   : > { %1395 = vmatpush.msra.mxu2 %v411_v54 }
  0x4b   : > { %1561 = vmatpush.msra.mxu3 %v1944_v13  ;;  %1332 = vmatpush.msra.mxu1 %v393_v31 }
  0x4c   : > { %1396 = vmatpush.msra.mxu2 %v410_v56 }
  0x4d   : > { %1562 = vmatpush.msra.mxu3 %v374_v18  ;;  %1333 = vmatpush.msra.mxu1 %v392_v32 }
  0x4e   : > { %1397 = vmatpush.msra.mxu2 %v409_v57 }
  0x4f   : > { %509 = vperm.xlu2 %1625, %v2006_v29   ;;  %1563 = vmatpush.msra.mxu3 %v1949_v14 }
  0x50   : > { %504 = vperm.xlu1 %1624, %v2011_v30   ;;  %499 = vperm.xlu0 %1623, %v388_v19  }
  0x51   : > { %1564 = vmatpush.msrb.mxu3 %v404_v34  ;;  %1334 = vmatpush.msra.mxu1 %v391_v33 }
  0x52   : > { %1398 = vmatpush.msra.mxu2 %v408_v46 }
  0x53   : > { %1565 = vmatpush.msrb.mxu3 %v403_v35  ;;  %1335 = vmatpush.msra.mxu1 %v2006_v29 }
  0x54   : > { %1399 = vmatpush.msra.mxu2 %v407_v47 }
  0x55   : > { %1566 = vmatpush.msrb.mxu3 %v402_v37  ;;  %1336 = vmatpush.msra.mxu1 %v2011_v30 }
  0x56   : > { %1400 = vmatpush.msra.mxu2 %v406_v48 }
  0x57   : > { %524 = vperm.xlu2 %1625, %v393_v31   ;;  %1567 = vmatpush.msrb.mxu3 %v401_v40 }
  0x58   : > { %519 = vperm.xlu1 %1624, %v392_v32   ;;  %514 = vperm.xlu0 %1623, %v391_v33  }
  0x59   : > { %1568 = vmatpush.msrb.mxu3 %v400_v41  ;;  %1401 = vmatpush.msra.mxu2 %v2064_v45 }
  0x5b   : > { %1569 = vmatpush.msrb.mxu3 %v399_v42 }
  0x5d   : > { %1570 = vmatpush.msrb.mxu3 %v398_v43 }
  0x5f   : > { %539 = vperm.xlu2 %1625, %v396_v36   ;;  %1571 = vmatpush.msrb.mxu3 %v397_v44 }
  0x60   : > { %534 = vperm.xlu1 %1624, %v395_v38   ;;  %529 = vperm.xlu0 %1623, %v394_v39  }
  0x61   : > { %1572 = vmatpush.msrb.mxu3 %v396_v36 }
  0x63   : > { %1573 = vmatpush.msrb.mxu3 %v395_v38 }
  0x65   : > { %1574 = vmatpush.msrb.mxu3 %v394_v39 }
  0x67   : > { %554 = vperm.xlu2 %1625, %v399_v42   ;;  %1575 = vmatpush.msrb.mxu3 %v393_v31 }
  0x68   : > { %549 = vperm.xlu1 %1624, %v398_v43   ;;  %544 = vperm.xlu0 %1623, %v397_v44  }
  0x69   : > { %1576 = vmatpush.msrb.mxu3 %v392_v32 }
  0x6b   : > { %1577 = vmatpush.msrb.mxu3 %v391_v33 }
  0x6d   : > { %1578 = vmatpush.msrb.mxu3 %v2006_v29 }
  0x6f   : > { %569 = vperm.xlu2 %1625, %v402_v37   ;;  %1579 = vmatpush.msrb.mxu3 %v2011_v30 }
  0x70   : > { %564 = vperm.xlu1 %1624, %v401_v40   ;;  %559 = vperm.xlu0 %1623, %v400_v41  }
  0x77   : > { %584 = vperm.xlu2 %1625, %v2064_v45  }
  0x78   : > { %579 = vperm.xlu1 %1624, %v404_v34   ;;  %574 = vperm.xlu0 %1623, %v403_v35  }
  0x7f   : > { %599 = vperm.xlu2 %1625, %v408_v46  }
  0x80   : > { %594 = vperm.xlu1 %1624, %v407_v47   ;;  %589 = vperm.xlu0 %1623, %v406_v48  }
  0x81   : > { %v445_v51 = vpop.permute.xlu2 %444 }
  0x82   : > { %v669_v52 = vadd.f32 %v2084_v49, %v445_v51 }
  0x84   : > { %v717_v8 = vmul.f32 0.01, %v669_v52 }
  0x86   : > { %v2129_v13 = vmax.f32 %v669_v52, %v717_v8 }
  0x87   : > { %614 = vperm.xlu2 %1625, %v411_v54  }
  0x88   : > { %609 = vperm.xlu1 %1624, %v410_v56   ;;  %604 = vperm.xlu0 %1623, %v409_v57  }
  0x89   : > { %v450_v60 = vpop.permute.xlu2 %449 }
  0x8a   : > { %v670_v61 = vadd.f32 %v2084_v49, %v450_v60 }
  0x8c   : > { %v718_v21 = vmul.f32 0.01, %v670_v61 }
  0x8e   : > { %v2142_v26 = vmax.f32 %v670_v61, %v718_v21 }
  0x8f   : > { %629 = vperm.xlu2 %1625, %v414_v63  }
  0x90   : > { %624 = vperm.xlu1 %1624, %v413_v0   ;;  %619 = vperm.xlu0 %1623, %v412_v1  }
  0x91   : > { %v465_v2 = vpop.permute.xlu2 %464 }
  0x92   : > { %v673_v3 = vadd.f32 %v2084_v49, %v465_v2 }
  0x94   : > { %v721_v11 = vmul.f32 0.01, %v673_v3 }
  0x96   : > { %v2134_v15 = vmax.f32 %v673_v3, %v721_v11 }
  0x97   : > { %644 = vperm.xlu2 %1625, %v417_v58  }
  0x98   : > { %639 = vperm.xlu1 %1624, %v416_v59   ;;  %634 = vperm.xlu0 %1623, %v415_v62  }
  0x99   : > { %v480_v4 = vpop.permute.xlu2 %479 }
  0x9a   : > { %v676_v5 = vadd.f32 %v2084_v49, %v480_v4  ;;  %v435_v6 = vpop.permute.xlu1 %434  ;;  %v425_v7 = vpop.permute.xlu0 %424 }
  0x9b   : > { %v667_v9 = vadd.f32 %v2084_v49, %v435_v6  ;;  %v665_v10 = vadd.f32 %v2084_v49, %v425_v7 }
  0x9c   : > { %v724_v37 = vmul.f32 0.01, %v676_v5 }
  0x9d   : > { %v713_v12 = vmul.f32 0.01, %v665_v10  ;;  %v715_v33 = vmul.f32 0.01, %v667_v9 }
  0x9e   : > { %v2159_v44 = vmax.f32 %v676_v5, %v724_v37 }
  0x9f   : > { %v2131_v14 = vmax.f32 %v665_v10, %v713_v12  ;;  %659 = vperm.xlu2 %1625, %v420_v50   ;;  %v2151_v40 = vmax.f32 %v667_v9, %v715_v33 }
  0xa0   : > { %654 = vperm.xlu1 %1624, %v419_v53   ;;  %649 = vperm.xlu0 %1623, %v418_v55  }
  0xa1   : > { %v809_v16 = vmax.f32 %v2131_v14, %v2129_v13  ;;  %v495_v17 = vpop.permute.xlu2 %494 }
  0xa2   : > { %v679_v18 = vadd.f32 %v2084_v49, %v495_v17  ;;  %v440_v19 = vpop.permute.xlu1 %439  ;;  %v430_v20 = vpop.permute.xlu0 %429 }
  0xa3   : > { %v668_v22 = vadd.f32 %v2084_v49, %v440_v19  ;;  %v666_v23 = vadd.f32 %v2084_v49, %v430_v20  ;;  %v813_v24 = vmax.f32 %v809_v16, %v2134_v15 }
  0xa4   : > { %v727_v54 = vmul.f32 0.01, %v679_v18 }
  0xa5   : > { %v714_v25 = vmul.f32 0.01, %v666_v23  ;;  %v716_v34 = vmul.f32 0.01, %v668_v22 }
  0xa6   : > { %v2174_v59 = vmax.f32 %v679_v18, %v727_v54 }
  0xa7   : > { %v2144_v27 = vmax.f32 %v666_v23, %v714_v25  ;;  %v2153_v41 = vmax.f32 %v668_v22, %v716_v34 }
  0xa9   : > { %v810_v28 = vmax.f32 %v2144_v27, %v2142_v26  ;;  %v510_v29 = vpop.permute.xlu2 %509 }
  0xaa   : > { %v682_v30 = vadd.f32 %v2084_v49, %v510_v29  ;;  %v460_v31 = vpop.permute.xlu1 %459  ;;  %v455_v32 = vpop.permute.xlu0 %454 }
  0xab   : > { %v672_v35 = vadd.f32 %v2084_v49, %v460_v31  ;;  %v671_v36 = vadd.f32 %v2084_v49, %v455_v32 }
  0xac   : > { %v730_v4 = vmul.f32 0.01, %v682_v30 }
  0xad   : > { %v720_v38 = vmul.f32 0.01, %v672_v35  ;;  %v719_v39 = vmul.f32 0.01, %v671_v36 }
  0xae   : > { %v2190_v9 = vmax.f32 %v682_v30, %v730_v4 }
  0xaf   : > { %v2155_v42 = vmax.f32 %v672_v35, %v720_v38  ;;  %v2157_v43 = vmax.f32 %v671_v36, %v719_v39 }
  0xb1   : > { %v812_v45 = vmax.f32 %v2153_v41, %v2155_v42  ;;  %v811_v46 = vmax.f32 %v2151_v40, %v2157_v43  ;;  %v525_v47 = vpop.permute.xlu2 %524 }
  0xb2   : > { %v475_v48 = vpop.permute.xlu1 %474  ;;  %v470_v50 = vpop.permute.xlu0 %469 }
  0xb3   : > { %v675_v51 = vadd.f32 %v2084_v49, %v475_v48  ;;  %v674_v52 = vadd.f32 %v2084_v49, %v470_v50  ;;  %v2168_v53 = vmax.f32 %v812_v45, %v2159_v44 }
  0xb5   : > { %v723_v55 = vmul.f32 0.01, %v675_v51  ;;  %v722_v56 = vmul.f32 0.01, %v674_v52 }
  0xb7   : > { %v2170_v57 = vmax.f32 %v675_v51, %v723_v55  ;;  %v2172_v58 = vmax.f32 %v674_v52, %v722_v56  ;;  %v685_v55 = vadd.f32 %v2084_v49, %v525_v47 }
  0xb9   : > { %v2177_v60 = vmax.f32 %v811_v46, %v2170_v57  ;;  %v814_v61 = vmax.f32 %v810_v28, %v2172_v58  ;;  %v2180_v62 = vpop.permute.xlu2 %539 }
  0xba   : > { %v490_v63 = vpop.permute.xlu1 %489  ;;  %v485_v0 = vpop.permute.xlu0 %484 }
  0xbb   : > { %v678_v1 = vadd.f32 %v2084_v49, %v490_v63  ;;  %v677_v2 = vadd.f32 %v2084_v49, %v485_v0  ;;  %v819_v3 = vmax.f32 %v2177_v60, %v2174_v59 }
  0xbd   : > { %v726_v5 = vmul.f32 0.01, %v678_v1  ;;  %v725_v6 = vmul.f32 0.01, %v677_v2 }
  0xbf   : > { %v2186_v7 = vmax.f32 %v678_v1, %v726_v5  ;;  %v2188_v8 = vmax.f32 %v677_v2, %v725_v6 }
  0xc1   : > { %v818_v10 = vmax.f32 %v814_v61, %v2186_v7  ;;  %v817_v11 = vmax.f32 %v813_v24, %v2188_v8  ;;  %v555_v12 = vpop.permute.xlu2 %554 }
  0xc2   : > { %v505_v16 = vpop.permute.xlu1 %504  ;;  %v500_v17 = vpop.permute.xlu0 %499  ;;  %v691_v0 = vadd.f32 %v2084_v49, %v555_v12 }
  0xc3   : > { %v681_v18 = vadd.f32 %v2084_v49, %v505_v16  ;;  %v680_v19 = vadd.f32 %v2084_v49, %v500_v17  ;;  %v822_v20 = vmax.f32 %v818_v10, %v2190_v9  ;;  %v733_v10 = vmul.f32 0.01, %v685_v55 }
  0xc4   : > { %v739_v12 = vmul.f32 0.01, %v691_v0 }
  0xc5   : > { %v729_v21 = vmul.f32 0.01, %v681_v18  ;;  %v728_v22 = vmul.f32 0.01, %v680_v19 }
  0xc7   : > { %v2197_v23 = vmax.f32 %v681_v18, %v729_v21  ;;  %v2199_v25 = vmax.f32 %v680_v19, %v728_v22 }
  0xc9   : > { %v2202_v28 = vmax.f32 %v817_v11, %v2197_v23  ;;  %v820_v24 = vmax.f32 %v2168_v53, %v2199_v25  ;;  %v570_v29 = vpop.permute.xlu2 %569 }
  0xca   : > { %v520_v30 = vpop.permute.xlu1 %519  ;;  %v515_v31 = vpop.permute.xlu0 %514  ;;  %v694_v4 = vadd.f32 %v2084_v49, %v570_v29 }
  0xcb   : > { %v683_v45 = vadd.f32 %v2084_v49, %v515_v31  ;;  %v684_v47 = vadd.f32 %v2084_v49, %v520_v30  ;;  %v2229_v31 = vmax.f32 %v685_v55, %v733_v10  ;;  %v688_v30 = vadd.f32 %v2084_v49, %v2180_v62 }
  0xcc   : > { %v742_v21 = vmul.f32 0.01, %v694_v4 }
  0xcd   : > { %v731_v51 = vmul.f32 0.01, %v683_v45 }
  0xcf   : > { %v2214_v1 = vmax.f32 %v683_v45, %v731_v51 }
  0xd1   : > { %v585_v34 = vpop.permute.xlu2 %584  ;;  %v823_v18 = vmax.f32 %v819_v3, %v2214_v1 }
  0xd2   : > { %v535_v32 = vpop.permute.xlu1 %534  ;;  %v530_v33 = vpop.permute.xlu0 %529 }
  0xd3   : > { %v686_v46 = vadd.f32 %v2084_v49, %v530_v33  ;;  %v687_v48 = vadd.f32 %v2084_v49, %v535_v32 }
  0xd5   : > { %v734_v54 = vmul.f32 0.01, %v686_v46  ;;  %v735_v56 = vmul.f32 0.01, %v687_v48 }
  0xd7   : > { %v2218_v5 = vmax.f32 %v686_v46, %v734_v54  ;;  %v2221_v11 = vmax.f32 %v687_v48, %v735_v56  ;;  %v2236_v48 = vmax.f32 %v691_v0, %v739_v12  ;;  %v2242_v54 = vmax.f32 %v694_v4, %v742_v21 }
  0xd9   : > { %v2206_v37 = vpop.permute.xlu2 %599  ;;  %v826_v22 = vmax.f32 %v822_v20, %v2218_v5  ;;  %v827_v32 = vmax.f32 %v823_v18, %v2221_v11  ;;  %2829 = vst [vmem:[#allocation4_spill] sm:$0xff] %v2242_v54 }
  0xda   : > { %v550_v35 = vpop.permute.xlu1 %549  ;;  %v545_v36 = vpop.permute.xlu0 %544 }
  0xdb   : > { %v690_v50 = vadd.f32 %v2084_v49, %v550_v35  ;;  %v689_v6 = vadd.f32 %v2084_v49, %v545_v36  ;;  %v732_v36 = vmul.f32 0.01, %v684_v47 }
  0xdd   : > { %v738_v60 = vmul.f32 0.01, %v690_v50  ;;  %v737_v29 = vmul.f32 0.01, %v689_v6  ;;  %v2249_v10 = vmax.f32 %v684_v47, %v732_v36 }
  0xdf   : > { %v2224_v16 = vmax.f32 %v690_v50, %v738_v60  ;;  %v2245_v55 = vmax.f32 %v689_v6, %v737_v29  ;;  %v831_v60 = vmax.f32 %v827_v32, %v2236_v48 }
  0xe1   : > { %v615_v52 = vpop.permute.xlu2 %614 }
  0xe2   : > { %v565_v38 = vpop.permute.xlu1 %564  ;;  %v560_v39 = vpop.permute.xlu0 %559  ;;  %v703_v33 = vadd.f32 %v2084_v49, %v615_v52  ;;  %v697_v52 = vadd.f32 %v2084_v49, %v585_v34 }
  0xe3   : > { %v693_v17 = vadd.f32 %v2084_v49, %v565_v38  ;;  %v830_v38 = vmax.f32 %v826_v22, %v2224_v16  ;;  %v692_v62 = vadd.f32 %v2084_v49, %v560_v39 }
  0xe4   : > { %v751_v56 = vmul.f32 0.01, %v703_v33  ;;  %v745_v21 = vmul.f32 0.01, %v697_v52 }
  0xe5   : > { %v741_v45 = vmul.f32 0.01, %v693_v17  ;;  %v834_v4 = vmax.f32 %v830_v38, %v2242_v54  ;;  %v740_v22 = vmul.f32 0.01, %v692_v62 }
  0xe6   : > { %v2263_v29 = vmax.f32 %v703_v33, %v751_v56 }
  0xe7   : > { %v2253_v12 = vmax.f32 %v693_v17, %v741_v45  ;;  %v2280_v56 = vmax.f32 %v692_v62, %v740_v22 }
  0xe9   : > { %v630_v35 = vpop.permute.xlu2 %629 }
  0xea   : > { %v580_v61 = vpop.permute.xlu1 %579  ;;  %v575_v63 = vpop.permute.xlu0 %574 }
  0xeb   : > { %v695_v2 = vadd.f32 %v2084_v49, %v575_v63  ;;  %v696_v34 = vadd.f32 %v2084_v49, %v580_v61  ;;  %v824_v61 = vmax.f32 %v820_v24, %v2249_v10  ;;  %v2282_v24 = vmax.f32 %v697_v52, %v745_v21 }
  0xed   : > { %v743_v19 = vmul.f32 0.01, %v695_v2  ;;  %2830 = vst [vmem:[#allocation5_spill] sm:$0xff] %v2282_v24 }
  0xef   : > { %v2238_v20 = vmax.f32 %v695_v2, %v743_v19  ;;  %v825_v2 = vmax.f32 %v2202_v28, %v2229_v31  ;;  %v736_v19 = vmul.f32 0.01, %v688_v30  ;;  %v706_v28 = vadd.f32 %v2084_v49, %v630_v35 }
  0xf1   : > { %2828 = vst [vmem:[#allocation3_spill] sm:$0xff] %v2238_v20  ;;  %v835_v6 = vmax.f32 %v831_v60, %v2238_v20  ;;  %v829_v47 = vmax.f32 %v825_v2, %v2245_v55  ;;  %v645_v53 = vpop.permute.xlu2 %644  ;;  %v754_v60 = vmul.f32 0.01, %v706_v28 }
  0xf2   : > { %v595_v3 = vpop.permute.xlu1 %594  ;;  %v590_v46 = vpop.permute.xlu0 %589  ;;  %v709_v52 = vadd.f32 %v2084_v49, %v645_v53 }
  0xf3   : > { %v699_v50 = vadd.f32 %v2084_v49, %v595_v3  ;;  %v698_v51 = vadd.f32 %v2084_v49, %v590_v46  ;;  %v833_v36 = vmax.f32 %v829_v47, %v2253_v12  ;;  %v744_v3 = vmul.f32 0.01, %v696_v34 }
  0xf4   : > { %v2293_v62 = vmax.f32 %v706_v28, %v754_v60  ;;  %v757_v28 = vmul.f32 0.01, %v709_v52 }
  0xf5   : > { %v747_v63 = vmul.f32 0.01, %v699_v50  ;;  %v746_v0 = vmul.f32 0.01, %v698_v51 }
  0xf7   : > { %v2258_v18 = vmax.f32 %v699_v50, %v747_v63  ;;  %v2260_v39 = vmax.f32 %v698_v51, %v746_v0  ;;  %v2276_v50 = vmax.f32 %v688_v30, %v736_v19  ;;  %v700_v51 = vadd.f32 %v2084_v49, %v2206_v37 }
  0xf8   : > { %v837_v30 = vmax.f32 %v833_v36, %v2282_v24 }
  0xf9   : > { %v839_v17 = vmax.f32 %v835_v6, %v2258_v18  ;;  %v838_v32 = vmax.f32 %v834_v4, %v2260_v39  ;;  %v828_v2 = vmax.f32 %v824_v61, %v2276_v50  ;;  %v2285_v4 = vmax.f32 %v696_v34, %v744_v3  ;;  %v660_v53 = vpop.permute.xlu2 %659 }
  0xfa   : > { %v610_v38 = vpop.permute.xlu1 %609  ;;  %v605_v45 = vpop.permute.xlu0 %604  ;;  %v748_v19 = vmul.f32 0.01, %v700_v51 }
  0xfb   : > { %v702_v46 = vadd.f32 %v2084_v49, %v610_v38  ;;  %v701_v33 = vadd.f32 %v2084_v49, %v605_v45  ;;  %v843_v35 = vmax.f32 %v839_v17, %v2263_v29  ;;  %2831 = vst [vmem:[#allocation6_spill] sm:$0xff] %v2285_v4  ;;  %v832_v37 = vmax.f32 %v828_v2, %v2280_v56 }
  0xfc   : > { %v2302_v3 = vmax.f32 %v700_v51, %v748_v19  ;;  %v712_v2 = vadd.f32 %v2084_v49, %v660_v53 }
  0xfd   : > { %v750_v63 = vmul.f32 0.01, %v702_v46  ;;  %v749_v0 = vmul.f32 0.01, %v701_v33  ;;  %v836_v61 = vmax.f32 %v832_v37, %v2285_v4 }
  0xfe   : > { %2832 = vst [vmem:[#allocation7_spill] sm:$0xff] %v2302_v3 }
  0xff   : > { %v2287_v6 = vmax.f32 %v702_v46, %v750_v63  ;;  %v2289_v47 = vmax.f32 %v701_v33, %v749_v0  ;;  %v840_v63 = vmax.f32 %v836_v61, %v2302_v3  ;;  %v2309_v0 = vmax.f32 %v709_v52, %v757_v28 }
 0x101   : > { %v842_v21 = vmax.f32 %v838_v32, %v2287_v6  ;;  %v841_v22 = vmax.f32 %v837_v30, %v2289_v47 }
 0x102   : > { %v625_v17 = vpop.permute.xlu1 %624  ;;  %v620_v34 = vpop.permute.xlu0 %619 }
 0x103   : > { %v705_v38 = vadd.f32 %v2084_v49, %v625_v17  ;;  %v704_v45 = vadd.f32 %v2084_v49, %v620_v34  ;;  %v846_v36 = vmax.f32 %v842_v21, %v2293_v62 }
 0x105   : > { %v753_v46 = vmul.f32 0.01, %v705_v38  ;;  %v752_v33 = vmul.f32 0.01, %v704_v45 }
 0x107   : > { %v2304_v60 = vmax.f32 %v705_v38, %v753_v46  ;;  %v2306_v32 = vmax.f32 %v704_v45, %v752_v33  ;;  %v760_v38 = vmul.f32 0.01, %v712_v2 }
 0x109   : > { %v845_v30 = vmax.f32 %v841_v22, %v2304_v60  ;;  %v844_v37 = vmax.f32 %v840_v63, %v2306_v32  ;;  %v2321_v28 = vmax.f32 %v712_v2, %v760_v38 }
 0x10a   : > { %v640_v51 = vpop.permute.xlu1 %639  ;;  %v635_v19 = vpop.permute.xlu0 %634 }
 0x10b   : > { %v849_v21 = vmax.f32 %v845_v30, %v2309_v0  ;;  %v708_v17 = vadd.f32 %v2084_v49, %v640_v51  ;;  %v707_v34 = vadd.f32 %v2084_v49, %v635_v19 }
 0x10d   : > { %v756_v45 = vmul.f32 0.01, %v708_v17  ;;  %v755_v46 = vmul.f32 0.01, %v707_v34 }
 0x10f   : > { %v2317_v61 = vmax.f32 %v708_v17, %v756_v45  ;;  %v2319_v52 = vmax.f32 %v707_v34, %v755_v46 }
 0x111   : > { %v848_v22 = vmax.f32 %v844_v37, %v2317_v61  ;;  %v847_v33 = vmax.f32 %v843_v35, %v2319_v52 }
 0x112   : > { %v655_v53 = vpop.permute.xlu1 %654  ;;  %v650_v63 = vpop.permute.xlu0 %649 }
 0x113   : > { %v852_v30 = vmax.f32 %v848_v22, %v2321_v28  ;;  %v711_v51 = vadd.f32 %v2084_v49, %v655_v53  ;;  %v710_v19 = vadd.f32 %v2084_v49, %v650_v63 }
 0x115   : > { %v759_v3 = vmul.f32 0.01, %v711_v51  ;;  %v758_v24 = vmul.f32 0.01, %v710_v19 }
 0x117   : > { %v2328_v17 = vmax.f32 %v711_v51, %v759_v3  ;;  %v2330_v34 = vmax.f32 %v710_v19, %v758_v24 }
 0x119   : > { %v851_v2 = vmax.f32 %v847_v33, %v2328_v17  ;;  %v850_v37 = vmax.f32 %v846_v36, %v2330_v34 }
 0x11b   : > { %v854_v38 = vmax.f32 %v851_v2, %v852_v30  ;;  %v853_v35 = vmax.f32 %v849_v21, %v850_v37 }
 0x11d   : > { %v855_v45 = vmax.f32 %v853_v35, %v854_v38 }
 0x11f   : > { %v856_v46 = vrot.slane %v855_v45, 4 }
 0x121   : > { %v857_v4 = vmax.f32 %v855_v45, %v856_v46 }
 0x123   : > { %v858_v22 = vrot.slane %v857_v4, 2 }
 0x125   : > { %v859_v20 = vmax.f32 %v857_v4, %v858_v22  ;;  %v265_v22 = vld [vmem:[%s2401_s26] sm:$0xff] }
 0x126   : > { %v277_v46 = vunpack.c.0.s8 %v265_v22  ;;  %v278_v2 = vunpack.c.1.s8 %v265_v22  ;;  %v279_v51 = vunpack.c.2.s8 %v265_v22 }
 0x127   : > { %v860_v53 = vrot.slane %v859_v20, 1 }
 0x128   : > { %v325_v30 = vcvt.s32.f32 %v277_v46  ;;  %v326_v35 = vcvt.s32.f32 %v278_v2 }
 0x129   : > { %v2334_v54 = vmax.f32 %v859_v20, %v860_v53 }
 0x12b   : > { %v862_v24 = vsub.f32 %v2131_v14, %v2334_v54  ;;  %v863_v3 = vsub.f32 %v2144_v27, %v2334_v54  ;;  %v864_v36 = vsub.f32 %v2151_v40, %v2334_v54  ;;  %v865_v21 = vsub.f32 %v2153_v41, %v2334_v54 }
 0x12c   : > { %v866_v4 = vsub.f32 %v2129_v13, %v2334_v54  ;;  %v867_v20 = vsub.f32 %v2142_v26, %v2334_v54  ;;  %v868_v33 = vsub.f32 %v2157_v43, %v2334_v54  ;;  %v869_v14 = vsub.f32 %v2155_v42, %v2334_v54 }
 0x12d   : > { %v870_v27 = vsub.f32 %v2134_v15, %v2334_v54  ;;  %v871_v40 = vsub.f32 %v2172_v58, %v2334_v54  ;;  %v872_v41 = vsub.f32 %v2170_v57, %v2334_v54  ;;  %v873_v13 = vsub.f32 %v2159_v44, %v2334_v54 }
 0x12e   : > { %v910_v45 = vmul.f32 1.442695, %v862_v24  ;;  %v912_v37 = vmul.f32 1.442695, %v863_v3  ;;  %v914_v53 = vmul.f32 1.442695, %v864_v36  ;;  %v280_v15 = vunpack.c.3.s8 %v265_v22 }
 0x12f   : > { %v916_v49 = vmul.f32 1.442695, %v865_v21  ;;  %v918_v19 = vmul.f32 1.442695, %v866_v4  ;;  %v266_v24 = vld [vmem:[%s2401_s26 + $0x8] sm:$0xff] }
 0x130   : > { %1739 = vpow2.f32 %v910_v45  ;;  %v920_v3 = vmul.f32 1.442695, %v867_v20  ;;  %v922_v42 = vmul.f32 1.442695, %v868_v33  ;;  %v281_v43 = vunpack.c.0.s8 %v266_v24 }
 0x131   : > { %1741 = vpow2.f32 %v912_v37  ;;  %v327_v45 = vcvt.s32.f32 %v279_v51  ;;  %v924_v4 = vmul.f32 1.442695, %v869_v14  ;;  %v328_v46 = vcvt.s32.f32 %v280_v15 }
 0x132   : > { %1743 = vpow2.f32 %v914_v53  ;;  %v282_v53 = vunpack.c.1.s8 %v266_v24  ;;  %v926_v26 = vmul.f32 1.442695, %v870_v27  ;;  %v283_v20 = vunpack.c.2.s8 %v266_v24 }
 0x133   : > { %1745 = vpow2.f32 %v916_v49  ;;  %v329_v49 = vcvt.s32.f32 %v281_v43 }
 0x134   : > { %1747 = vpow2.f32 %v918_v19  ;;  %v330_v14 = vcvt.s32.f32 %v282_v53  ;;  %v284_v19 = vunpack.c.3.s8 %v266_v24 }
 0x135   : > { %1749 = vpow2.f32 %v920_v3 }
 0x136   : > { %v1740_v38 = vpop.eup %1739  ;;  %1751 = vpow2.f32 %v922_v42  ;;  %v930_v42 = vmul.f32 1.442695, %v872_v41  ;;  %v332_v24 = vcvt.s32.f32 %v284_v19 }
 0x137   : > { %v1742_v63 = vpop.eup %1741  ;;  %v2405_v36 = vmul.f32 %v1740_v38, %v325_v30  ;;  %v267_v30 = vld [vmem:[%s2401_s26 + $0x10] sm:$0xff]  ;;  %1753 = vpow2.f32 %v924_v4  ;;  %v2833_v4 = vsub.f32 %v2188_v8, %v2334_v54 }
 0x138   : > { %v2407_v37 = vmul.f32 %v1742_v63, %v326_v35  ;;  %v1744_v21 = vpop.eup %1743  ;;  %v928_v63 = vmul.f32 1.442695, %v871_v40  ;;  %1755 = vpow2.f32 %v926_v26  ;;  %v285_v38 = vunpack.c.0.s8 %v267_v30 }
 0x139   : > { %v1746_v2 = vpop.eup %1745  ;;  %v2409_v22 = vmul.f32 %v1744_v21, %v327_v45  ;;  %v331_v35 = vcvt.s32.f32 %v283_v20  ;;  %v932_v40 = vmul.f32 1.442695, %v873_v13  ;;  %v286_v21 = vunpack.c.1.s8 %v267_v30  ;;  %v268_v13 = vld [vmem:[%s2401_s26 + $0x18] sm:$0xff] }
 0x13a   : > { %v1054_v33 = vadd.f32 %v2407_v37, %v2405_v36  ;;  %v1748_v51 = vpop.eup %1747  ;;  %v2417_v15 = vmul.f32 %v1746_v2, %v328_v46  ;;  %1757 = vpow2.f32 %v928_v63  ;;  %v934_v53 = vmul.f32 1.442695, %v2833_v4 }
 0x13b   : > { %v1750_v43 = vpop.eup %1749  ;;  %v2423_v3 = vmul.f32 %v1748_v51, %v329_v49  ;;  %1759 = vpow2.f32 %v930_v42  ;;  %v333_v46 = vcvt.s32.f32 %v285_v38  ;;  %v287_v2 = vunpack.c.2.s8 %v267_v30 }
 0x13c   : > { %v1055_v27 = vadd.f32 %v1054_v33, %v2409_v22  ;;  %v1752_v58 = vpop.eup %1751  ;;  %v2429_v26 = vmul.f32 %v1750_v43, %v330_v14  ;;  %1761 = vpow2.f32 %v932_v40  ;;  %v2834_v33 = vsub.f32 %v2186_v7, %v2334_v54 }
 0x13d   : > { %v1754_v41 = vpop.eup %1753  ;;  %v2435_v49 = vmul.f32 %v1752_v58, %v331_v35  ;;  %v288_v63 = vunpack.c.3.s8 %v267_v30  ;;  %v334_v14 = vcvt.s32.f32 %v286_v21  ;;  %1763 = vpow2.f32 %v934_v53 }
 0x13e   : > { %v1056_v45 = vadd.f32 %v1055_v27, %v2417_v15  ;;  %v1756_v44 = vpop.eup %1755  ;;  %v936_v51 = vmul.f32 1.442695, %v2834_v33  ;;  %v2442_v19 = vmul.f32 %v1754_v41, %v332_v24  ;;  %v2835_v43 = vsub.f32 %v2174_v59, %v2334_v54 }
 0x13f   : > { %v335_v38 = vcvt.s32.f32 %v287_v2  ;;  %v289_v35 = vunpack.c.0.s8 %v268_v13  ;;  %v2836_v30 = vsub.f32 %v2199_v25, %v2334_v54  ;;  %v336_v24 = vcvt.s32.f32 %v288_v63 }
 0x140   : > { %v1057_v57 = vadd.f32 %v1056_v45, %v2423_v3  ;;  %v1758_v27 = vpop.eup %1757  ;;  %v938_v42 = vmul.f32 1.442695, %v2835_v43  ;;  %v2448_v45 = vmul.f32 %v1756_v44, %v333_v46  ;;  %1765 = vpow2.f32 %v936_v51  ;;  %v269_v51 = vld [vmem:[%s2401_s26 + $0x20] sm:$0xff] }
 0x141   : > { %v1760_v7 = vpop.eup %1759  ;;  %v940_v40 = vmul.f32 1.442695, %v2836_v30  ;;  %v290_v21 = vunpack.c.1.s8 %v268_v13  ;;  %v880_v4 = vsub.f32 %v2214_v1, %v2334_v54  ;;  %v2837_v53 = vsub.f32 %v2197_v23, %v2334_v54 }
 0x142   : > { %v1058_v20 = vadd.f32 %v1057_v57, %v2429_v26  ;;  %v2454_v57 = vmul.f32 %v1758_v27, %v334_v14  ;;  %v1762_v41 = vpop.eup %1761  ;;  %1767 = vpow2.f32 %v938_v42  ;;  %v291_v2 = vunpack.c.2.s8 %v268_v13 }
 0x143   : > { %v942_v46 = vmul.f32 1.442695, %v2837_v53  ;;  %v2462_v44 = vmul.f32 %v1760_v7, %v335_v38  ;;  %v1764_v33 = vpop.eup %1763  ;;  %v881_v63 = vsub.f32 %v2249_v10, %v2334_v54  ;;  %1769 = vpow2.f32 %v940_v40 }
 0x144   : > { %v1059_v8 = vadd.f32 %v1058_v20, %v2435_v49  ;;  %v337_v20 = vcvt.s32.f32 %v289_v35  ;;  %v2838_v1 = vsub.f32 %v2190_v9, %v2334_v54  ;;  %v292_v27 = vunpack.c.3.s8 %v268_v13 }
 0x145   : > { %v2471_v23 = vmul.f32 %v1762_v41, %v336_v24  ;;  %v882_v38 = vsub.f32 %v2229_v31, %v2334_v54  ;;  %1771 = vpow2.f32 %v942_v46  ;;  %v946_v35 = vmul.f32 1.442695, %v880_v4 }
 0x146   : > { %v1060_v58 = vadd.f32 %v1059_v8, %v2442_v19  ;;  %v944_v14 = vmul.f32 1.442695, %v2838_v1  ;;  %v338_v8 = vcvt.s32.f32 %v290_v21  ;;  %v1766_v42 = vpop.eup %1765  ;;  %v293_v7 = vunpack.c.0.s8 %v269_v51 }
 0x147   : > { %v2476_v10 = vmul.f32 %v1764_v33, %v337_v20  ;;  %v883_v13 = vsub.f32 %v2218_v5, %v2334_v54  ;;  %v948_v40 = vmul.f32 1.442695, %v881_v63  ;;  %v294_v24 = vunpack.c.1.s8 %v269_v51  ;;  %v270_v33 = vld [vmem:[%s2401_s26 + $0x28] sm:$0xff] }
 0x148   : > { %v1061_v59 = vadd.f32 %v1060_v58, %v2448_v45  ;;  %v339_v58 = vcvt.s32.f32 %v291_v2  ;;  %v1768_v9 = vpop.eup %1767  ;;  %1773 = vpow2.f32 %v944_v14  ;;  %v340_v21 = vcvt.s32.f32 %v292_v27 }
 0x149   : > { %v1770_v41 = vpop.eup %1769  ;;  %v884_v4 = vsub.f32 %v2221_v11, %v2334_v54  ;;  %1775 = vpow2.f32 %v946_v35  ;;  %v950_v53 = vmul.f32 1.442695, %v882_v38  ;;  %v341_v46 = vcvt.s32.f32 %v293_v7 }
 0x14a   : > { %v1062_v25 = vadd.f32 %v1061_v59, %v2454_v57  ;;  %v2481_v59 = vmul.f32 %v1766_v42, %v338_v8  ;;  %v295_v2 = vunpack.c.2.s8 %v269_v51  ;;  %v2486_v20 = vmul.f32 %v1768_v9, %v339_v58 }
 0x14b   : > { %v885_v63 = vsub.f32 %v2276_v50, %v2334_v54  ;;  %1777 = vpow2.f32 %v948_v40  ;;  %v952_v1 = vmul.f32 1.442695, %v883_v13  ;;  %v342_v14 = vcvt.s32.f32 %v294_v24 }
 0x14c   : > { %v1063_v43 = vadd.f32 %v1062_v25, %v2462_v44  ;;  %2839 = vst [vmem:[#allocation8_spill] sm:$0xff] %v2481_v59  ;;  %v1772_v25 = vpop.eup %1771  ;;  %v296_v8 = vunpack.c.3.s8 %v269_v51  ;;  %v2492_v27 = vmul.f32 %v1770_v41, %v340_v21  ;;  %v886_v42 = vsub.f32 %v2245_v55, %v2334_v54 }
 0x14d   : > { %2840 = vst [vmem:[#allocation9_spill] sm:$0xff] %v2486_v20  ;;  %1779 = vpow2.f32 %v950_v53  ;;  %v954_v38 = vmul.f32 1.442695, %v884_v4  ;;  %v297_v35 = vunpack.c.0.s8 %v270_v33  ;;  %v343_v58 = vcvt.s32.f32 %v295_v2 }
 0x14e   : > { %v1064_v30 = vadd.f32 %v1063_v43, %v2471_v23  ;;  %2841 = vst [vmem:[#allocation10_spill] sm:$0xff] %v2492_v27  ;;  %v1774_v43 = vpop.eup %1773  ;;  %v2497_v7 = vmul.f32 %v1772_v25, %v341_v46  ;;  %v887_v51 = vsub.f32 %v2224_v16, %v2334_v54  ;;  %1781 = vpow2.f32 %v952_v1 }
 0x14f   : > { %v956_v9 = vmul.f32 1.442695, %v885_v63  ;;  %v344_v13 = vcvt.s32.f32 %v296_v8  ;;  %v298_v40 = vunpack.c.1.s8 %v270_v33  ;;  %v2502_v24 = vmul.f32 %v1774_v43, %v342_v14 }
 0x150   : > { %v1065_v31 = vadd.f32 %v1064_v30, %v2476_v10  ;;  %v1776_v30 = vpop.eup %1775  ;;  %1783 = vpow2.f32 %v954_v38  ;;  %v958_v41 = vmul.f32 1.442695, %v886_v42  ;;  %v345_v4 = vcvt.s32.f32 %v297_v35 }
 0x151   : > { %v1778_v21 = vpop.eup %1777  ;;  %v299_v53 = vunpack.c.2.s8 %v270_v33  ;;  %v2507_v46 = vmul.f32 %v1776_v30, %v343_v58  ;;  %v889_v25 = vsub.f32 %v2280_v56, %v2334_v54  ;;  %1785 = vpow2.f32 %v956_v9 }
 0x152   : > { %v1066_v5 = vadd.f32 %v1065_v31, %v2481_v59  ;;  %v888_v31 = vsub.f32 %v2236_v48, %v2334_v54  ;;  %v960_v63 = vmul.f32 1.442695, %v887_v51  ;;  %v300_v1 = vunpack.c.3.s8 %v270_v33  ;;  %v2842_v33 = vld [vmem:[#allocation4_spill] sm:$0xff] }
 0x153   : > { %v1780_v2 = vpop.eup %1779  ;;  %v346_v14 = vcvt.s32.f32 %v298_v40  ;;  %v2513_v8 = vmul.f32 %v1778_v21, %v344_v13  ;;  %v890_v43 = vsub.f32 %v2253_v12, %v2334_v54  ;;  %1787 = vpow2.f32 %v958_v41  ;;  %v2843_v21 = vld [vmem:[#allocation3_spill] sm:$0xff] }
 0x154   : > { %v1067_v11 = vadd.f32 %v1066_v5, %v2486_v20  ;;  %v271_v5 = vld [vmem:[%s2401_s26 + $0x30] sm:$0xff]  ;;  %v962_v42 = vmul.f32 1.442695, %v888_v31  ;;  %v347_v38 = vcvt.s32.f32 %v299_v53  ;;  %v2518_v58 = vmul.f32 %v1780_v2, %v345_v4 }
 0x155   : > { %v301_v35 = vunpack.c.0.s8 %v271_v5  ;;  %v891_v30 = vsub.f32 %v2842_v33, %v2334_v54  ;;  %1789 = vpow2.f32 %v960_v63  ;;  %v964_v51 = vmul.f32 1.442695, %v889_v25  ;;  %v272_v25 = vld [vmem:[%s2401_s26 + $0x38] sm:$0xff] }
 0x156   : > { %v1068_v50 = vadd.f32 %v1067_v11, %v2492_v27  ;;  %v1782_v11 = vpop.eup %1781  ;;  %v348_v9 = vcvt.s32.f32 %v300_v1  ;;  %v302_v13 = vunpack.c.1.s8 %v271_v5  ;;  %v892_v31 = vsub.f32 %v2843_v21, %v2334_v54  ;;  %v2844_v1 = vld [vmem:[#allocation6_spill] sm:$0xff] }
 0x157   : > { %v2523_v40 = vmul.f32 %v1782_v11, %v346_v14  ;;  %1791 = vpow2.f32 %v962_v42  ;;  %v966_v41 = vmul.f32 1.442695, %v890_v43  ;;  %v303_v4 = vunpack.c.2.s8 %v271_v5 }
 0x158   : > { %v1069_v55 = vadd.f32 %v1068_v50, %v2497_v7  ;;  %v1784_v50 = vpop.eup %1783  ;;  %v349_v53 = vcvt.s32.f32 %v301_v35  ;;  %v893_v14 = vsub.f32 %v2844_v1, %v2334_v54  ;;  %1793 = vpow2.f32 %v964_v51  ;;  %v2845_v35 = vld [vmem:[#allocation5_spill] sm:$0xff] }
 0x159   : > { %v350_v11 = vcvt.s32.f32 %v302_v13  ;;  %1795 = vpow2.f32 %v966_v41  ;;  %v305_v21 = vunpack.c.0.s8 %v272_v25  ;;  %v306_v51 = vunpack.c.1.s8 %v272_v25 }
 0x15a   : > { %v1070_v16 = vadd.f32 %v1069_v55, %v2502_v24  ;;  %v1786_v55 = vpop.eup %1785 }
 0x15b   : > { %v1788_v63 = vpop.eup %1787  ;;  %v2534_v33 = vmul.f32 %v1786_v55, %v348_v9 }
 0x15c   : > { %v1071_v48 = vadd.f32 %v1070_v16, %v2507_v46  ;;  %v2528_v16 = vmul.f32 %v1784_v50, %v347_v38  ;;  %v1790_v43 = vpop.eup %1789  ;;  %v894_v38 = vsub.f32 %v2845_v35, %v2334_v54  ;;  %v970_v50 = vmul.f32 1.442695, %v892_v31 }
 0x15d   : > { %v2539_v27 = vmul.f32 %v1788_v63, %v349_v53  ;;  %v2542_v13 = vmul.f32 %v1790_v43, %v350_v11  ;;  %v353_v31 = vcvt.s32.f32 %v305_v21  ;;  %v2847_v11 = vsub.f32 %v2260_v39, %v2334_v54 }
 0x15e   : > { %v1072_v56 = vadd.f32 %v1071_v48, %v2513_v8  ;;  %v968_v48 = vmul.f32 1.442695, %v891_v30  ;;  %v1792_v30 = vpop.eup %1791  ;;  %v974_v41 = vmul.f32 1.442695, %v894_v38  ;;  %v354_v43 = vcvt.s32.f32 %v306_v51 }
 0x15f   : > { %v2848_v21 = vsub.f32 %v2258_v18, %v2334_v54  ;;  %v2851_v18 = vsub.f32 %v2289_v47, %v2334_v54 }
 0x160   : > { %v1073_v12 = vadd.f32 %v1072_v56, %v2518_v58  ;;  %v304_v56 = vunpack.c.3.s8 %v271_v5  ;;  %1797 = vpow2.f32 %v968_v48  ;;  %v972_v5 = vmul.f32 1.442695, %v893_v14  ;;  %v2846_v48 = vld [vmem:[#allocation7_spill] sm:$0xff] }
 0x161   : > { %1799 = vpow2.f32 %v970_v50  ;;  %v897_v14 = vsub.f32 %v2846_v48, %v2334_v54 }
 0x162   : > { %v1074_v2 = vadd.f32 %v1073_v12, %v2523_v40  ;;  %v351_v12 = vcvt.s32.f32 %v303_v4  ;;  %v352_v9 = vcvt.s32.f32 %v304_v56  ;;  %v307_v4 = vunpack.c.2.s8 %v272_v25 }
 0x163   : > { %1801 = vpow2.f32 %v972_v5  ;;  %v976_v56 = vmul.f32 1.442695, %v2847_v11 }
 0x164   : > { %v1075_v42 = vadd.f32 %v1074_v2, %v2528_v16  ;;  %v1794_v2 = vpop.eup %1793  ;;  %v2545_v35 = vmul.f32 %v1792_v30, %v351_v12  ;;  %1803 = vpow2.f32 %v974_v41  ;;  %v978_v30 = vmul.f32 1.442695, %v2848_v21 }
 0x165   : > { %v1796_v63 = vpop.eup %1795  ;;  %v2554_v50 = vmul.f32 %v1794_v2, %v352_v9  ;;  %1805 = vpow2.f32 %v976_v56 }
 0x166   : > { %v1076_v1 = vadd.f32 %v1075_v42, %v2534_v33  ;;  %v273_v42 = vld [vmem:[%s2401_s26 + $0x40] sm:$0xff]  ;;  %v1798_v12 = vpop.eup %1797  ;;  %v2560_v48 = vmul.f32 %v1796_v63, %v353_v31  ;;  %1807 = vpow2.f32 %v978_v30 }
 0x167   : > { %v309_v20 = vunpack.c.0.s8 %v273_v42  ;;  %v1800_v39 = vpop.eup %1799  ;;  %v310_v51 = vunpack.c.1.s8 %v273_v42  ;;  %v2563_v2 = vmul.f32 %v1798_v12, %v354_v43  ;;  %v311_v31 = vunpack.c.2.s8 %v273_v42 }
 0x168   : > { %v1077_v55 = vadd.f32 %v1076_v1, %v2539_v27  ;;  %v308_v1 = vunpack.c.3.s8 %v272_v25  ;;  %2849 = vst [vmem:[#allocation4_spill] sm:$0xff] %v2560_v48  ;;  %v980_v25 = vmul.f32 1.442695, %v897_v14  ;;  %v274_v14 = vld [vmem:[%s2401_s26 + $0x48] sm:$0xff]  ;;  %v2853_v43 = vsub.f32 %v2287_v6, %v2334_v54 }
 0x169   : > { %2850 = vst [vmem:[#allocation3_spill] sm:$0xff] %v2563_v2  ;;  %v357_v63 = vcvt.s32.f32 %v309_v20  ;;  %v312_v12 = vunpack.c.3.s8 %v273_v42  ;;  %v358_v21 = vcvt.s32.f32 %v310_v51  ;;  %v2855_v20 = vsub.f32 %v2263_v29, %v2334_v54 }
 0x16a   : > { %v1078_v53 = vadd.f32 %v1077_v55, %v2542_v13  ;;  %v355_v55 = vcvt.s32.f32 %v307_v4  ;;  %v356_v9 = vcvt.s32.f32 %v308_v1  ;;  %v982_v4 = vmul.f32 1.442695, %v2851_v18 }
 0x16b   : > { %1809 = vpow2.f32 %v980_v25  ;;  %v984_v1 = vmul.f32 1.442695, %v2853_v43  ;;  %v2856_v42 = vsub.f32 %v2306_v32, %v2334_v54 }
 0x16c   : > { %v1079_v38 = vadd.f32 %v1078_v53, %v2545_v35  ;;  %v1802_v53 = vpop.eup %1801  ;;  %v2569_v11 = vmul.f32 %v1800_v39, %v355_v55  ;;  %1811 = vpow2.f32 %v982_v4  ;;  %v986_v55 = vmul.f32 1.442695, %v2855_v20  ;;  %v275_v20 = vld [vmem:[%s2401_s26 + $0x50] sm:$0xff] }
 0x16d   : > { %v1804_v56 = vpop.eup %1803  ;;  %v2576_v30 = vmul.f32 %v1802_v53, %v356_v9  ;;  %v359_v39 = vcvt.s32.f32 %v311_v31  ;;  %1813 = vpow2.f32 %v984_v1  ;;  %v988_v51 = vmul.f32 1.442695, %v2856_v42 }
 0x16e   : > { %v1080_v5 = vadd.f32 %v1079_v38, %v2554_v50  ;;  %2852 = vst [vmem:[#allocation6_spill] sm:$0xff] %v2569_v11  ;;  %v2582_v18 = vmul.f32 %v1804_v56, %v357_v63  ;;  %v360_v9 = vcvt.s32.f32 %v312_v12  ;;  %v314_v53 = vunpack.c.1.s8 %v274_v14 }
 0x16f   : > { %2854 = vst [vmem:[#allocation5_spill] sm:$0xff] %v2576_v30  ;;  %1815 = vpow2.f32 %v986_v55  ;;  %v2857_v31 = vsub.f32 %v2304_v60, %v2334_v54  ;;  %v315_v56 = vunpack.c.2.s8 %v274_v14  ;;  %v2858_v12 = vsub.f32 %v2293_v62, %v2334_v54 }
 0x170   : > { %v1081_v41 = vadd.f32 %v1080_v5, %v2560_v48  ;;  %v1806_v5 = vpop.eup %1805  ;;  %1817 = vpow2.f32 %v988_v51 }
 0x171   : > { %v1808_v6 = vpop.eup %1807  ;;  %v2588_v4 = vmul.f32 %v1806_v5, %v358_v21  ;;  %v990_v63 = vmul.f32 1.442695, %v2857_v31  ;;  %v992_v21 = vmul.f32 1.442695, %v2858_v12  ;;  %v362_v5 = vcvt.s32.f32 %v314_v53 }
 0x172   : > { %v1082_v38 = vadd.f32 %v1081_v41, %v2563_v2  ;;  %v313_v41 = vunpack.c.0.s8 %v274_v14  ;;  %v318_v53 = vunpack.c.1.s8 %v275_v20  ;;  %v319_v12 = vunpack.c.2.s8 %v275_v20 }
 0x173   : > { %1819 = vpow2.f32 %v990_v63 }
 0x174   : > { %v1083_v47 = vadd.f32 %v1082_v38, %v2569_v11  ;;  %v1810_v38 = vpop.eup %1809  ;;  %v361_v43 = vcvt.s32.f32 %v313_v41  ;;  %1821 = vpow2.f32 %v992_v21 }
 0x175   : > { %v1812_v32 = vpop.eup %1811  ;;  %v2601_v55 = vmul.f32 %v1810_v38, %v360_v9 }
 0x176   : > { %v1084_v25 = vadd.f32 %v1083_v47, %v2576_v30  ;;  %v2594_v47 = vmul.f32 %v1808_v6, %v359_v39  ;;  %v1814_v42 = vpop.eup %1813  ;;  %v2859_v39 = vsub.f32 %v2319_v52, %v2334_v54  ;;  %v363_v6 = vcvt.s32.f32 %v315_v56 }
 0x177   : > { %v2607_v31 = vmul.f32 %v1812_v32, %v361_v43  ;;  %v1816_v62 = vpop.eup %1815  ;;  %v2613_v63 = vmul.f32 %v1814_v42, %v362_v5  ;;  %v2861_v56 = vsub.f32 %v2309_v0, %v2334_v54  ;;  %v2862_v5 = vsub.f32 %v2330_v34, %v2334_v54 }
 0x178   : > { %v1085_v29 = vadd.f32 %v1084_v25, %v2582_v18  ;;  %v316_v25 = vunpack.c.3.s8 %v274_v14  ;;  %v994_v41 = vmul.f32 1.442695, %v2859_v39  ;;  %v2860_v14 = vsub.f32 %v2317_v61, %v2334_v54  ;;  %v276_v39 = vld [vmem:[%s2401_s26 + $0x58] sm:$0xff] }
 0x179   : > { %v998_v43 = vmul.f32 1.442695, %v2861_v56  ;;  %v366_v42 = vcvt.s32.f32 %v318_v53 }
 0x17a   : > { %v1086_v1 = vadd.f32 %v1085_v29, %v2588_v4  ;;  %v317_v29 = vunpack.c.0.s8 %v275_v20  ;;  %v996_v9 = vmul.f32 1.442695, %v2860_v14  ;;  %v364_v38 = vcvt.s32.f32 %v316_v25 }
 0x17b   : > { %1823 = vpow2.f32 %v994_v41  ;;  %v1000_v25 = vmul.f32 1.442695, %v2862_v5 }
 0x17c   : > { %v1087_v60 = vadd.f32 %v1086_v1, %v2594_v47  ;;  %v1818_v1 = vpop.eup %1817  ;;  %v365_v32 = vcvt.s32.f32 %v317_v29  ;;  %1825 = vpow2.f32 %v996_v9 }
 0x17d   : > { %v1820_v61 = vpop.eup %1819  ;;  %v2626_v41 = vmul.f32 %v1818_v1, %v364_v38  ;;  %1827 = vpow2.f32 %v998_v43  ;;  %v322_v38 = vunpack.c.1.s8 %v276_v39 }
 0x17e   : > { %v1088_v51 = vadd.f32 %v1087_v60, %v2601_v55  ;;  %v2619_v60 = vmul.f32 %v1816_v62, %v363_v6  ;;  %v1822_v14 = vpop.eup %1821  ;;  %v2863_v6 = vsub.f32 %v2328_v17, %v2334_v54  ;;  %v321_v62 = vunpack.c.0.s8 %v276_v39 }
 0x17f   : > { %v1046_v56 = vmul.f32 %v1820_v61, %v365_v32  ;;  %1829 = vpow2.f32 %v1000_v25  ;;  %v1047_v1 = vmul.f32 %v1822_v14, %v366_v42  ;;  %v323_v17 = vunpack.c.2.s8 %v276_v39 }
 0x180   : > { %v1089_v52 = vadd.f32 %v1088_v51, %v2607_v31  ;;  %v320_v51 = vunpack.c.3.s8 %v275_v20  ;;  %v1002_v29 = vmul.f32 1.442695, %v2863_v6  ;;  %v2864_v20 = vsub.f32 %v2321_v28, %v2334_v54 }
 0x181   : > { %v1824_v34 = vpop.eup %1823  ;;  %v369_v5 = vcvt.s32.f32 %v321_v62  ;;  %v324_v32 = vunpack.c.3.s8 %v276_v39  ;;  %v370_v61 = vcvt.s32.f32 %v322_v38  ;;  %v371_v59 = vcvt.s32.f32 %v323_v17 }
 0x182   : > { %v1090_v21 = vadd.f32 %v1089_v52, %v2613_v63  ;;  %v367_v52 = vcvt.s32.f32 %v319_v12  ;;  %v1004_v9 = vmul.f32 1.442695, %v2864_v20  ;;  %v368_v53 = vcvt.s32.f32 %v320_v51  ;;  %v1826_v43 = vpop.eup %1825 }
 0x183   : > { %1831 = vpow2.f32 %v1002_v29  ;;  %v1828_v12 = vpop.eup %1827  ;;  %v372_v20 = vcvt.s32.f32 %v324_v32 }
 0x184   : > { %v1091_v0 = vadd.f32 %v1090_v21, %v2619_v60  ;;  %v1048_v6 = vmul.f32 %v1824_v34, %v367_v52  ;;  %1833 = vpow2.f32 %v1004_v9  ;;  %v1050_v54 = vmul.f32 %v1828_v12, %v369_v5 }
 0x185   : > { %v1830_v2 = vpop.eup %1829 }
 0x186   : > { %v1092_v30 = vadd.f32 %v1091_v0, %v2626_v41  ;;  %v1049_v0 = vmul.f32 %v1826_v43, %v368_v53  ;;  %v1051_v42 = vmul.f32 %v1830_v2, %v370_v61 }
 0x188   : > { %v1093_v21 = vadd.f32 %v1092_v30, %v1046_v56 }
 0x189   : > { %v1832_v51 = vpop.eup %1831 }
 0x18a   : > { %v1094_v11 = vadd.f32 %v1093_v21, %v1047_v1  ;;  %v1834_v14 = vpop.eup %1833  ;;  %v1052_v29 = vmul.f32 %v1832_v51, %v371_v59 }
 0x18b   : > { %v1053_v48 = vmul.f32 %v1834_v14, %v372_v20 }
 0x18c   : > { %v1095_v25 = vadd.f32 %v1094_v11, %v1048_v6 }
 0x18e   : > { %v1096_v28 = vadd.f32 %v1095_v25, %v1049_v0 }
 0x190   : > { %v1097_v30 = vadd.f32 %v1096_v28, %v1050_v54 }
 0x192   : > { %v1098_v62 = vadd.f32 %v1097_v30, %v1051_v42 }
 0x194   : > { %v1099_v52 = vadd.f32 %v1098_v62, %v1052_v29 }
 0x196   : > { %v1100_v34 = vadd.f32 %v1099_v52, %v1053_v48 }
 0x198   : > { %v1101_v21 = vrot.slane %v1100_v34, 4 }
 0x19a   : > { %v1102_v9 = vadd.f32 %v1101_v21, %v1100_v34 }
 0x19c   : > { %v1103_v39 = vrot.slane %v1102_v9, 2 }
 0x19e   : > { %v1104_v38 = vadd.f32 %v1103_v39, %v1102_v9 }
 0x1a0   : > { %v1105_v53 = vrot.slane %v1104_v38, 1 }
 0x1a2   : > { %v1106_v11 = vadd.f32 %v1105_v53, %v1104_v38 }
 0x1a4   : > { %v1107_v43 = vmax.f32 %v1106_v11, 1e-30  ;;  %v2865_v11 = vld [vmem:[#allocation4_spill] sm:$0xff] }
 0x1a6   : > { %1835 = vrcp.f32 %v1107_v43 }
 0x1ac   : > { %v1836_v5 = vpop.eup %1835 }
 0x1ad   : > { %v1109_v17 = vmul.f32 %v1836_v5, %v1107_v43  ;;  %v2866_v43 = vld [vmem:[#allocation8_spill] sm:$0xff] }
 0x1af   : > { %v1110_v12 = vsub.f32 2.0, %v1109_v17  ;;  %v2867_v17 = vld [vmem:[#allocation3_spill] sm:$0xff] }
 0x1b1   : > { %v2636_v32 = vmul.f32 %v1836_v5, %v1110_v12  ;;  %v2868_v12 = vld [vmem:[#allocation9_spill] sm:$0xff] }
 0x1b3   : > { %v1144_v59 = vmul.f32 %v2636_v32, %v2582_v18  ;;  %v1112_v2 = vmul.f32 %v2636_v32, %v2405_v36  ;;  %v1128_v61 = vmul.f32 %v2636_v32, %v2497_v7  ;;  %v1145_v25 = vmul.f32 %v2636_v32, %v2588_v4 }
 0x1b4   : > { %v1146_v28 = vmul.f32 %v2636_v32, %v2594_v47  ;;  %v1147_v20 = vmul.f32 %v2636_v32, %v2601_v55  ;;  %v1148_v18 = vmul.f32 %v2636_v32, %v2607_v31  ;;  %v1149_v36 = vmul.f32 %v2636_v32, %v2613_v63 }
 0x1b5   : > { %1224 = vxpose.xlu1.b32.start [1/16] %v1144_v59, 128  ;;  %v1626_v51 = vpack.i.bf16 %v1128_v61, %v1112_v2  ;;  %v1150_v7 = vmul.f32 %v2636_v32, %v2619_v60  ;;  %v1113_v4 = vmul.f32 %v2636_v32, %v2407_v37  ;;  %v1129_v47 = vmul.f32 %v2636_v32, %v2502_v24  ;;  %v2869_v2 = vld [vmem:[#allocation6_spill] sm:$0xff] }
 0x1b6   : > { %v1151_v30 = vmul.f32 %v2636_v32, %v2626_v41  ;;  %v1152_v55 = vmul.f32 %v2636_v32, %v1046_v56  ;;  %v1153_v31 = vmul.f32 %v2636_v32, %v1047_v1  ;;  %v1154_v14 = vmul.f32 %v2636_v32, %v1048_v6 }
 0x1b7   : > { %1627 = vxpose.xlu0.b32.start [1/16] %v1626_v51, 128  ;;  %v1628_v63 = vpack.i.bf16 %v1129_v47, %v1113_v4  ;;  %v1155_v62 = vmul.f32 %v2636_v32, %v1049_v0  ;;  %v1156_v60 = vmul.f32 %v2636_v32, %v1050_v54  ;;  %v1157_v37 = vmul.f32 %v2636_v32, %v1051_v42  ;;  %v2871_v51 = vld [vmem:[#allocation5_spill] sm:$0xff] }
 0x1b8   : > { %v2669_v24 = vmul.f32 %v2636_v32, %v1052_v29  ;;  %v1114_v41 = vmul.f32 %v2636_v32, %v2409_v22  ;;  %v1130_v56 = vmul.f32 %v2636_v32, %v2507_v46  ;;  %v2676_v1 = vmul.f32 %v2636_v32, %v1053_v48 }
 0x1b9   : > { %v1115_v0 = vmul.f32 %v2636_v32, %v2417_v15  ;;  %v1131_v54 = vmul.f32 %v2636_v32, %v2513_v8  ;;  %v1116_v22 = vmul.f32 %v2636_v32, %v2423_v3  ;;  %v1132_v46 = vmul.f32 %v2636_v32, %v2518_v58 }
 0x1ba   : > { %v1630_v6 = vpack.i.bf16 %v1130_v56, %v1114_v41  ;;  %v1117_v29 = vmul.f32 %v2636_v32, %v2429_v26  ;;  %v1133_v15 = vmul.f32 %v2636_v32, %v2523_v40  ;;  %v1118_v52 = vmul.f32 %v2636_v32, %v2435_v49 }
 0x1bb   : > { %v1632_v42 = vpack.i.bf16 %v1131_v54, %v1115_v0  ;;  %v1634_v48 = vpack.i.bf16 %v1132_v46, %v1116_v22  ;;  %v1134_v3 = vmul.f32 %v2636_v32, %v2528_v16  ;;  %v1119_v34 = vmul.f32 %v2636_v32, %v2442_v19 }
 0x1bc   : > { %v1636_v8 = vpack.i.bf16 %v1133_v15, %v1117_v29  ;;  %v1135_v26 = vmul.f32 %v2636_v32, %v2534_v33  ;;  %v1120_v21 = vmul.f32 %v2636_v32, %v2448_v45  ;;  %v1136_v49 = vmul.f32 %v2636_v32, %v2539_v27 }
 0x1bd   : > { %1225 = vxpose.xlu1.b32.cont [2/16] %v1145_v25, 128  ;;  %v1638_v58 = vpack.i.bf16 %v1134_v3, %v1118_v52  ;;  %v1121_v9 = vmul.f32 %v2636_v32, %v2454_v57  ;;  %v1137_v19 = vmul.f32 %v2636_v32, %v2542_v13  ;;  %v1122_v39 = vmul.f32 %v2636_v32, %v2462_v44  ;;  %v2870_v25 = vld [vmem:[#allocation10_spill] sm:$0xff] }
 0x1be   : > { %v1640_v40 = vpack.i.bf16 %v1135_v26, %v1119_v34  ;;  %v1642_v16 = vpack.i.bf16 %v1136_v49, %v1120_v21  ;;  %v1138_v45 = vmul.f32 %v2636_v32, %v2545_v35  ;;  %v1123_v38 = vmul.f32 %v2636_v32, %v2471_v23 }
 0x1bf   : > { %1629 = vxpose.xlu0.b32.cont [2/16] %v1628_v63, 128  ;;  %v1644_v33 = vpack.i.bf16 %v1137_v19, %v1121_v9  ;;  %v1139_v57 = vmul.f32 %v2636_v32, %v2554_v50  ;;  %v1124_v53 = vmul.f32 %v2636_v32, %v2476_v10  ;;  %v1140_v44 = vmul.f32 %v2636_v32, %v2865_v11 }
 0x1c0   : > { %v1646_v27 = vpack.i.bf16 %v1138_v45, %v1122_v39  ;;  %v1125_v5 = vmul.f32 %v2636_v32, %v2866_v43  ;;  %v1141_v23 = vmul.f32 %v2636_v32, %v2867_v17  ;;  %v1126_v59 = vmul.f32 %v2636_v32, %v2868_v12  ;;  %v1838_v17 = vld [vmem:[%s2814_s2 + $0x170] sm:$0xff] }
 0x1c1   : > { %v1648_v13 = vpack.i.bf16 %v1139_v57, %v1123_v38  ;;  %v1650_v35 = vpack.i.bf16 %v1140_v44, %v1124_v53  ;;  %v1142_v10 = vmul.f32 %v2636_v32, %v2869_v2  ;;  %v1841_v2 = vld [vmem:[%s2814_s2 + $0x158] sm:$0xff] }
 0x1c2   : > { %v1652_v50 = vpack.i.bf16 %v1141_v23, %v1125_v5  ;;  %v1837_v5 = vld [vmem:[%s2814_s2 + $0x178] sm:$0xff] }
 0x1c3   : > { %v1654_v61 = vpack.i.bf16 %v1142_v10, %v1126_v59  ;;  %v1840_v59 = vld [vmem:[%s2814_s2 + $0x160] sm:$0xff]  ;;  %v1842_v10 = vld [vmem:[%s2814_s2 + $0x150] sm:$0xff] }
 0x1c5   : > { %1226 = vxpose.xlu1.b32.cont [3/16] %v1146_v28, 128  ;;  %v1127_v28 = vmul.f32 %v2636_v32, %v2870_v25  ;;  %v1843_v25 = vld [vmem:[%s2814_s2 + $0x148] sm:$0xff] }
 0x1c7   : > { %1631 = vxpose.xlu0.b32.cont [3/16] %v1630_v6, 128 }
 0x1cd   : > { %1227 = vxpose.xlu1.b32.cont [4/16] %v1147_v20, 128  ;;  %v1143_v20 = vmul.f32 %v2636_v32, %v2871_v51  ;;  %v1844_v51 = vld [vmem:[%s2814_s2 + $0x140] sm:$0xff] }
 0x1cf   : > { %1633 = vxpose.xlu0.b32.cont [4/16] %v1632_v42, 128 }
 0x1d5   : > { %1228 = vxpose.xlu1.b32.cont [5/16] %v1148_v18, 128  ;;  %v1656_v18 = vpack.i.bf16 %v1143_v20, %v1127_v28  ;;  %v1845_v20 = vld [vmem:[%s2814_s2 + $0x138] sm:$0xff] }
 0x1d7   : > { %1635 = vxpose.xlu0.b32.cont [5/16] %v1634_v48, 128 }
 0x1dd   : > { %1229 = vxpose.xlu1.b32.cont [6/16] %v1149_v36, 128 }
 0x1df   : > { %1637 = vxpose.xlu0.b32.cont [6/16] %v1636_v8, 128 }
 0x1e5   : > { %1230 = vxpose.xlu1.b32.cont [7/16] %v1150_v7, 128 }
 0x1e7   : > { %1639 = vxpose.xlu0.b32.cont [7/16] %v1638_v58, 128 }
 0x1ed   : > { %1231 = vxpose.xlu1.b32.cont [8/16] %v1151_v30, 128 }
 0x1ef   : > { %1641 = vxpose.xlu0.b32.cont [8/16] %v1640_v40, 128 }
 0x1f5   : > { %1232 = vxpose.xlu1.b32.cont [9/16] %v1152_v55, 128 }
 0x1f7   : > { %1643 = vxpose.xlu0.b32.cont [9/16] %v1642_v16, 128 }
 0x1fd   : > { %1233 = vxpose.xlu1.b32.cont [10/16] %v1153_v31, 128 }
 0x1ff   : > { %1645 = vxpose.xlu0.b32.cont [10/16] %v1644_v33, 128 }
 0x205   : > { %1234 = vxpose.xlu1.b32.cont [11/16] %v1154_v14, 128 }
 0x207   : > { %1647 = vxpose.xlu0.b32.cont [11/16] %v1646_v27, 128 }
 0x20d   : > { %1235 = vxpose.xlu1.b32.cont [12/16] %v1155_v62, 128 }
 0x20f   : > { %1649 = vxpose.xlu0.b32.cont [12/16] %v1648_v13, 128 }
 0x215   : > { %1236 = vxpose.xlu1.b32.cont [13/16] %v1156_v60, 128 }
 0x217   : > { %1651 = vxpose.xlu0.b32.cont [13/16] %v1650_v35, 128 }
 0x21d   : > { %1237 = vxpose.xlu1.b32.cont [14/16] %v1157_v37, 128 }
 0x21f   : > { %1653 = vxpose.xlu0.b32.cont [14/16] %v1652_v50, 128  ;;  %v1839_v50 = vld [vmem:[%s2814_s2 + $0x168] sm:$0xff] }
 0x225   : > { %1238 = vxpose.xlu1.b32.cont [15/16] %v2669_v24, 128 }
 0x227   : > { %1655 = vxpose.xlu0.b32.cont [15/16] %v1654_v61, 128 }
 0x22d   : > { %1239 = vxpose.xlu1.b32.end [16/16] %v2676_v1, 128 }
 0x22f   : > { %1657 = vxpose.xlu0.b32.end [16/16] %v1656_v18, 128  ;;  %v1846_v18 = vld [vmem:[%s2814_s2 + $0x130] sm:$0xff] }
 0x259   : > { %v1240_v36 = vpop.trf.xlu1 }
 0x25a   : > { %1402 = vmatmul.f32.vlgmr.msra.gmra.mxu2 %v1240_v36 }
 0x25b   : > { %v1658_v7 = vpop.trf.xlu0 }
 0x25c   : > { %v1659_v4 = vunpack.i.l.bf16 %v1658_v7  ;;  %v1662_v47 = vunpack.i.h.bf16 %v1658_v7  ;;  %v1847_v7 = vld [vmem:[%s2814_s2 + $0x128] sm:$0xff] }
 0x25e   : > { %1272 = vmatmul.f32.vlgmr.msra.gmra.mxu0 %v1659_v4  ;;  %1337 = vmatmul.f32.vlgmr.msra.gmra.mxu1 %v1662_v47  ;;  %v1848_v47 = vld [vmem:[%s2814_s2 + $0x120] sm:$0xff] }
 0x261   : > { %v1241_v30 = vpop.trf.xlu1 }
 0x262   : > { %1405 = vmatmul.f32.gmra.mxu2 %v1241_v30  ;;  %v1849_v30 = vld [vmem:[%s2814_s2 + $0x118] sm:$0xff] }
 0x263   : > { %v1663_v55 = vpop.trf.xlu0 }
 0x264   : > { %v1664_v31 = vunpack.i.l.bf16 %v1663_v55  ;;  %v1667_v14 = vunpack.i.h.bf16 %v1663_v55  ;;  %v1850_v55 = vld [vmem:[%s2814_s2 + $0x110] sm:$0xff] }
 0x266   : > { %1275 = vmatmul.f32.gmra.mxu0 %v1664_v31  ;;  %1340 = vmatmul.f32.gmra.mxu1 %v1667_v14 }
 0x269   : > { %v1242_v63 = vpop.trf.xlu1 }
 0x26a   : > { %1408 = vmatmul.f32.gmra.mxu2 %v1242_v63  ;;  %v1851_v63 = vld [vmem:[%s2814_s2 + $0x108] sm:$0xff] }
 0x26b   : > { %v1668_v32 = vpop.trf.xlu0 }
 0x26c   : > { %v1669_v62 = vunpack.i.l.bf16 %v1668_v32  ;;  %v1672_v60 = vunpack.i.h.bf16 %v1668_v32 }
 0x26e   : > { %1278 = vmatmul.f32.gmra.mxu0 %v1669_v62  ;;  %1343 = vmatmul.f32.gmra.mxu1 %v1672_v60 }
 0x271   : > { %v1243_v37 = vpop.trf.xlu1 }
 0x272   : > { %1411 = vmatmul.f32.gmra.mxu2 %v1243_v37  ;;  %v1852_v37 = vld [vmem:[%s2814_s2 + $0x100] sm:$0xff] }
 0x273   : > { %v1673_v24 = vpop.trf.xlu0 }
 0x274   : > { %v1674_v41 = vunpack.i.l.bf16 %v1673_v24  ;;  %v1677_v56 = vunpack.i.h.bf16 %v1673_v24 }
 0x276   : > { %1281 = vmatmul.f32.gmra.mxu0 %v1674_v41  ;;  %1346 = vmatmul.f32.gmra.mxu1 %v1677_v56 }
 0x279   : > { %v1244_v1 = vpop.trf.xlu1 }
 0x27a   : > { %1414 = vmatmul.f32.gmra.mxu2 %v1244_v1 }
 0x27b   : > { %v1678_v6 = vpop.trf.xlu0 }
 0x27c   : > { %v1679_v0 = vunpack.i.l.bf16 %v1678_v6  ;;  %v1682_v54 = vunpack.i.h.bf16 %v1678_v6 }
 0x27e   : > { %1284 = vmatmul.f32.gmra.mxu0 %v1679_v0  ;;  %1349 = vmatmul.f32.gmra.mxu1 %v1682_v54 }
 0x281   : > { %v1245_v42 = vpop.trf.xlu1 }
 0x282   : > { %1417 = vmatmul.f32.gmra.mxu2 %v1245_v42 }
 0x283   : > { %v1683_v22 = vpop.trf.xlu0 }
 0x284   : > { %v1684_v46 = vunpack.i.l.bf16 %v1683_v22  ;;  %v1687_v48 = vunpack.i.h.bf16 %v1683_v22 }
 0x286   : > { %1287 = vmatmul.f32.gmra.mxu0 %v1684_v46  ;;  %1352 = vmatmul.f32.gmra.mxu1 %v1687_v48 }
 0x289   : > { %v1246_v29 = vpop.trf.xlu1 }
 0x28a   : > { %1420 = vmatmul.f32.gmra.mxu2 %v1246_v29 }
 0x28b   : > { %v1688_v15 = vpop.trf.xlu0 }
 0x28c   : > { %v1689_v8 = vunpack.i.l.bf16 %v1688_v15  ;;  %v1692_v52 = vunpack.i.h.bf16 %v1688_v15 }
 0x28e   : > { %1290 = vmatmul.f32.gmra.mxu0 %v1689_v8  ;;  %1355 = vmatmul.f32.gmra.mxu1 %v1692_v52 }
 0x291   : > { %v1247_v3 = vpop.trf.xlu1 }
 0x292   : > { %1423 = vmatmul.f32.gmra.mxu2 %v1247_v3 }
 0x293   : > { %v1693_v58 = vpop.trf.xlu0 }
 0x294   : > { %v1694_v34 = vunpack.i.l.bf16 %v1693_v58  ;;  %v1697_v26 = vunpack.i.h.bf16 %v1693_v58 }
 0x296   : > { %1293 = vmatmul.f32.gmra.mxu0 %v1694_v34  ;;  %1358 = vmatmul.f32.gmra.mxu1 %v1697_v26 }
 0x299   : > { %v1248_v40 = vpop.trf.xlu1 }
 0x29a   : > { %1426 = vmatmul.f32.gmra.mxu2 %v1248_v40 }
 0x29b   : > { %v1698_v21 = vpop.trf.xlu0 }
 0x29c   : > { %v1699_v49 = vunpack.i.l.bf16 %v1698_v21  ;;  %v1702_v16 = vunpack.i.h.bf16 %v1698_v21 }
 0x29e   : > { %1296 = vmatmul.f32.gmra.mxu0 %v1699_v49  ;;  %1361 = vmatmul.f32.gmra.mxu1 %v1702_v16 }
 0x2a1   : > { %v1249_v9 = vpop.trf.xlu1 }
 0x2a2   : > { %1429 = vmatmul.f32.gmra.mxu2 %v1249_v9 }
 0x2a3   : > { %v1703_v19 = vpop.trf.xlu0 }
 0x2a4   : > { %v1704_v33 = vunpack.i.l.bf16 %v1703_v19  ;;  %v1707_v39 = vunpack.i.h.bf16 %v1703_v19 }
 0x2a6   : > { %1299 = vmatmul.f32.gmra.mxu0 %v1704_v33  ;;  %1364 = vmatmul.f32.gmra.mxu1 %v1707_v39 }
 0x2a9   : > { %v1250_v45 = vpop.trf.xlu1 }
 0x2aa   : > { %1432 = vmatmul.f32.gmra.mxu2 %v1250_v45 }
 0x2ab   : > { %v1708_v27 = vpop.trf.xlu0 }
 0x2ac   : > { %v1709_v38 = vunpack.i.l.bf16 %v1708_v27  ;;  %v1712_v57 = vunpack.i.h.bf16 %v1708_v27 }
 0x2ae   : > { %1302 = vmatmul.f32.gmra.mxu0 %v1709_v38  ;;  %1367 = vmatmul.f32.gmra.mxu1 %v1712_v57 }
 0x2b1   : > { %v1251_v13 = vpop.trf.xlu1 }
 0x2b2   : > { %1435 = vmatmul.f32.gmra.mxu2 %v1251_v13 }
 0x2b3   : > { %v1713_v53 = vpop.trf.xlu0 }
 0x2b4   : > { %v1714_v11 = vunpack.i.l.bf16 %v1713_v53  ;;  %v1717_v44 = vunpack.i.h.bf16 %v1713_v53 }
 0x2b6   : > { %1305 = vmatmul.f32.gmra.mxu0 %v1714_v11  ;;  %1370 = vmatmul.f32.gmra.mxu1 %v1717_v44 }
 0x2b9   : > { %v1252_v34 = vpop.trf.xlu1 }
 0x2bb   : > { %v1718_v35 = vpop.trf.xlu0 }
 0x2bc   : > { %v1719_v43 = vunpack.i.l.bf16 %v1718_v35  ;;  %v1722_v62 = vunpack.i.h.bf16 %v1718_v35 }
 0x2be   : > { %1308 = vmatmul.f32.vlgmr.msra.gmra.mxu3 %v1719_v43 }
 0x2bf   : > { %1580 = vmatpush.msra.mxu3 %v1837_v5 }
 0x2c1   : > { %1581 = vmatpush.msra.mxu3 %v1838_v17  ;;  %v1253_v33 = vpop.trf.xlu1 }
 0x2c3   : > { %v1723_v23 = vpop.trf.xlu0  ;;  %1582 = vmatpush.msra.mxu3 %v1839_v50 }
 0x2c4   : > { %v1724_v12 = vunpack.i.l.bf16 %v1723_v23  ;;  %v1727_v6 = vunpack.i.h.bf16 %v1723_v23 }
 0x2c5   : > { %1583 = vmatpush.msra.mxu3 %v1840_v59 }
 0x2c6   : > { %1311 = vmatmul.f32.gmra.mxu3 %v1724_v12 }
 0x2c7   : > { %1584 = vmatpush.msra.mxu3 %v1841_v2 }
 0x2c9   : > { %1585 = vmatpush.msra.mxu3 %v1842_v10  ;;  %v1254_v13 = vpop.trf.xlu1 }
 0x2cb   : > { %v1728_v61 = vpop.trf.xlu0  ;;  %1586 = vmatpush.msra.mxu3 %v1843_v25 }
 0x2cc   : > { %v1729_v28 = vunpack.i.l.bf16 %v1728_v61  ;;  %v1732_v48 = vunpack.i.h.bf16 %v1728_v61 }
 0x2cd   : > { %1587 = vmatpush.msra.mxu3 %v1844_v51 }
 0x2ce   : > { %1314 = vmatmul.f32.gmra.mxu3 %v1729_v28 }
 0x2cf   : > { %1588 = vmatpush.msra.mxu3 %v1845_v20 }
 0x2d1   : > { %1589 = vmatpush.msra.mxu3 %v1846_v18  ;;  %v1255_v5 = vpop.trf.xlu1 }
 0x2d3   : > { %v1733_v36 = vpop.trf.xlu0  ;;  %1590 = vmatpush.msra.mxu3 %v1847_v7 }
 0x2d4   : > { %v1734_v4 = vunpack.i.l.bf16 %v1733_v36  ;;  %v1737_v58 = vunpack.i.h.bf16 %v1733_v36 }
 0x2d5   : > { %1591 = vmatpush.msra.mxu3 %v1848_v47 }
 0x2d6   : > { %1317 = vmatmul.f32.gmra.mxu3 %v1734_v4 }
 0x2d7   : > { %1592 = vmatpush.msra.mxu3 %v1849_v30 }
 0x2d9   : > { %1593 = vmatpush.msra.mxu3 %v1850_v55 }
 0x2db   : > { %v1273_v31 = vpop.f32.mrf.mxu0  ;;  %v1338_v14 = vpop.f32.mrf.mxu1  ;;  %1594 = vmatpush.msra.mxu3 %v1851_v63 }
 0x2dc   : > { %v1339_v32 = vadd.f32 %v1338_v14, %v1273_v31 }
 0x2dd   : > { %v1403_v60 = vpop.f32.mrf.mxu2  ;;  %1595 = vmatpush.msra.mxu3 %v1852_v37 }
 0x2de   : > { %v1404_v24 = vadd.f32 %v1403_v60, %v1339_v32  ;;  %1373 = vmatmul.f32.vlgmr.msrb.gmra.mxu3 %v1722_v62 }
 0x2e0   : > { %1451 = vst [vmem:[%s2781_s10] sm:$0xff] %v1404_v24 }
 0x2e3   : > { %v1276_v41 = vpop.f32.mrf.mxu0  ;;  %v1341_v56 = vpop.f32.mrf.mxu1 }
 0x2e4   : > { %v1342_v1 = vadd.f32 %v1341_v56, %v1276_v41 }
 0x2e5   : > { %v1406_v0 = vpop.f32.mrf.mxu2 }
 0x2e6   : > { %v1407_v54 = vadd.f32 %v1406_v0, %v1342_v1  ;;  %1376 = vmatmul.f32.gmra.mxu3 %v1727_v6 }
 0x2e8   : > { %1452 = vst [vmem:[%s2781_s10 + $0x8] sm:$0xff] %v1407_v54 }
 0x2eb   : > { %v1279_v42 = vpop.f32.mrf.mxu0  ;;  %v1344_v22 = vpop.f32.mrf.mxu1 }
 0x2ec   : > { %v1345_v46 = vadd.f32 %v1344_v22, %v1279_v42 }
 0x2ed   : > { %v1409_v29 = vpop.f32.mrf.mxu2 }
 0x2ee   : > { %v1410_v15 = vadd.f32 %v1409_v29, %v1345_v46  ;;  %1379 = vmatmul.f32.gmra.mxu3 %v1732_v48 }
 0x2f0   : > { %1453 = vst [vmem:[%s2781_s10 + $0x10] sm:$0xff] %v1410_v15 }
 0x2f3   : > { %v1282_v8 = vpop.f32.mrf.mxu0  ;;  %v1347_v52 = vpop.f32.mrf.mxu1 }
 0x2f4   : > { %v1348_v3 = vadd.f32 %v1347_v52, %v1282_v8 }
 0x2f5   : > { %v1412_v26 = vpop.f32.mrf.mxu2 }
 0x2f6   : > { %v1413_v40 = vadd.f32 %v1412_v26, %v1348_v3  ;;  %1382 = vmatmul.f32.gmra.mxu3 %v1737_v58 }
 0x2f8   : > { %1454 = vst [vmem:[%s2781_s10 + $0x18] sm:$0xff] %v1413_v40 }
 0x2fb   : > { %v1285_v21 = vpop.f32.mrf.mxu0  ;;  %v1350_v49 = vpop.f32.mrf.mxu1 }
 0x2fc   : > { %v1351_v16 = vadd.f32 %v1350_v49, %v1285_v21 }
 0x2fd   : > { %v1415_v9 = vpop.f32.mrf.mxu2 }
 0x2fe   : > { %v1416_v19 = vadd.f32 %v1415_v9, %v1351_v16  ;;  %1438 = vmatmul.f32.vlgmr.msra.gmra.mxu3 %v1252_v34 }
 0x300   : > { %1455 = vst [vmem:[%s2781_s10 + $0x20] sm:$0xff] %v1416_v19 }
 0x303   : > { %v1288_v39 = vpop.f32.mrf.mxu0  ;;  %v1353_v45 = vpop.f32.mrf.mxu1 }
 0x304   : > { %v1354_v27 = vadd.f32 %v1353_v45, %v1288_v39 }
 0x305   : > { %v1418_v38 = vpop.f32.mrf.mxu2 }
 0x306   : > { %v1419_v57 = vadd.f32 %v1418_v38, %v1354_v27  ;;  %1441 = vmatmul.f32.gmra.mxu3 %v1253_v33 }
 0x308   : > { %1456 = vst [vmem:[%s2781_s10 + $0x28] sm:$0xff] %v1419_v57 }
 0x30b   : > { %v1291_v53 = vpop.f32.mrf.mxu0  ;;  %v1356_v11 = vpop.f32.mrf.mxu1 }
 0x30c   : > { %v1357_v44 = vadd.f32 %v1356_v11, %v1291_v53 }
 0x30d   : > { %v1421_v35 = vpop.f32.mrf.mxu2 }
 0x30e   : > { %v1422_v43 = vadd.f32 %v1421_v35, %v1357_v44  ;;  %1444 = vmatmul.f32.gmra.mxu3 %v1254_v13 }
 0x310   : > { %1457 = vst [vmem:[%s2781_s10 + $0x30] sm:$0xff] %v1422_v43 }
 0x313   : > { %v1294_v17 = vpop.f32.mrf.mxu0  ;;  %v1359_v23 = vpop.f32.mrf.mxu1 }
 0x314   : > { %v1360_v50 = vadd.f32 %v1359_v23, %v1294_v17 }
 0x315   : > { %v1424_v12 = vpop.f32.mrf.mxu2 }
 0x316   : > { %v1425_v59 = vadd.f32 %v1424_v12, %v1360_v50  ;;  %1447 = vmatmul.f32.gmra.mxu3 %v1255_v5 }
 0x318   : > { %1458 = vst [vmem:[%s2781_s10 + $0x38] sm:$0xff] %v1425_v59 }
 0x31b   : > { %v1297_v2 = vpop.f32.mrf.mxu0  ;;  %v1362_v10 = vpop.f32.mrf.mxu1 }
 0x31c   : > { %v1363_v61 = vadd.f32 %v1362_v10, %v1297_v2 }
 0x31d   : > { %v1427_v25 = vpop.f32.mrf.mxu2 }
 0x31e   : > { %v1428_v28 = vadd.f32 %v1427_v25, %v1363_v61 }
 0x320   : > { %1459 = vst [vmem:[%s2781_s10 + $0x40] sm:$0xff] %v1428_v28 }
 0x323   : > { %v1300_v51 = vpop.f32.mrf.mxu0  ;;  %v1365_v20 = vpop.f32.mrf.mxu1 }
 0x324   : > { %v1366_v18 = vadd.f32 %v1365_v20, %v1300_v51 }
 0x325   : > { %v1430_v36 = vpop.f32.mrf.mxu2 }
 0x326   : > { %v1431_v7 = vadd.f32 %v1430_v36, %v1366_v18 }
 0x328   : > { %1460 = vst [vmem:[%s2781_s10 + $0x48] sm:$0xff] %v1431_v7 }
 0x32b   : > { %v1303_v4 = vpop.f32.mrf.mxu0  ;;  %v1368_v47 = vpop.f32.mrf.mxu1 }
 0x32c   : > { %v1369_v30 = vadd.f32 %v1368_v47, %v1303_v4 }
 0x32d   : > { %v1433_v55 = vpop.f32.mrf.mxu2 }
 0x32e   : > { %v1434_v31 = vadd.f32 %v1433_v55, %v1369_v30 }
 0x330   : > { %1461 = vst [vmem:[%s2781_s10 + $0x50] sm:$0xff] %v1434_v31 }
 0x333   : > { %v1306_v14 = vpop.f32.mrf.mxu0  ;;  %v1371_v63 = vpop.f32.mrf.mxu1 }
 0x334   : > { %v1372_v32 = vadd.f32 %v1371_v63, %v1306_v14 }
 0x335   : > { %v1436_v62 = vpop.f32.mrf.mxu2 }
 0x336   : > { %v1437_v60 = vadd.f32 %v1436_v62, %v1372_v32 }
 0x338   : > { %1462 = vst [vmem:[%s2781_s10 + $0x58] sm:$0xff] %v1437_v60 }
 0x341   : > { %v1309_v37 = vpop.f32.mrf.mxu3 }
 0x349   : > { %v1312_v24 = vpop.f32.mrf.mxu3 }
 0x351   : > { %v1315_v41 = vpop.f32.mrf.mxu3 }
 0x359   : > { %v1318_v56 = vpop.f32.mrf.mxu3 }
 0x361   : > { %v1374_v1 = vpop.f32.mrf.mxu3 }
 0x362   : > { %v1375_v42 = vadd.f32 %v1374_v1, %v1309_v37 }
 0x369   : > { %v1377_v6 = vpop.f32.mrf.mxu3 }
 0x36a   : > { %v1378_v48 = vadd.f32 %v1377_v6, %v1312_v24 }
 0x371   : > { %v1380_v0 = vpop.f32.mrf.mxu3 }
 0x372   : > { %v1381_v8 = vadd.f32 %v1380_v0, %v1315_v41 }
 0x379   : > { %v1383_v54 = vpop.f32.mrf.mxu3 }
 0x37a   : > { %v1384_v58 = vadd.f32 %v1383_v54, %v1318_v56 }
 0x381   : > { %v1439_v22 = vpop.f32.mrf.mxu3 }
 0x382   : > { %v1440_v46 = vadd.f32 %v1439_v22, %v1375_v42 }
 0x384   : > { %1463 = vst [vmem:[%s2781_s10 + $0x60] sm:$0xff] %v1440_v46 }
 0x389   : > { %v1442_v29 = vpop.f32.mrf.mxu3 }
 0x38a   : > { %v1443_v15 = vadd.f32 %v1442_v29, %v1378_v48 }
 0x38c   : > { %1464 = vst [vmem:[%s2781_s10 + $0x68] sm:$0xff] %v1443_v15 }
 0x391   : > { %v1445_v52 = vpop.f32.mrf.mxu3 }
 0x392   : > { %v1446_v3 = vadd.f32 %v1445_v52, %v1381_v8 }
 0x394   : > { %1465 = vst [vmem:[%s2781_s10 + $0x70] sm:$0xff] %v1446_v3 }
 0x399   : > { %v1448_v34 = vpop.f32.mrf.mxu3 }
 0x39a   : > { %v1449_v26 = vadd.f32 %v1448_v34, %v1384_v58 }
 0x39c   : > { %1466 = vst [vmem:[%s2781_s10 + $0x78] sm:$0xff] %v1449_v26 }
 0x39d PF: > { %p10_p10 = scmp.ge.s32.totalorder %s1917_s16, 5   ;;  %s2872_s12 = smov %s1871_s13 }
 0x39e   : > { %s2873_s13 = smov %s1926_s19  ;;  %s2874_s14 = smov %s1917_s16 }
 0x39f   :  { %12 = sbr.rel (!%p10_p10) target bundleno = 2 (0x2), region = 108 }

</bundles_post_ra>
